<compile_context>
chip_gen: v6e
topology: v6e:2x2x1
jax: 0.10.0
libtpu: 0.0.40
codegen_flags: <defaults>
</compile_context>

<pallas_src>
import functools
import math

import numpy as np
import jax
import jax.numpy as jnp
from jax.experimental import pallas as pl
from jax.experimental.pallas import tpu as pltpu

# ----------------------- module hyper-parameters ---------------------------
SAMPLE_RATE = 22050
N_FFT = 1024
HOP = 441
F_MIN = 30.0
F_MAX = 11000.0
N_MELS = 128
LOG_MULT = 1000.0
N_FREQS = N_FFT // 2 + 1          # 513 onesided bins
N_KEEP = 512                      # bins 0..511 (Nyquist bin is zero-weighted)
N_TAP2 = N_FFT - 2 * HOP          # 142 samples in the third conv tap
D2_K = 256                        # third tap zero-padded to a lane-aligned K
TF_MAX = 512                      # max frame-tile rows (MXU LHS height)


def _round_up(n, m):
    return ((n + m - 1) // m) * m


# ----------------------- deterministic "weights" (float64) ------------------
def _hz_to_mel_slaney(f):
    f = np.asarray(f, dtype=np.float64)
    f_sp = 200.0 / 3.0
    min_log_hz = 1000.0
    min_log_mel = min_log_hz / f_sp
    logstep = math.log(6.4) / 27.0
    return np.where(f >= min_log_hz,
                    min_log_mel + np.log(np.maximum(f, 1e-10) / min_log_hz) / logstep,
                    f / f_sp)


def _mel_to_hz_slaney(m):
    m = np.asarray(m, dtype=np.float64)
    f_sp = 200.0 / 3.0
    min_log_hz = 1000.0
    min_log_mel = min_log_hz / f_sp
    logstep = math.log(6.4) / 27.0
    return np.where(m >= min_log_mel,
                    min_log_hz * np.exp(logstep * (m - min_log_mel)),
                    f_sp * m)


def make_mel_fb_full():
    """torchaudio.functional.melscale_fbanks(513, 30, 11000, 128, 22050,
    norm=None, mel_scale='slaney') -> (n_freqs, n_mels), float64, unscaled."""
    all_freqs = np.linspace(0.0, SAMPLE_RATE // 2, N_FREQS)
    m_min = _hz_to_mel_slaney(F_MIN)
    m_max = _hz_to_mel_slaney(F_MAX)
    m_pts = np.linspace(m_min, m_max, N_MELS + 2)
    f_pts = _mel_to_hz_slaney(m_pts)
    f_diff = f_pts[1:] - f_pts[:-1]                        # (n_mels+1,)
    slopes = f_pts[None, :] - all_freqs[:, None]           # (n_freqs, n_mels+2)
    down = -slopes[:, :-2] / f_diff[:-1]
    up = slopes[:, 2:] / f_diff[1:]
    return np.maximum(0.0, np.minimum(down, up))           # (n_freqs, n_mels)


def make_dft_full():
    """Windowed, frame-length-normalized real/imag DFT (n_fft, n_freqs), float64."""
    n = np.arange(N_FFT, dtype=np.float64)[:, None]
    k = np.arange(N_FREQS, dtype=np.float64)[None, :]
    # torch.hann_window(n_fft, periodic=True)
    win = 0.5 - 0.5 * np.cos(2.0 * np.pi * np.arange(N_FFT, dtype=np.float64) / N_FFT)
    ang = 2.0 * np.pi * n * k / N_FFT
    norm = 1.0 / math.sqrt(N_FFT)                          # normalized='frame_length'
    cos_m = win[:, None] * np.cos(ang) * norm
    sin_m = win[:, None] * np.sin(ang) * norm
    return cos_m, sin_m


@functools.lru_cache(maxsize=None)
def _kernel_weights(dft_dtype_name):
    """Device-resident, cached kernel weights (built & uploaded once per dtype).

    Returns:
      d0 : (441, 1024)  fused [cos|sin] rows   0..440   (dft dtype)
      d1 : (441, 1024)  fused [cos|sin] rows 441..881   (dft dtype)
      d2 : (256, 1024)  fused [cos|sin] rows 882..1023, zero-padded to K=256
      mel: (512, 128)   1000 * mel_fb[:512, :]  (f32; log multiplier folded in)
    """
    dft_dtype = jnp.dtype(dft_dtype_name)

    fb = make_mel_fb_full()
    # Exactness guard: the trimmed Nyquist bin must carry zero mel weight
    # (true because f_max = 11000 Hz < Nyquist = 11025 Hz).
    assert np.all(fb[N_KEEP:, :] == 0.0), "trimmed frequency bins are not zero-weighted"
    mel_np = (LOG_MULT * fb[:N_KEEP, :]).astype(np.float32)

    cos_m, sin_m = make_dft_full()
    fused = np.concatenate([cos_m[:, :N_KEEP], sin_m[:, :N_KEEP]], axis=1)  # (1024, 1024)
    d0_np = fused[0:HOP]
    d1_np = fused[HOP:2 * HOP]
    d2_np = np.zeros((D2_K, 2 * N_KEEP), dtype=np.float64)
    d2_np[:N_TAP2] = fused[2 * HOP:]        # rows 142..255 stay zero (exact)

    def to_dev(a):
        return jnp.asarray(np.asarray(a, dtype=np.float32), dtype=dft_dtype)

    return to_dev(d0_np), to_dev(d1_np), to_dev(d2_np), jnp.asarray(mel_np)


# ------------------------------- kernel -------------------------------------
def logmel_kernel(xa_ref, xb_ref, xc_ref, d0_ref, d1_ref, d2_ref, mel_ref, out_ref):
    # 3-tap conv-as-matmul STFT: frame f = [x2d[f] | x2d[f+1] | x2d[f+2, :142]].
    acc = jnp.dot(xa_ref[...], d0_ref[...], preferred_element_type=jnp.float32)
    acc = acc + jnp.dot(xb_ref[...], d1_ref[...], preferred_element_type=jnp.float32)
    # Columns 142..255 of the third slab are real samples multiplied by zero
    # rows of d2, so the 256-wide (lane-aligned) slice is exact.
    xc_head = xc_ref[...][:, :D2_K]
    acc = acc + jnp.dot(xc_head, d2_ref[...], preferred_element_type=jnp.float32)

    re = acc[:, :N_KEEP]                                   # tile-aligned halves
    im = acc[:, N_KEEP:]
    mag = jnp.sqrt(re * re + im * im)                      # power=1 magnitude
    mel = jnp.dot(mag, mel_ref[...], preferred_element_type=jnp.float32)
    out_ref[...] = jnp.log1p(mel)                          # LOG_MULT folded into mel_ref


# ------------------------- jitted framing + pallas_call ---------------------
@functools.partial(jax.jit, static_argnames=("num_frames", "tf", "steps", "dft_dtype_name"))
def _log_mel_impl(x, d0, d1, d2, mel_fb, *, num_frames, tf, steps, dft_dtype_name):
    wav_dtype = jnp.dtype(dft_dtype_name)
    f_total = tf * steps

    # STFT framing prep (center=True, reflect padding) — no gather: reshape the
    # padded waveform to (rows, HOP) and take three row-shifted slabs.
    pad = N_FFT // 2
    xp = jnp.pad(x.astype(jnp.float32), (pad, pad), mode="reflect")
    need = (f_total + 2) * HOP
    if xp.shape[0] < need:
        xp = jnp.pad(xp, (0, need - xp.shape[0]))
    else:
        xp = xp[:need]                                     # never drops in-use samples
    x2d = xp.astype(wav_dtype).reshape(f_total + 2, HOP)
    xa = x2d[0:f_total]                                    # tap 0  (samples   0..440)
    xb = x2d[1:f_total + 1]                                # tap 1  (samples 441..881)
    xc = x2d[2:f_total + 2]                                # tap 2  (samples 882..1023)

    out = pl.pallas_call(
        logmel_kernel,
        out_shape=jax.ShapeDtypeStruct((f_total, N_MELS), jnp.float32),
        grid_spec=pltpu.PrefetchScalarGridSpec(
            num_scalar_prefetch=0,
            grid=(steps,),
            in_specs=[
                pl.BlockSpec((tf, HOP), lambda i: (i, 0)),              # xa
                pl.BlockSpec((tf, HOP), lambda i: (i, 0)),              # xb
                pl.BlockSpec((tf, HOP), lambda i: (i, 0)),              # xc
                pl.BlockSpec((HOP, 2 * N_KEEP), lambda i: (0, 0)),      # d0 (invariant)
                pl.BlockSpec((HOP, 2 * N_KEEP), lambda i: (0, 0)),      # d1 (invariant)
                pl.BlockSpec((D2_K, 2 * N_KEEP), lambda i: (0, 0)),     # d2 (invariant)
                pl.BlockSpec((N_KEEP, N_MELS), lambda i: (0, 0)),       # mel (invariant)
            ],
            out_specs=pl.BlockSpec((tf, N_MELS), lambda i: (i, 0)),
        ),
        compiler_params=pltpu.CompilerParams(
            dimension_semantics=("parallel",),
            # ~8-14 MiB live in bf16 mode (~25 MiB in f32 mode); 48 MiB keeps
            # headroom on all generations incl. v7x's 64 MiB physical VMEM.
            vmem_limit_bytes=48 * 1024 * 1024,
        ),
    )(xa, xb, xc, d0, d1, d2, mel_fb)

    return out[:num_frames]


def log_mel_spect(x, precision="bf16"):
    """x: float32 waveform of shape (T,). Returns (num_frames, n_mels) float32.

    precision: "bf16" (default, bf16 MXU operands / f32 accumulation) or
               "f32" (exact mode, matches the float64 reference to ~1e-5).
    """
    if precision not in ("bf16", "f32"):
        raise ValueError(f"unknown precision {precision!r}")
    T = int(x.shape[0])
    if T < N_FFT // 2 + 1:
        raise ValueError(f"waveform too short for reflect padding: need >= "
                         f"{N_FFT // 2 + 1} samples, got {T}")
    num_frames = 1 + T // HOP

    # Frame tile / grid-step selection: big tiles for long audio, and an even
    # number of grid steps (>=2 when possible) so v7x's two TensorCores both
    # get work from the "parallel" grid axis.
    steps = -(-num_frames // TF_MAX)
    if num_frames > 8:
        steps = max(2, steps + (steps % 2))
    tf = _round_up(-(-num_frames // steps), 8)

    dft_dtype_name = "bfloat16" if precision == "bf16" else "float32"
    d0, d1, d2, mel_fb = _kernel_weights(dft_dtype_name)
    return _log_mel_impl(x, d0, d1, d2, mel_fb, num_frames=num_frames,
                         tf=int(tf), steps=int(steps),
                         dft_dtype_name=dft_dtype_name)


# ------------------------- float64 NumPy reference --------------------------
def log_mel_spect_ref64(x):
    x = np.asarray(x, dtype=np.float64)
    pad = N_FFT // 2
    xp = np.pad(x, (pad, pad), mode="reflect")
    num_frames = 1 + x.shape[0] // HOP
    idx = np.arange(num_frames)[:, None] * HOP + np.arange(N_FFT)[None, :]
    frames = xp[idx]
    cos_m, sin_m = make_dft_full()
    fb = make_mel_fb_full()
    re = frames @ cos_m
    im = frames @ sin_m
    mag = np.sqrt(re * re + im * im)
    return np.log1p(LOG_MULT * (mag @ fb))


if __name__ == "__main__":
    k_small, k_long = jax.random.split(jax.random.PRNGKey(0))

    # Small clip: 3087 samples -> 8 frames (single-step, tf=8 path).
    T_small = HOP * 7
    x_small = jax.random.normal(k_small, (T_small,), dtype=jnp.float32)

    # Longer clip: ~6 s of audio -> 301 frames -> two 152-frame grid steps
    # (multi-step grid, even step count for v7x, tail-frame padding).
    T_long = HOP * 300
    x_long = jax.random.normal(k_long, (T_long,), dtype=jnp.float32)

    for x in (x_small, x_long):
        T = int(x.shape[0])
        F = 1 + T // HOP
        ref = log_mel_spect_ref64(np.asarray(x))

        # Exact f32 mode: must match the float64 reference tightly.
        out_f32 = jax.block_until_ready(log_mel_spect(x, precision="f32"))
        assert out_f32.shape == (F, N_MELS), out_f32.shape
        assert np.all(np.isfinite(np.asarray(out_f32)))
        np.testing.assert_allclose(np.asarray(out_f32), ref, rtol=2e-4, atol=2e-4)

        # Default bf16 mode: bf16 rounding of the frames/DFT operands gives
        # ~1e-3 typical absolute error in log-mel space, with rare larger
        # deviations where a mel bin is nearly empty (log amplifies relative
        # error of tiny linear values), hence the looser max bound.
        out_bf16 = jax.block_until_ready(log_mel_spect(x))
        assert out_bf16.shape == (F, N_MELS), out_bf16.shape
        assert np.all(np.isfinite(np.asarray(out_bf16)))
        err = np.abs(np.asarray(out_bf16) - ref)
        assert err.mean() < 5e-3, f"bf16 mean |err| too large: {err.mean()}"
        assert err.max() < 1.5e-1, f"bf16 max |err| too large: {err.max()}"

    print("KERNEL_OK")
</pallas_src>

<mosaic_0001>
module attributes {stable_mosaic.version = 11 : i64} {
  func.func @logmel_kernel(%arg0: i32, %arg1: memref<8x441xf32, #tpu.memory_space<vmem>>, %arg2: memref<8x441xf32, #tpu.memory_space<vmem>>, %arg3: memref<8x441xf32, #tpu.memory_space<vmem>>, %arg4: memref<441x1024xf32, #tpu.memory_space<vmem>>, %arg5: memref<441x1024xf32, #tpu.memory_space<vmem>>, %arg6: memref<256x1024xf32, #tpu.memory_space<vmem>>, %arg7: memref<512x128xf32, #tpu.memory_space<vmem>>, %arg8: memref<8x128xf32, #tpu.memory_space<vmem>>) attributes {dimension_semantics = [#tpu.dimension_semantics<parallel>], iteration_bounds = array<i64: 1>, scalar_prefetch = 0 : i64, scratch_operands = 0 : i64, tpu.core_type = #tpu.core_type<tc>, window_params = [{transform_indices = @transform_0, window_bounds = array<i64: 8, 441>}, {transform_indices = @transform_1, window_bounds = array<i64: 8, 441>}, {transform_indices = @transform_2, window_bounds = array<i64: 8, 441>}, {pipeline_mode = #tpu.pipeline_mode<synchronous>, transform_indices = @transform_3, window_bounds = array<i64: 441, 1024>}, {pipeline_mode = #tpu.pipeline_mode<synchronous>, transform_indices = @transform_4, window_bounds = array<i64: 441, 1024>}, {pipeline_mode = #tpu.pipeline_mode<synchronous>, transform_indices = @transform_5, window_bounds = array<i64: 256, 1024>}, {pipeline_mode = #tpu.pipeline_mode<synchronous>, transform_indices = @transform_6, window_bounds = array<i64: 512, 128>}, {transform_indices = @transform_7, window_bounds = array<i64: 8, 128>}]} {
    %c0 = arith.constant 0 : index
    %c0_0 = arith.constant 0 : index
    %0 = vector.load %arg1[%c0, %c0_0] : memref<8x441xf32, #tpu.memory_space<vmem>>, vector<8x441xf32>
    %c0_1 = arith.constant 0 : index
    %c0_2 = arith.constant 0 : index
    %1 = vector.load %arg4[%c0_1, %c0_2] : memref<441x1024xf32, #tpu.memory_space<vmem>>, vector<441x1024xf32>
    %cst = arith.constant dense<0.000000e+00> : vector<8x1024xf32>
    %2 = tpu.matmul %0, %1, %cst {dimension_numbers = #tpu.dot_dimension_numbers<[1], [0], [0], [1], [0, 0, 1, 1], [], []>} : vector<8x441xf32>, vector<441x1024xf32>, vector<8x1024xf32> -> vector<8x1024xf32>
    %c0_3 = arith.constant 0 : index
    %c0_4 = arith.constant 0 : index
    %3 = vector.load %arg2[%c0_3, %c0_4] : memref<8x441xf32, #tpu.memory_space<vmem>>, vector<8x441xf32>
    %c0_5 = arith.constant 0 : index
    %c0_6 = arith.constant 0 : index
    %4 = vector.load %arg5[%c0_5, %c0_6] : memref<441x1024xf32, #tpu.memory_space<vmem>>, vector<441x1024xf32>
    %cst_7 = arith.constant dense<0.000000e+00> : vector<8x1024xf32>
    %5 = tpu.matmul %3, %4, %cst_7 {dimension_numbers = #tpu.dot_dimension_numbers<[1], [0], [0], [1], [0, 0, 1, 1], [], []>} : vector<8x441xf32>, vector<441x1024xf32>, vector<8x1024xf32> -> vector<8x1024xf32>
    %6 = arith.addf %2, %5 : vector<8x1024xf32>
    %c0_8 = arith.constant 0 : index
    %c0_9 = arith.constant 0 : index
    %7 = vector.load %arg3[%c0_8, %c0_9] : memref<8x441xf32, #tpu.memory_space<vmem>>, vector<8x441xf32>
    %8 = vector.extract_strided_slice %7 {offsets = [0, 0], sizes = [8, 256], strides = [1, 1]} : vector<8x441xf32> to vector<8x256xf32>
    %c0_10 = arith.constant 0 : index
    %c0_11 = arith.constant 0 : index
    %9 = vector.load %arg6[%c0_10, %c0_11] : memref<256x1024xf32, #tpu.memory_space<vmem>>, vector<256x1024xf32>
    %cst_12 = arith.constant dense<0.000000e+00> : vector<8x1024xf32>
    %10 = tpu.matmul %8, %9, %cst_12 {dimension_numbers = #tpu.dot_dimension_numbers<[1], [0], [0], [1], [0, 0, 1, 1], [], []>} : vector<8x256xf32>, vector<256x1024xf32>, vector<8x1024xf32> -> vector<8x1024xf32>
    %11 = arith.addf %6, %10 : vector<8x1024xf32>
    %12 = vector.extract_strided_slice %11 {offsets = [0, 0], sizes = [8, 512], strides = [1, 1]} : vector<8x1024xf32> to vector<8x512xf32>
    %13 = vector.extract_strided_slice %11 {offsets = [0, 512], sizes = [8, 512], strides = [1, 1]} : vector<8x1024xf32> to vector<8x512xf32>
    %14 = arith.mulf %12, %12 : vector<8x512xf32>
    %15 = arith.mulf %13, %13 : vector<8x512xf32>
    %16 = arith.addf %14, %15 : vector<8x512xf32>
    %17 = math.sqrt %16 : vector<8x512xf32>
    %c0_13 = arith.constant 0 : index
    %c0_14 = arith.constant 0 : index
    %18 = vector.load %arg7[%c0_13, %c0_14] : memref<512x128xf32, #tpu.memory_space<vmem>>, vector<512x128xf32>
    %cst_15 = arith.constant dense<0.000000e+00> : vector<8x128xf32>
    %19 = tpu.matmul %17, %18, %cst_15 {dimension_numbers = #tpu.dot_dimension_numbers<[1], [0], [0], [1], [0, 0, 1, 1], [], []>} : vector<8x512xf32>, vector<512x128xf32>, vector<8x128xf32> -> vector<8x128xf32>
    %20 = math.log1p %19 : vector<8x128xf32>
    %c0_16 = arith.constant 0 : index
    %c0_17 = arith.constant 0 : index
    %21 = vector.load %arg8[%c0_16, %c0_17] : memref<8x128xf32, #tpu.memory_space<vmem>>, vector<8x128xf32>
    tpu.vector_store %arg8[%c0_16, %c0_17], %20 {strides = array<i32>} : memref<8x128xf32, #tpu.memory_space<vmem>>, vector<8x128xf32>,
    return
  }
  func.func @transform_0(%arg0: i32) -> (i32, i32) {
    %c0_i32 = arith.constant 0 : i32
    %c0_i32_0 = arith.constant 0 : i32
    return %arg0, %c0_i32 : i32, i32
  }
  func.func @transform_1(%arg0: i32) -> (i32, i32) {
    %c0_i32 = arith.constant 0 : i32
    %c0_i32_0 = arith.constant 0 : i32
    return %arg0, %c0_i32 : i32, i32
  }
  func.func @transform_2(%arg0: i32) -> (i32, i32) {
    %c0_i32 = arith.constant 0 : i32
    %c0_i32_0 = arith.constant 0 : i32
    return %arg0, %c0_i32 : i32, i32
  }
  func.func @transform_3(%arg0: i32) -> (i32, i32) {
    %c0_i32 = arith.constant 0 : i32
    %c0_i32_0 = arith.constant 0 : i32
    %c0_i32_1 = arith.constant 0 : i32
    return %c0_i32, %c0_i32_0 : i32, i32
  }
  func.func @transform_4(%arg0: i32) -> (i32, i32) {
    %c0_i32 = arith.constant 0 : i32
    %c0_i32_0 = arith.constant 0 : i32
    %c0_i32_1 = arith.constant 0 : i32
    return %c0_i32, %c0_i32_0 : i32, i32
  }
  func.func @transform_5(%arg0: i32) -> (i32, i32) {
    %c0_i32 = arith.constant 0 : i32
    %c0_i32_0 = arith.constant 0 : i32
    %c0_i32_1 = arith.constant 0 : i32
    return %c0_i32, %c0_i32_0 : i32, i32
  }
  func.func @transform_6(%arg0: i32) -> (i32, i32) {
    %c0_i32 = arith.constant 0 : i32
    %c0_i32_0 = arith.constant 0 : i32
    %c0_i32_1 = arith.constant 0 : i32
    return %c0_i32, %c0_i32_0 : i32, i32
  }
  func.func @transform_7(%arg0: i32) -> (i32, i32) {
    %c0_i32 = arith.constant 0 : i32
    %c0_i32_0 = arith.constant 0 : i32
    return %arg0, %c0_i32 : i32, i32
  }
}

</mosaic_0001>

<bundles_post_ra>
// kernel: _log_mel_impl.1
= control target key start
LH: loop header
LB: loop body
LE: loop exit
PB: predicated region body
PF: predicated region fallthrough
CT: control target
= control target key end

     0   :  { %12 = vsyncpa [#allocation3], 0  ;;  %s3423_s0 = inlined_call_operand.vmem [shape: f32[8,441], index: 0, kind: input, shape index: {}]   ;;  %s3424_s1 = inlined_call_operand.vmem [shape: f32[8,441], index: 1, kind: input, shape index: {}]   ;;  %s3425_s2 = inlined_call_operand.vmem [shape: f32[8,441], index: 2, kind: input, shape index: {}]   ;;  %s3426_s3 = inlined_call_operand.hbm [shape: f32[441,1024], index: 3, kind: input, shape index: {}]   ;;  %s3427_s4 = inlined_call_operand.hbm [shape: f32[441,1024], index: 4, kind: input, shape index: {}]   ;;  %s3428_s5 = inlined_call_operand.hbm [shape: f32[256,1024], index: 5, kind: input, shape index: {}]   ;;  %s3429_s6 = inlined_call_operand.hbm [shape: f32[512,128], index: 6, kind: input, shape index: {}]   ;;  %s3430_s7 = inlined_call_operand.hbm [shape: f32[8,128], index: 7, kind: output, shape index: {}]  }
   0x1   :  { %13 = vsyncpa [#allocation6], 0 }
   0x2   :  { %14 = vsyncpa [#allocation9], 0 }
   0x3   :  { %15 = vsyncpa [#allocation4], 0  ;;  %s3228_s24 = smov [#allocation5]   ;;  %s3229_s26 = smov [#allocation2]  }
   0x4   :  { %s39_s25 = sshll.u32 %s3228_s24, 4  ;;  %s27_s27 = sshll.u32 %s3229_s26, 4  ;;  %s40_s25 = int_to_ptr.vmem [resolvable:$true] %s39_s25  ;;  %s28_s27 = int_to_ptr.vmem [resolvable:$true] %s27_s27 }
   0x5   :  { %s3128_s28 = scalar_lea.vmem %s40_s25, 57344  ;;  %p3133_p1 = scmp.lt.s32.totalorder %s40_s25, %s40_s25 }
   0x6   :  { %p3129_p0 = scmp.ne.s32.totalorder %s40_s25, %s3128_s28  ;;  %p3134_p2 = scmp.lt.s32.totalorder %s3128_s28, %s3128_s28 }
   0x8   :  { %p3135_p3 = por %p3134_p2, %p3133_p1 }
   0xa   :  { %p3136_p4 = pnand %p3135_p3, %p3129_p0 }
   0xc   :  { %3139 = shalt.err (!%p3136_p4)
}
   0xd   :  { %s3230_s29 = smov 1024   ;;  %s3231_s30 = smov 64  }
   0xe   :  { %45 = dma.hbm_to_vmem [thread:$0]  %s3427_s4, 57344, %s40_s25, [#allocation6], %s3230_s29, %s3230_s29, %s3231_s30  }
   0xf   :  { %s3148_s10 = scalar_lea.vmem %s28_s27, 57344  ;;  %p3153_p6 = scmp.lt.s32.totalorder %s28_s27, %s28_s27 }
  0x10   :  { %p3149_p5 = scmp.ne.s32.totalorder %s28_s27, %s3148_s10  ;;  %p3154_p7 = scmp.lt.s32.totalorder %s3148_s10, %s3148_s10 }
  0x12   :  { %p3155_p8 = por %p3154_p7, %p3153_p6 }
  0x14   :  { %p3156_p9 = pnand %p3155_p8, %p3149_p5 }
  0x16   :  { %3159 = shalt.err (!%p3156_p9)
}
  0x17   :  { %33 = dma.hbm_to_vmem [thread:$0]  %s3426_s3, 57344, %s28_s27, [#allocation3], %s3230_s29, %s3230_s29, %s3231_s30  }
  0x18   :  { %s3232_s13 = smov [#allocation7]   ;;  %s3233_s15 = smov [#allocation8]  }
  0x19   :  { %s51_s14 = sshll.u32 %s3232_s13, 4  ;;  %s63_s16 = sshll.u32 %s3233_s15, 4  ;;  %s52_s14 = int_to_ptr.vmem [resolvable:$true] %s51_s14  ;;  %s64_s16 = int_to_ptr.vmem [resolvable:$true] %s63_s16 }
  0x1a   :  { %s3168_s17 = scalar_lea.vmem %s52_s14, 32768  ;;  %p3173_p11 = scmp.lt.s32.totalorder %s52_s14, %s52_s14 }
  0x1b   :  { %p3169_p10 = scmp.ne.s32.totalorder %s52_s14, %s3168_s17  ;;  %p3174_p12 = scmp.lt.s32.totalorder %s3168_s17, %s3168_s17 }
  0x1d   :  { %p3175_p13 = por %p3174_p12, %p3173_p11 }
  0x1f   :  { %p3176_p0 = pnand %p3175_p13, %p3169_p10 }
  0x21   :  { %3179 = shalt.err (!%p3176_p0)
}
  0x22   :  { %57 = dma.hbm_to_vmem [thread:$0]  %s3428_s5, 32768, %s52_s14, [#allocation6], %s3230_s29, %s3230_s29, %s3231_s30  }
  0x23   :  { %s3188_s19 = scalar_lea.vmem %s64_s16, 8192  ;;  %p3193_p2 = scmp.lt.s32.totalorder %s64_s16, %s64_s16 }
  0x24   :  { %p3189_p1 = scmp.ne.s32.totalorder %s64_s16, %s3188_s19  ;;  %p3194_p3 = scmp.lt.s32.totalorder %s3188_s19, %s3188_s19 }
  0x26   :  { %p3195_p4 = por %p3194_p3, %p3193_p2 }
  0x28   :  { %p3196_p5 = pnand %p3195_p4, %p3189_p1 }
  0x2a   :  { %3199 = shalt.err (!%p3196_p5)
}
  0x2b   :  { %s3234_s3 = smov 128   ;;  %s3235_s20 = smov 8  }
  0x2c   :  { %69 = dma.hbm_to_vmem [thread:$0]  %s3429_s6, 8192, %s64_s16, [#allocation9], %s3234_s3, %s3234_s3, %s3235_s20  }
  0x2d   :  { %3220 = dma.done.wait [#allocation3], 57344  }
  0x2e   :  { %3221 = vsyncadd [#allocation3], 4294909952 }
  0x2f   :  { %3222 = dma.done.wait [#allocation6], 90112  }
  0x30   :  { %3223 = vsyncadd [#allocation6], 4294877184 }
  0x31   :  { %3224 = dma.done.wait [#allocation9], 8192  }
  0x32   :  { %3225 = vsyncadd [#allocation9], 4294959104  ;;  %v659_v0 = vld [vmem:[#allocation5 + $0x3c8] sm:$0xff]  ;;  %v658_v2 = vld [vmem:[#allocation5 + $0x3c0] sm:$0xff]  ;;  %vm990_vm0 = vcmask 1040384   ;;  %vm986_vm1 = vcmask 465920  }
  0x33   :  { %v915_v1 = vld [vmem:[#allocation5 + $0xbc8] sm:$0xff]  ;;  %1015 = vmatprep.subr.mxu0 %v659_v0  ;;  %v914_v3 = vld [vmem:[#allocation5 + $0xbc0] sm:$0xff] }
  0x34   :  { %1086 = vmatprep.subr.mxu1 %v915_v1  ;;  %v651_v4 = vld [vmem:[#allocation5 + $0x388] sm:$0xff]  ;;  %1016 = vmatpush1.msra.mxu0 %v658_v2  ;;  %v650_v6 = vld [vmem:[#allocation5 + $0x380] sm:$0xff] }
  0x35   :  { %v907_v5 = vld [vmem:[#allocation5 + $0xb88] sm:$0xff]  ;;  %1087 = vmatpush1.msra.mxu1 %v914_v3  ;;  %v906_v7 = vld [vmem:[#allocation5 + $0xb80] sm:$0xff]  ;;  %1017 = vmatprep.subr.mxu0 %v651_v4 }
  0x36   :  { %v643_v8 = vld [vmem:[#allocation5 + $0x348] sm:$0xff]  ;;  %1088 = vmatprep.subr.mxu1 %v907_v5  ;;  %v642_v10 = vld [vmem:[#allocation5 + $0x340] sm:$0xff]  ;;  %1018 = vmatpush1.msra.mxu0 %v650_v6 }
  0x37   :  { %v899_v9 = vld [vmem:[#allocation5 + $0xb48] sm:$0xff]  ;;  %v898_v11 = vld [vmem:[#allocation5 + $0xb40] sm:$0xff]  ;;  %1089 = vmatpush1.msra.mxu1 %v906_v7  ;;  %1019 = vmatprep.subr.mxu0 %v643_v8 }
  0x38   :  { %v635_v12 = vld [vmem:[#allocation5 + $0x308] sm:$0xff]  ;;  %1090 = vmatprep.subr.mxu1 %v899_v9  ;;  %v634_v14 = vld [vmem:[#allocation5 + $0x300] sm:$0xff]  ;;  %1020 = vmatpush1.msra.mxu0 %v642_v10 }
  0x39   :  { %v891_v13 = vld [vmem:[#allocation5 + $0xb08] sm:$0xff]  ;;  %v890_v15 = vld [vmem:[#allocation5 + $0xb00] sm:$0xff]  ;;  %1091 = vmatpush1.msra.mxu1 %v898_v11  ;;  %1021 = vmatprep.subr.mxu0 %v635_v12 }
  0x3a   :  { %v627_v16 = vld [vmem:[#allocation5 + $0x2c8] sm:$0xff]  ;;  %1092 = vmatprep.subr.mxu1 %v891_v13  ;;  %v626_v18 = vld [vmem:[#allocation5 + $0x2c0] sm:$0xff]  ;;  %1022 = vmatpush1.msra.mxu0 %v634_v14 }
  0x3b   :  { %v883_v17 = vld [vmem:[#allocation5 + $0xac8] sm:$0xff]  ;;  %v882_v19 = vld [vmem:[#allocation5 + $0xac0] sm:$0xff]  ;;  %1093 = vmatpush1.msra.mxu1 %v890_v15  ;;  %1023 = vmatprep.subr.mxu0 %v627_v16 }
  0x3c   :  { %v619_v20 = vld [vmem:[#allocation5 + $0x288] sm:$0xff]  ;;  %1094 = vmatprep.subr.mxu1 %v883_v17  ;;  %v618_v22 = vld [vmem:[#allocation5 + $0x280] sm:$0xff]  ;;  %1024 = vmatpush1.msra.mxu0 %v626_v18 }
  0x3d   :  { %v875_v21 = vld [vmem:[#allocation5 + $0xa88] sm:$0xff]  ;;  %v874_v23 = vld [vmem:[#allocation5 + $0xa80] sm:$0xff]  ;;  %1095 = vmatpush1.msra.mxu1 %v882_v19  ;;  %1025 = vmatprep.subr.mxu0 %v619_v20 }
  0x3e   :  { %v611_v24 = vld [vmem:[#allocation5 + $0x248] sm:$0xff]  ;;  %1096 = vmatprep.subr.mxu1 %v875_v21  ;;  %v610_v26 = vld [vmem:[#allocation5 + $0x240] sm:$0xff]  ;;  %1026 = vmatpush1.msra.mxu0 %v618_v22 }
  0x3f   :  { %v867_v25 = vld [vmem:[#allocation5 + $0xa48] sm:$0xff]  ;;  %v866_v27 = vld [vmem:[#allocation5 + $0xa40] sm:$0xff]  ;;  %1097 = vmatpush1.msra.mxu1 %v874_v23  ;;  %1027 = vmatprep.subr.mxu0 %v611_v24 }
  0x40   :  { %v603_v28 = vld [vmem:[#allocation5 + $0x208] sm:$0xff]  ;;  %1098 = vmatprep.subr.mxu1 %v867_v25  ;;  %v602_v30 = vld [vmem:[#allocation5 + $0x200] sm:$0xff]  ;;  %1028 = vmatpush1.msra.mxu0 %v610_v26 }
  0x41   :  { %v859_v29 = vld [vmem:[#allocation5 + $0xa08] sm:$0xff]  ;;  %v858_v31 = vld [vmem:[#allocation5 + $0xa00] sm:$0xff]  ;;  %1099 = vmatpush1.msra.mxu1 %v866_v27  ;;  %1029 = vmatprep.subr.mxu0 %v603_v28 }
  0x42   :  { %v595_v32 = vld [vmem:[#allocation5 + $0x1c8] sm:$0xff]  ;;  %1100 = vmatprep.subr.mxu1 %v859_v29  ;;  %v594_v34 = vld [vmem:[#allocation5 + $0x1c0] sm:$0xff]  ;;  %1030 = vmatpush1.msra.mxu0 %v602_v30 }
  0x43   :  { %v851_v33 = vld [vmem:[#allocation5 + $0x9c8] sm:$0xff]  ;;  %v850_v35 = vld [vmem:[#allocation5 + $0x9c0] sm:$0xff]  ;;  %1101 = vmatpush1.msra.mxu1 %v858_v31  ;;  %1031 = vmatprep.subr.mxu0 %v595_v32  ;;  %v3294_v32 = vld [vmem:[%s3424_s1 + $0x18] sm:$0xff] }
  0x44   :  { %v587_v36 = vld [vmem:[#allocation5 + $0x188] sm:$0xff]  ;;  %1102 = vmatprep.subr.mxu1 %v851_v33  ;;  %v586_v38 = vld [vmem:[#allocation5 + $0x180] sm:$0xff]  ;;  %1032 = vmatpush1.msra.mxu0 %v594_v34  ;;  %v3299_v34 = vld [vmem:[%s3424_s1 + $0x10] sm:$0xff] }
  0x45   :  { %v843_v37 = vld [vmem:[#allocation5 + $0x988] sm:$0xff]  ;;  %v842_v39 = vld [vmem:[#allocation5 + $0x980] sm:$0xff]  ;;  %1103 = vmatpush1.msra.mxu1 %v850_v35  ;;  %1033 = vmatprep.subr.mxu0 %v587_v36  ;;  %v661_v35 = vld [vmem:[#allocation5 + $0x3d8] sm:$0xff] }
  0x46   :  { %v579_v40 = vld [vmem:[#allocation5 + $0x148] sm:$0xff]  ;;  %1104 = vmatprep.subr.mxu1 %v843_v37  ;;  %v578_v42 = vld [vmem:[#allocation5 + $0x140] sm:$0xff]  ;;  %1034 = vmatpush1.msra.mxu0 %v586_v38  ;;  %v660_v37 = vld [vmem:[#allocation5 + $0x3d0] sm:$0xff] }
  0x47   :  { %v835_v41 = vld [vmem:[#allocation5 + $0x948] sm:$0xff]  ;;  %v834_v43 = vld [vmem:[#allocation5 + $0x940] sm:$0xff]  ;;  %1105 = vmatpush1.msra.mxu1 %v842_v39  ;;  %1035 = vmatprep.subr.mxu0 %v579_v40  ;;  %v653_v39 = vld [vmem:[#allocation5 + $0x398] sm:$0xff] }
  0x48   :  { %v571_v44 = vld [vmem:[#allocation5 + $0x108] sm:$0xff]  ;;  %1106 = vmatprep.subr.mxu1 %v835_v41  ;;  %v570_v46 = vld [vmem:[#allocation5 + $0x100] sm:$0xff]  ;;  %1036 = vmatpush1.msra.mxu0 %v578_v42  ;;  %v652_v41 = vld [vmem:[#allocation5 + $0x390] sm:$0xff] }
  0x49   :  { %v827_v45 = vld [vmem:[#allocation5 + $0x908] sm:$0xff]  ;;  %v826_v47 = vld [vmem:[#allocation5 + $0x900] sm:$0xff]  ;;  %1107 = vmatpush1.msra.mxu1 %v834_v43  ;;  %1037 = vmatprep.subr.mxu0 %v571_v44  ;;  %v645_v43 = vld [vmem:[#allocation5 + $0x358] sm:$0xff] }
  0x4a   :  { %v563_v48 = vld [vmem:[#allocation5 + $0xc8] sm:$0xff]  ;;  %1108 = vmatprep.subr.mxu1 %v827_v45  ;;  %v562_v50 = vld [vmem:[#allocation5 + $0xc0] sm:$0xff]  ;;  %1038 = vmatpush1.msra.mxu0 %v570_v46  ;;  %v644_v45 = vld [vmem:[#allocation5 + $0x350] sm:$0xff] }
  0x4b   :  { %v819_v49 = vld [vmem:[#allocation5 + $0x8c8] sm:$0xff]  ;;  %v818_v51 = vld [vmem:[#allocation5 + $0x8c0] sm:$0xff]  ;;  %1109 = vmatpush1.msra.mxu1 %v826_v47  ;;  %1039 = vmatprep.subr.mxu0 %v563_v48  ;;  %v637_v47 = vld [vmem:[#allocation5 + $0x318] sm:$0xff] }
  0x4c   :  { %v555_v52 = vld [vmem:[#allocation5 + $0x88] sm:$0xff]  ;;  %1110 = vmatprep.subr.mxu1 %v819_v49  ;;  %v554_v54 = vld [vmem:[#allocation5 + $0x80] sm:$0xff]  ;;  %1040 = vmatpush1.msra.mxu0 %v562_v50  ;;  %v636_v49 = vld [vmem:[#allocation5 + $0x310] sm:$0xff] }
  0x4d   :  { %v811_v53 = vld [vmem:[#allocation5 + $0x888] sm:$0xff]  ;;  %v810_v55 = vld [vmem:[#allocation5 + $0x880] sm:$0xff]  ;;  %1111 = vmatpush1.msra.mxu1 %v818_v51  ;;  %1041 = vmatprep.subr.mxu0 %v555_v52  ;;  %v629_v51 = vld [vmem:[#allocation5 + $0x2d8] sm:$0xff] }
  0x4e   :  { %v547_v56 = vld [vmem:[#allocation5 + $0x48] sm:$0xff]  ;;  %1112 = vmatprep.subr.mxu1 %v811_v53  ;;  %v546_v58 = vld [vmem:[#allocation5 + $0x40] sm:$0xff]  ;;  %1042 = vmatpush1.msra.mxu0 %v554_v54  ;;  %v628_v53 = vld [vmem:[#allocation5 + $0x2d0] sm:$0xff] }
  0x4f   :  { %v803_v57 = vld [vmem:[#allocation5 + $0x848] sm:$0xff]  ;;  %v802_v59 = vld [vmem:[#allocation5 + $0x840] sm:$0xff]  ;;  %1113 = vmatpush1.msra.mxu1 %v810_v55  ;;  %1043 = vmatprep.subr.mxu0 %v547_v56  ;;  %v621_v55 = vld [vmem:[#allocation5 + $0x298] sm:$0xff] }
  0x50   :  { %v539_v60 = vld [vmem:[#allocation5 + $0x8] sm:$0xff]  ;;  %1114 = vmatprep.subr.mxu1 %v803_v57  ;;  %v538_v62 = vld [vmem:[#allocation5] sm:$0xff]  ;;  %1044 = vmatpush1.msra.mxu0 %v546_v58  ;;  %v620_v57 = vld [vmem:[#allocation5 + $0x290] sm:$0xff] }
  0x51   :  { %v795_v61 = vld [vmem:[#allocation5 + $0x808] sm:$0xff]  ;;  %v794_v63 = vld [vmem:[#allocation5 + $0x800] sm:$0xff]  ;;  %1115 = vmatpush1.msra.mxu1 %v802_v59  ;;  %1045 = vmatprep.subr.mxu0 %v539_v60  ;;  %v613_v59 = vld [vmem:[#allocation5 + $0x258] sm:$0xff] }
  0x52   :  { %v787_v0 = vld [vmem:[#allocation5 + $0x7c8] sm:$0xff]  ;;  %1116 = vmatprep.subr.mxu1 %v795_v61  ;;  %v786_v2 = vld [vmem:[#allocation5 + $0x7c0] sm:$0xff]  ;;  %1046 = vmatpush1.msra.mxu0 %v538_v62  ;;  %v612_v61 = vld [vmem:[#allocation5 + $0x250] sm:$0xff] }
  0x53   :  { %v979_v1 = vld [vmem:[#allocation5 + $0xdc8] sm:$0x1]  ;;  %v978_v3 = vld [vmem:[#allocation5 + $0xdc0] sm:$0x1]  ;;  %1117 = vmatpush1.msra.mxu1 %v794_v63  ;;  %1047 = vmatprep.subr.mxu0 %v787_v0  ;;  %v605_v63 = vld [vmem:[#allocation5 + $0x218] sm:$0xff] }
  0x54   :  { %v779_v4 = vld [vmem:[#allocation5 + $0x788] sm:$0xff]  ;;  %2999 = vmatprep.subr.msk.mxu1 %vm990_vm0, %v979_v1  ;;  %v778_v6 = vld [vmem:[#allocation5 + $0x780] sm:$0xff]  ;;  %1048 = vmatpush2.msra.mxu0 %v786_v2  ;;  %v604_v2 = vld [vmem:[#allocation5 + $0x210] sm:$0xff] }
  0x55   :  { %v971_v5 = vld [vmem:[#allocation5 + $0xd88] sm:$0xff]  ;;  %v970_v7 = vld [vmem:[#allocation5 + $0xd80] sm:$0xff]  ;;  %3000 = vmatpush2.msk.msra.mxu1 %vm990_vm0, %v978_v3  ;;  %1049 = vmatprep.subr.mxu0 %v779_v4  ;;  %v597_v4 = vld [vmem:[#allocation5 + $0x1d8] sm:$0xff] }
  0x56   :  { %v771_v8 = vld [vmem:[#allocation5 + $0x748] sm:$0xff]  ;;  %1136 = vmatprep.subr.mxu1 %v971_v5  ;;  %v770_v10 = vld [vmem:[#allocation5 + $0x740] sm:$0xff]  ;;  %1050 = vmatpush2.msra.mxu0 %v778_v6  ;;  %v917_v5 = vld [vmem:[#allocation5 + $0xbd8] sm:$0xff] }
  0x57   :  { %v963_v9 = vld [vmem:[#allocation5 + $0xd48] sm:$0xff]  ;;  %v962_v11 = vld [vmem:[#allocation5 + $0xd40] sm:$0xff]  ;;  %1137 = vmatpush2.msra.mxu1 %v970_v7  ;;  %1051 = vmatprep.subr.mxu0 %v771_v8  ;;  %v596_v6 = vld [vmem:[#allocation5 + $0x1d0] sm:$0xff] }
  0x58   :  { %v763_v12 = vld [vmem:[#allocation5 + $0x708] sm:$0xff]  ;;  %1138 = vmatprep.subr.mxu1 %v963_v9  ;;  %v762_v14 = vld [vmem:[#allocation5 + $0x700] sm:$0xff]  ;;  %1052 = vmatpush2.msra.mxu0 %v770_v10  ;;  %v916_v7 = vld [vmem:[#allocation5 + $0xbd0] sm:$0xff] }
  0x59   :  { %v955_v13 = vld [vmem:[#allocation5 + $0xd08] sm:$0xff]  ;;  %v954_v15 = vld [vmem:[#allocation5 + $0xd00] sm:$0xff]  ;;  %1139 = vmatpush2.msra.mxu1 %v962_v11  ;;  %1053 = vmatprep.subr.mxu0 %v763_v12  ;;  %v589_v8 = vld [vmem:[#allocation5 + $0x198] sm:$0xff] }
  0x5a   :  { %v755_v16 = vld [vmem:[#allocation5 + $0x6c8] sm:$0xff]  ;;  %1140 = vmatprep.subr.mxu1 %v955_v13  ;;  %v754_v18 = vld [vmem:[#allocation5 + $0x6c0] sm:$0xff]  ;;  %1054 = vmatpush2.msra.mxu0 %v762_v14  ;;  %v909_v9 = vld [vmem:[#allocation5 + $0xb98] sm:$0xff] }
  0x5b   :  { %v947_v17 = vld [vmem:[#allocation5 + $0xcc8] sm:$0xff]  ;;  %v946_v19 = vld [vmem:[#allocation5 + $0xcc0] sm:$0xff]  ;;  %1141 = vmatpush2.msra.mxu1 %v954_v15  ;;  %1055 = vmatprep.subr.mxu0 %v755_v16  ;;  %v588_v10 = vld [vmem:[#allocation5 + $0x190] sm:$0xff] }
  0x5c   :  { %v747_v20 = vld [vmem:[#allocation5 + $0x688] sm:$0xff]  ;;  %1142 = vmatprep.subr.mxu1 %v947_v17  ;;  %v746_v22 = vld [vmem:[#allocation5 + $0x680] sm:$0xff]  ;;  %1056 = vmatpush2.msra.mxu0 %v754_v18  ;;  %v908_v11 = vld [vmem:[#allocation5 + $0xb90] sm:$0xff] }
  0x5d   :  { %v939_v21 = vld [vmem:[#allocation5 + $0xc88] sm:$0xff]  ;;  %v938_v23 = vld [vmem:[#allocation5 + $0xc80] sm:$0xff]  ;;  %1143 = vmatpush2.msra.mxu1 %v946_v19  ;;  %1057 = vmatprep.subr.mxu0 %v747_v20  ;;  %v581_v12 = vld [vmem:[#allocation5 + $0x158] sm:$0xff] }
  0x5e   :  { %v739_v24 = vld [vmem:[#allocation5 + $0x648] sm:$0xff]  ;;  %1144 = vmatprep.subr.mxu1 %v939_v21  ;;  %v738_v26 = vld [vmem:[#allocation5 + $0x640] sm:$0xff]  ;;  %1058 = vmatpush2.msra.mxu0 %v746_v22  ;;  %v901_v13 = vld [vmem:[#allocation5 + $0xb58] sm:$0xff] }
  0x5f   :  { %v931_v25 = vld [vmem:[#allocation5 + $0xc48] sm:$0xff]  ;;  %v930_v27 = vld [vmem:[#allocation5 + $0xc40] sm:$0xff]  ;;  %1145 = vmatpush2.msra.mxu1 %v938_v23  ;;  %1059 = vmatprep.subr.mxu0 %v739_v24  ;;  %v580_v14 = vld [vmem:[#allocation5 + $0x150] sm:$0xff] }
  0x60   :  { %v731_v28 = vld [vmem:[#allocation5 + $0x608] sm:$0xff]  ;;  %1146 = vmatprep.subr.mxu1 %v931_v25  ;;  %v730_v30 = vld [vmem:[#allocation5 + $0x600] sm:$0xff]  ;;  %1060 = vmatpush2.msra.mxu0 %v738_v26  ;;  %v900_v15 = vld [vmem:[#allocation5 + $0xb50] sm:$0xff] }
  0x61   :  { %v923_v29 = vld [vmem:[#allocation5 + $0xc08] sm:$0xff]  ;;  %v922_v31 = vld [vmem:[#allocation5 + $0xc00] sm:$0xff]  ;;  %1147 = vmatpush2.msra.mxu1 %v930_v27  ;;  %1061 = vmatprep.subr.mxu0 %v731_v28  ;;  %v573_v16 = vld [vmem:[#allocation5 + $0x118] sm:$0xff] }
  0x62   :  { %v723_v33 = vld [vmem:[#allocation5 + $0x5c8] sm:$0xff]  ;;  %1148 = vmatprep.subr.mxu1 %v923_v29  ;;  %1062 = vmatpush2.msra.mxu0 %v730_v30  ;;  %v722_v36 = vld [vmem:[#allocation5 + $0x5c0] sm:$0xff]  ;;  %v893_v17 = vld [vmem:[#allocation5 + $0xb18] sm:$0xff] }
  0x63   :  { %1149 = vmatpush2.msra.mxu1 %v922_v31  ;;  %3001 = vmatprep.mubr.msk.f32.mxu1 %vm986_vm1, %v3294_v32  ;;  %v715_v38 = vld [vmem:[#allocation5 + $0x588] sm:$0xff]  ;;  %v714_v40 = vld [vmem:[#allocation5 + $0x580] sm:$0xff]  ;;  %v572_v18 = vld [vmem:[#allocation5 + $0x110] sm:$0xff] }
  0x64   :  { %1063 = vmatprep.subr.mxu0 %v723_v33  ;;  %1151 = vmatmul.mubr.f32.vlgmr.msra.gmra.mxu1 %v3299_v34  ;;  %v707_v42 = vld [vmem:[#allocation5 + $0x548] sm:$0xff]  ;;  %v706_v44 = vld [vmem:[#allocation5 + $0x540] sm:$0xff]  ;;  %v892_v19 = vld [vmem:[#allocation5 + $0xb10] sm:$0xff] }
  0x65   :  { %1157 = vmatprep.subr.mxu1 %v661_v35  ;;  %1064 = vmatpush2.msra.mxu0 %v722_v36  ;;  %v699_v46 = vld [vmem:[#allocation5 + $0x508] sm:$0xff]  ;;  %v698_v48 = vld [vmem:[#allocation5 + $0x500] sm:$0xff]  ;;  %v565_v20 = vld [vmem:[#allocation5 + $0xd8] sm:$0xff] }
  0x66   :  { %1158 = vmatpush1.msra.mxu1 %v660_v37  ;;  %1065 = vmatprep.subr.mxu0 %v715_v38  ;;  %v691_v50 = vld [vmem:[#allocation5 + $0x4c8] sm:$0xff]  ;;  %v690_v52 = vld [vmem:[#allocation5 + $0x4c0] sm:$0xff]  ;;  %v885_v21 = vld [vmem:[#allocation5 + $0xad8] sm:$0xff] }
  0x67   :  { %1159 = vmatprep.subr.mxu1 %v653_v39  ;;  %1066 = vmatpush2.msra.mxu0 %v714_v40  ;;  %v683_v54 = vld [vmem:[#allocation5 + $0x488] sm:$0xff]  ;;  %v682_v56 = vld [vmem:[#allocation5 + $0x480] sm:$0xff]  ;;  %v564_v22 = vld [vmem:[#allocation5 + $0xd0] sm:$0xff] }
  0x68   :  { %1160 = vmatpush1.msra.mxu1 %v652_v41  ;;  %1067 = vmatprep.subr.mxu0 %v707_v42  ;;  %v675_v58 = vld [vmem:[#allocation5 + $0x448] sm:$0xff]  ;;  %v674_v60 = vld [vmem:[#allocation5 + $0x440] sm:$0xff]  ;;  %v884_v23 = vld [vmem:[#allocation5 + $0xad0] sm:$0xff] }
  0x69   :  { %1161 = vmatprep.subr.mxu1 %v645_v43  ;;  %1068 = vmatpush2.msra.mxu0 %v706_v44  ;;  %v667_v62 = vld [vmem:[#allocation5 + $0x408] sm:$0xff]  ;;  %v666_v0 = vld [vmem:[#allocation5 + $0x400] sm:$0xff]  ;;  %v557_v24 = vld [vmem:[#allocation5 + $0x98] sm:$0xff] }
  0x6a   :  { %1162 = vmatpush1.msra.mxu1 %v644_v45  ;;  %1069 = vmatprep.subr.mxu0 %v699_v46  ;;  %v3307_v1 = vld [vmem:[%s3424_s1 + $0x8] sm:$0xff]  ;;  %v3312_v3 = vld [vmem:[%s3424_s1] sm:$0xff]  ;;  %v877_v25 = vld [vmem:[#allocation5 + $0xa98] sm:$0xff] }
  0x6b   :  { %1163 = vmatprep.subr.mxu1 %v637_v47  ;;  %1070 = vmatpush2.msra.mxu0 %v698_v48  ;;  %v556_v26 = vld [vmem:[#allocation5 + $0x90] sm:$0xff]  ;;  %v549_v28 = vld [vmem:[#allocation5 + $0x58] sm:$0xff] }
  0x6c   :  { %1164 = vmatpush1.msra.mxu1 %v636_v49  ;;  %1071 = vmatprep.subr.mxu0 %v691_v50  ;;  %v876_v27 = vld [vmem:[#allocation5 + $0xa90] sm:$0xff]  ;;  %v869_v29 = vld [vmem:[#allocation5 + $0xa58] sm:$0xff] }
  0x6d   :  { %1165 = vmatprep.subr.mxu1 %v629_v51  ;;  %1072 = vmatpush2.msra.mxu0 %v690_v52  ;;  %v548_v30 = vld [vmem:[#allocation5 + $0x50] sm:$0xff]  ;;  %v541_v33 = vld [vmem:[#allocation5 + $0x18] sm:$0xff] }
  0x6e   :  { %1166 = vmatpush1.msra.mxu1 %v628_v53  ;;  %1073 = vmatprep.subr.mxu0 %v683_v54  ;;  %v868_v31 = vld [vmem:[#allocation5 + $0xa50] sm:$0xff]  ;;  %v861_v35 = vld [vmem:[#allocation5 + $0xa18] sm:$0xff] }
  0x6f   :  { %1167 = vmatprep.subr.mxu1 %v621_v55  ;;  %1074 = vmatpush2.msra.mxu0 %v682_v56  ;;  %v540_v36 = vld [vmem:[#allocation5 + $0x10] sm:$0xff]  ;;  %v789_v38 = vld [vmem:[#allocation5 + $0x7d8] sm:$0xff] }
  0x70   :  { %1168 = vmatpush1.msra.mxu1 %v620_v57  ;;  %1075 = vmatprep.subr.mxu0 %v675_v58  ;;  %v860_v37 = vld [vmem:[#allocation5 + $0xa10] sm:$0xff]  ;;  %v853_v39 = vld [vmem:[#allocation5 + $0x9d8] sm:$0xff] }
  0x71   :  { %1169 = vmatprep.subr.mxu1 %v613_v59  ;;  %1076 = vmatpush2.msra.mxu0 %v674_v60  ;;  %v788_v40 = vld [vmem:[#allocation5 + $0x7d0] sm:$0xff]  ;;  %v781_v42 = vld [vmem:[#allocation5 + $0x798] sm:$0xff] }
  0x72   :  { %1170 = vmatpush1.msra.mxu1 %v612_v61  ;;  %1077 = vmatprep.subr.mxu0 %v667_v62  ;;  %v852_v41 = vld [vmem:[#allocation5 + $0x9d0] sm:$0xff]  ;;  %v845_v43 = vld [vmem:[#allocation5 + $0x998] sm:$0xff] }
  0x73   :  { %1171 = vmatprep.subr.mxu1 %v605_v63  ;;  %1078 = vmatpush2.msra.mxu0 %v666_v0  ;;  %v780_v44 = vld [vmem:[#allocation5 + $0x790] sm:$0xff]  ;;  %v773_v46 = vld [vmem:[#allocation5 + $0x758] sm:$0xff] }
  0x74   :  { %1079 = vmatprep.mubr.f32.mxu0 %v3307_v1  ;;  %1172 = vmatpush1.msra.mxu1 %v604_v2  ;;  %v844_v45 = vld [vmem:[#allocation5 + $0x990] sm:$0xff]  ;;  %v837_v47 = vld [vmem:[#allocation5 + $0x958] sm:$0xff] }
  0x75   :  { %1080 = vmatmul.mubr.f32.vlgmr.msra.gmra.mxu0 %v3312_v3  ;;  %1173 = vmatprep.subr.mxu1 %v597_v4  ;;  %v772_v48 = vld [vmem:[#allocation5 + $0x750] sm:$0xff]  ;;  %v765_v50 = vld [vmem:[#allocation5 + $0x718] sm:$0xff] }
  0x76   :  { %1228 = vmatprep.subr.mxu0 %v917_v5  ;;  %1174 = vmatpush1.msra.mxu1 %v596_v6  ;;  %v836_v49 = vld [vmem:[#allocation5 + $0x950] sm:$0xff]  ;;  %v829_v51 = vld [vmem:[#allocation5 + $0x918] sm:$0xff] }
  0x77   :  { %1229 = vmatpush1.msra.mxu0 %v916_v7  ;;  %1175 = vmatprep.subr.mxu1 %v589_v8  ;;  %v764_v52 = vld [vmem:[#allocation5 + $0x710] sm:$0xff]  ;;  %v757_v54 = vld [vmem:[#allocation5 + $0x6d8] sm:$0xff] }
  0x78   :  { %1230 = vmatprep.subr.mxu0 %v909_v9  ;;  %1176 = vmatpush1.msra.mxu1 %v588_v10  ;;  %v828_v53 = vld [vmem:[#allocation5 + $0x910] sm:$0xff]  ;;  %v821_v55 = vld [vmem:[#allocation5 + $0x8d8] sm:$0xff] }
  0x79   :  { %1231 = vmatpush1.msra.mxu0 %v908_v11  ;;  %1177 = vmatprep.subr.mxu1 %v581_v12  ;;  %v756_v56 = vld [vmem:[#allocation5 + $0x6d0] sm:$0xff]  ;;  %v749_v58 = vld [vmem:[#allocation5 + $0x698] sm:$0xff] }
  0x7a   :  { %1232 = vmatprep.subr.mxu0 %v901_v13  ;;  %1178 = vmatpush1.msra.mxu1 %v580_v14  ;;  %v820_v57 = vld [vmem:[#allocation5 + $0x8d0] sm:$0xff]  ;;  %v813_v59 = vld [vmem:[#allocation5 + $0x898] sm:$0xff] }
  0x7b   :  { %1233 = vmatpush1.msra.mxu0 %v900_v15  ;;  %1179 = vmatprep.subr.mxu1 %v573_v16  ;;  %v748_v60 = vld [vmem:[#allocation5 + $0x690] sm:$0xff]  ;;  %v741_v62 = vld [vmem:[#allocation5 + $0x658] sm:$0xff] }
  0x7c   :  { %1234 = vmatprep.subr.mxu0 %v893_v17  ;;  %1180 = vmatpush1.msra.mxu1 %v572_v18  ;;  %v812_v61 = vld [vmem:[#allocation5 + $0x890] sm:$0xff]  ;;  %v805_v63 = vld [vmem:[#allocation5 + $0x858] sm:$0xff] }
  0x7d   :  { %1235 = vmatpush1.msra.mxu0 %v892_v19  ;;  %1181 = vmatprep.subr.mxu1 %v565_v20  ;;  %v740_v0 = vld [vmem:[#allocation5 + $0x650] sm:$0xff]  ;;  %v733_v4 = vld [vmem:[#allocation5 + $0x618] sm:$0xff] }
  0x7e   :  { %1236 = vmatprep.subr.mxu0 %v885_v21  ;;  %1182 = vmatpush1.msra.mxu1 %v564_v22  ;;  %v804_v2 = vld [vmem:[#allocation5 + $0x850] sm:$0xff]  ;;  %v797_v5 = vld [vmem:[#allocation5 + $0x818] sm:$0xff] }
  0x7f   :  { %1237 = vmatpush1.msra.mxu0 %v884_v23  ;;  %1183 = vmatprep.subr.mxu1 %v557_v24  ;;  %v732_v6 = vld [vmem:[#allocation5 + $0x610] sm:$0xff]  ;;  %v725_v8 = vld [vmem:[#allocation5 + $0x5d8] sm:$0xff] }
  0x80   :  { %1238 = vmatprep.subr.mxu0 %v877_v25  ;;  %1184 = vmatpush1.msra.mxu1 %v556_v26  ;;  %v796_v7 = vld [vmem:[#allocation5 + $0x810] sm:$0xff]  ;;  %v981_v9 = vld [vmem:[#allocation5 + $0xdd8] sm:$0x1] }
  0x81   :  { %1239 = vmatpush1.msra.mxu0 %v876_v27  ;;  %1185 = vmatprep.subr.mxu1 %v549_v28  ;;  %v724_v10 = vld [vmem:[#allocation5 + $0x5d0] sm:$0xff]  ;;  %v717_v12 = vld [vmem:[#allocation5 + $0x598] sm:$0xff] }
  0x82   :  { %1240 = vmatprep.subr.mxu0 %v869_v29  ;;  %1186 = vmatpush1.msra.mxu1 %v548_v30  ;;  %v980_v11 = vld [vmem:[#allocation5 + $0xdd0] sm:$0x1]  ;;  %v973_v13 = vld [vmem:[#allocation5 + $0xd98] sm:$0xff] }
  0x83   :  { %1241 = vmatpush1.msra.mxu0 %v868_v31  ;;  %1187 = vmatprep.subr.mxu1 %v541_v33  ;;  %v716_v14 = vld [vmem:[#allocation5 + $0x590] sm:$0xff]  ;;  %v709_v16 = vld [vmem:[#allocation5 + $0x558] sm:$0xff] }
  0x84   :  { %1242 = vmatprep.subr.mxu0 %v861_v35  ;;  %1188 = vmatpush1.msra.mxu1 %v540_v36  ;;  %v972_v15 = vld [vmem:[#allocation5 + $0xd90] sm:$0xff]  ;;  %v965_v17 = vld [vmem:[#allocation5 + $0xd58] sm:$0xff] }
  0x85   :  { %1243 = vmatpush1.msra.mxu0 %v860_v37  ;;  %1189 = vmatprep.subr.mxu1 %v789_v38  ;;  %v708_v18 = vld [vmem:[#allocation5 + $0x550] sm:$0xff]  ;;  %v701_v20 = vld [vmem:[#allocation5 + $0x518] sm:$0xff] }
  0x86   :  { %1244 = vmatprep.subr.mxu0 %v853_v39  ;;  %1190 = vmatpush2.msra.mxu1 %v788_v40  ;;  %v964_v19 = vld [vmem:[#allocation5 + $0xd50] sm:$0xff]  ;;  %v957_v21 = vld [vmem:[#allocation5 + $0xd18] sm:$0xff] }
  0x87   :  { %1245 = vmatpush1.msra.mxu0 %v852_v41  ;;  %1191 = vmatprep.subr.mxu1 %v781_v42  ;;  %v700_v22 = vld [vmem:[#allocation5 + $0x510] sm:$0xff]  ;;  %v693_v24 = vld [vmem:[#allocation5 + $0x4d8] sm:$0xff]  ;;  %v663_v42 = vld [vmem:[#allocation5 + $0x3e8] sm:$0xff] }
  0x88   :  { %1246 = vmatprep.subr.mxu0 %v845_v43  ;;  %1192 = vmatpush2.msra.mxu1 %v780_v44  ;;  %v956_v23 = vld [vmem:[#allocation5 + $0xd10] sm:$0xff]  ;;  %v949_v25 = vld [vmem:[#allocation5 + $0xcd8] sm:$0xff]  ;;  %v919_v43 = vld [vmem:[#allocation5 + $0xbe8] sm:$0xff] }
  0x89   :  { %1247 = vmatpush1.msra.mxu0 %v844_v45  ;;  %1193 = vmatprep.subr.mxu1 %v773_v46  ;;  %v692_v26 = vld [vmem:[#allocation5 + $0x4d0] sm:$0xff]  ;;  %v685_v28 = vld [vmem:[#allocation5 + $0x498] sm:$0xff]  ;;  %v662_v44 = vld [vmem:[#allocation5 + $0x3e0] sm:$0xff] }
  0x8a   :  { %1248 = vmatprep.subr.mxu0 %v837_v47  ;;  %1194 = vmatpush2.msra.mxu1 %v772_v48  ;;  %v948_v27 = vld [vmem:[#allocation5 + $0xcd0] sm:$0xff]  ;;  %v941_v29 = vld [vmem:[#allocation5 + $0xc98] sm:$0xff]  ;;  %v918_v45 = vld [vmem:[#allocation5 + $0xbe0] sm:$0xff] }
  0x8b   :  { %1249 = vmatpush1.msra.mxu0 %v836_v49  ;;  %1195 = vmatprep.subr.mxu1 %v765_v50  ;;  %v684_v30 = vld [vmem:[#allocation5 + $0x490] sm:$0xff]  ;;  %v677_v33 = vld [vmem:[#allocation5 + $0x458] sm:$0xff]  ;;  %v655_v46 = vld [vmem:[#allocation5 + $0x3a8] sm:$0xff] }
  0x8c   :  { %1250 = vmatprep.subr.mxu0 %v829_v51  ;;  %1196 = vmatpush2.msra.mxu1 %v764_v52  ;;  %v940_v31 = vld [vmem:[#allocation5 + $0xc90] sm:$0xff]  ;;  %v933_v35 = vld [vmem:[#allocation5 + $0xc58] sm:$0xff]  ;;  %v911_v47 = vld [vmem:[#allocation5 + $0xba8] sm:$0xff] }
  0x8d   :  { %1251 = vmatpush1.msra.mxu0 %v828_v53  ;;  %1197 = vmatprep.subr.mxu1 %v757_v54  ;;  %v676_v36 = vld [vmem:[#allocation5 + $0x450] sm:$0xff]  ;;  %v669_v38 = vld [vmem:[#allocation5 + $0x418] sm:$0xff]  ;;  %v654_v48 = vld [vmem:[#allocation5 + $0x3a0] sm:$0xff] }
  0x8e   :  { %1252 = vmatprep.subr.mxu0 %v821_v55  ;;  %1198 = vmatpush2.msra.mxu1 %v756_v56  ;;  %v932_v37 = vld [vmem:[#allocation5 + $0xc50] sm:$0xff]  ;;  %v925_v39 = vld [vmem:[#allocation5 + $0xc18] sm:$0xff]  ;;  %v910_v49 = vld [vmem:[#allocation5 + $0xba0] sm:$0xff] }
  0x8f   :  { %1253 = vmatpush1.msra.mxu0 %v820_v57  ;;  %1199 = vmatprep.subr.mxu1 %v749_v58  ;;  %v668_v40 = vld [vmem:[#allocation5 + $0x410] sm:$0xff]  ;;  %v647_v50 = vld [vmem:[#allocation5 + $0x368] sm:$0xff]  ;;  %v646_v52 = vld [vmem:[#allocation5 + $0x360] sm:$0xff] }
  0x90   :  { %1254 = vmatprep.subr.mxu0 %v813_v59  ;;  %1200 = vmatpush2.msra.mxu1 %v748_v60  ;;  %v924_v41 = vld [vmem:[#allocation5 + $0xc10] sm:$0xff]  ;;  %v903_v51 = vld [vmem:[#allocation5 + $0xb68] sm:$0xff]  ;;  %v902_v53 = vld [vmem:[#allocation5 + $0xb60] sm:$0xff] }
  0x91   :  { %1255 = vmatpush1.msra.mxu0 %v812_v61  ;;  %1201 = vmatprep.subr.mxu1 %v741_v62  ;;  %v639_v54 = vld [vmem:[#allocation5 + $0x328] sm:$0xff]  ;;  %v638_v56 = vld [vmem:[#allocation5 + $0x320] sm:$0xff] }
  0x92   :  { %1256 = vmatprep.subr.mxu0 %v805_v63  ;;  %1202 = vmatpush2.msra.mxu1 %v740_v0  ;;  %v895_v55 = vld [vmem:[#allocation5 + $0xb28] sm:$0xff]  ;;  %v894_v57 = vld [vmem:[#allocation5 + $0xb20] sm:$0xff] }
  0x93   :  { %1257 = vmatpush1.msra.mxu0 %v804_v2  ;;  %1203 = vmatprep.subr.mxu1 %v733_v4  ;;  %v631_v58 = vld [vmem:[#allocation5 + $0x2e8] sm:$0xff]  ;;  %v630_v60 = vld [vmem:[#allocation5 + $0x2e0] sm:$0xff] }
  0x94   :  { %1258 = vmatprep.subr.mxu0 %v797_v5  ;;  %1204 = vmatpush2.msra.mxu1 %v732_v6  ;;  %v887_v59 = vld [vmem:[#allocation5 + $0xae8] sm:$0xff]  ;;  %v886_v61 = vld [vmem:[#allocation5 + $0xae0] sm:$0xff] }
  0x95   :  { %1259 = vmatpush1.msra.mxu0 %v796_v7  ;;  %1205 = vmatprep.subr.mxu1 %v725_v8  ;;  %v623_v62 = vld [vmem:[#allocation5 + $0x2a8] sm:$0xff]  ;;  %v622_v0 = vld [vmem:[#allocation5 + $0x2a0] sm:$0xff] }
  0x96   :  { %3002 = vmatprep.subr.msk.mxu0 %vm990_vm0, %v981_v9  ;;  %1206 = vmatpush2.msra.mxu1 %v724_v10  ;;  %v879_v63 = vld [vmem:[#allocation5 + $0xaa8] sm:$0xff]  ;;  %v878_v2 = vld [vmem:[#allocation5 + $0xaa0] sm:$0xff] }
  0x97   :  { %3003 = vmatpush2.msk.msra.mxu0 %vm990_vm0, %v980_v11  ;;  %1207 = vmatprep.subr.mxu1 %v717_v12  ;;  %v615_v4 = vld [vmem:[#allocation5 + $0x268] sm:$0xff]  ;;  %v614_v6 = vld [vmem:[#allocation5 + $0x260] sm:$0xff] }
  0x98   :  { %1278 = vmatprep.subr.mxu0 %v973_v13  ;;  %1208 = vmatpush2.msra.mxu1 %v716_v14  ;;  %v871_v5 = vld [vmem:[#allocation5 + $0xa68] sm:$0xff]  ;;  %v870_v7 = vld [vmem:[#allocation5 + $0xa60] sm:$0xff] }
  0x99   :  { %1279 = vmatpush2.msra.mxu0 %v972_v15  ;;  %1209 = vmatprep.subr.mxu1 %v709_v16  ;;  %v607_v8 = vld [vmem:[#allocation5 + $0x228] sm:$0xff]  ;;  %v606_v10 = vld [vmem:[#allocation5 + $0x220] sm:$0xff] }
  0x9a   :  { %1280 = vmatprep.subr.mxu0 %v965_v17  ;;  %1210 = vmatpush2.msra.mxu1 %v708_v18  ;;  %v863_v9 = vld [vmem:[#allocation5 + $0xa28] sm:$0xff]  ;;  %v862_v11 = vld [vmem:[#allocation5 + $0xa20] sm:$0xff] }
  0x9b   :  { %1281 = vmatpush2.msra.mxu0 %v964_v19  ;;  %1211 = vmatprep.subr.mxu1 %v701_v20  ;;  %v599_v12 = vld [vmem:[#allocation5 + $0x1e8] sm:$0xff]  ;;  %v598_v14 = vld [vmem:[#allocation5 + $0x1e0] sm:$0xff] }
  0x9c   :  { %1282 = vmatprep.subr.mxu0 %v957_v21  ;;  %1212 = vmatpush2.msra.mxu1 %v700_v22  ;;  %v855_v13 = vld [vmem:[#allocation5 + $0x9e8] sm:$0xff]  ;;  %v854_v15 = vld [vmem:[#allocation5 + $0x9e0] sm:$0xff] }
  0x9d   :  { %1283 = vmatpush2.msra.mxu0 %v956_v23  ;;  %1213 = vmatprep.subr.mxu1 %v693_v24  ;;  %v591_v16 = vld [vmem:[#allocation5 + $0x1a8] sm:$0xff]  ;;  %v590_v18 = vld [vmem:[#allocation5 + $0x1a0] sm:$0xff] }
  0x9e   :  { %1284 = vmatprep.subr.mxu0 %v949_v25  ;;  %1214 = vmatpush2.msra.mxu1 %v692_v26  ;;  %v847_v17 = vld [vmem:[#allocation5 + $0x9a8] sm:$0xff]  ;;  %v846_v19 = vld [vmem:[#allocation5 + $0x9a0] sm:$0xff] }
  0x9f   :  { %1285 = vmatpush2.msra.mxu0 %v948_v27  ;;  %1215 = vmatprep.subr.mxu1 %v685_v28  ;;  %v583_v20 = vld [vmem:[#allocation5 + $0x168] sm:$0xff]  ;;  %v582_v22 = vld [vmem:[#allocation5 + $0x160] sm:$0xff] }
  0xa0   :  { %1286 = vmatprep.subr.mxu0 %v941_v29  ;;  %1216 = vmatpush2.msra.mxu1 %v684_v30  ;;  %v839_v21 = vld [vmem:[#allocation5 + $0x968] sm:$0xff]  ;;  %v838_v23 = vld [vmem:[#allocation5 + $0x960] sm:$0xff] }
  0xa1   :  { %1287 = vmatpush2.msra.mxu0 %v940_v31  ;;  %1217 = vmatprep.subr.mxu1 %v677_v33  ;;  %v575_v24 = vld [vmem:[#allocation5 + $0x128] sm:$0xff]  ;;  %v574_v26 = vld [vmem:[#allocation5 + $0x120] sm:$0xff] }
  0xa2   :  { %1288 = vmatprep.subr.mxu0 %v933_v35  ;;  %1218 = vmatpush2.msra.mxu1 %v676_v36  ;;  %v831_v25 = vld [vmem:[#allocation5 + $0x928] sm:$0xff]  ;;  %v830_v27 = vld [vmem:[#allocation5 + $0x920] sm:$0xff] }
  0xa3   :  { %1289 = vmatpush2.msra.mxu0 %v932_v37  ;;  %1219 = vmatprep.subr.mxu1 %v669_v38  ;;  %v567_v28 = vld [vmem:[#allocation5 + $0xe8] sm:$0xff]  ;;  %v566_v30 = vld [vmem:[#allocation5 + $0xe0] sm:$0xff] }
  0xa4   :  { %1290 = vmatprep.subr.mxu0 %v925_v39  ;;  %1220 = vmatpush2.msra.mxu1 %v668_v40  ;;  %v823_v29 = vld [vmem:[#allocation5 + $0x8e8] sm:$0xff]  ;;  %v822_v31 = vld [vmem:[#allocation5 + $0x8e0] sm:$0xff] }
  0xa5   :  { %1221 = vmatprep.mubr.f32.mxu1 %v3307_v1  ;;  %1291 = vmatpush2.msra.mxu0 %v924_v41  ;;  %v559_v33 = vld [vmem:[#allocation5 + $0xa8] sm:$0xff]  ;;  %v558_v36 = vld [vmem:[#allocation5 + $0xa0] sm:$0xff] }
  0xa6   :  { %3004 = vmatprep.mubr.msk.f32.mxu0 %vm986_vm1, %v3294_v32  ;;  %1222 = vmatmul.mubr.f32.vlgmr.msra.gmra.mxu1 %v3312_v3  ;;  %v815_v35 = vld [vmem:[#allocation5 + $0x8a8] sm:$0xff]  ;;  %v814_v37 = vld [vmem:[#allocation5 + $0x8a0] sm:$0xff] }
  0xa7   :  { %1293 = vmatmul.mubr.f32.vlgmr.msra.gmra.mxu0 %v3299_v34  ;;  %1299 = vmatprep.subr.mxu0 %v663_v42  ;;  %v551_v38 = vld [vmem:[#allocation5 + $0x68] sm:$0xff]  ;;  %v550_v40 = vld [vmem:[#allocation5 + $0x60] sm:$0xff] }
  0xa8   :  { %1370 = vmatprep.subr.mxu1 %v919_v43  ;;  %1300 = vmatpush1.msra.mxu0 %v662_v44  ;;  %v807_v39 = vld [vmem:[#allocation5 + $0x868] sm:$0xff]  ;;  %v806_v41 = vld [vmem:[#allocation5 + $0x860] sm:$0xff] }
  0xa9   :  { %1371 = vmatpush1.msra.mxu1 %v918_v45  ;;  %1301 = vmatprep.subr.mxu0 %v655_v46  ;;  %v543_v42 = vld [vmem:[#allocation5 + $0x28] sm:$0xff]  ;;  %v542_v44 = vld [vmem:[#allocation5 + $0x20] sm:$0xff] }
  0xaa   :  { %1372 = vmatprep.subr.mxu1 %v911_v47  ;;  %1302 = vmatpush1.msra.mxu0 %v654_v48  ;;  %v799_v43 = vld [vmem:[#allocation5 + $0x828] sm:$0xff]  ;;  %v798_v45 = vld [vmem:[#allocation5 + $0x820] sm:$0xff] }
  0xab   :  { %1373 = vmatpush1.msra.mxu1 %v910_v49  ;;  %1303 = vmatprep.subr.mxu0 %v647_v50  ;;  %v791_v46 = vld [vmem:[#allocation5 + $0x7e8] sm:$0xff]  ;;  %v790_v48 = vld [vmem:[#allocation5 + $0x7e0] sm:$0xff] }
  0xac   :  { %1374 = vmatprep.subr.mxu1 %v903_v51  ;;  %1304 = vmatpush1.msra.mxu0 %v646_v52  ;;  %v983_v47 = vld [vmem:[#allocation5 + $0xde8] sm:$0x1]  ;;  %v982_v49 = vld [vmem:[#allocation5 + $0xde0] sm:$0x1] }
  0xad   :  { %1375 = vmatpush1.msra.mxu1 %v902_v53  ;;  %1305 = vmatprep.subr.mxu0 %v639_v54  ;;  %v783_v50 = vld [vmem:[#allocation5 + $0x7a8] sm:$0xff]  ;;  %v782_v52 = vld [vmem:[#allocation5 + $0x7a0] sm:$0xff] }
  0xae   :  { %1376 = vmatprep.subr.mxu1 %v895_v55  ;;  %1306 = vmatpush1.msra.mxu0 %v638_v56  ;;  %v975_v51 = vld [vmem:[#allocation5 + $0xda8] sm:$0xff]  ;;  %v974_v53 = vld [vmem:[#allocation5 + $0xda0] sm:$0xff] }
  0xaf   :  { %1377 = vmatpush1.msra.mxu1 %v894_v57  ;;  %1307 = vmatprep.subr.mxu0 %v631_v58  ;;  %v775_v54 = vld [vmem:[#allocation5 + $0x768] sm:$0xff]  ;;  %v774_v56 = vld [vmem:[#allocation5 + $0x760] sm:$0xff] }
  0xb0   :  { %1378 = vmatprep.subr.mxu1 %v887_v59  ;;  %1308 = vmatpush1.msra.mxu0 %v630_v60  ;;  %v967_v55 = vld [vmem:[#allocation5 + $0xd68] sm:$0xff]  ;;  %v966_v57 = vld [vmem:[#allocation5 + $0xd60] sm:$0xff] }
  0xb1   :  { %1379 = vmatpush1.msra.mxu1 %v886_v61  ;;  %1309 = vmatprep.subr.mxu0 %v623_v62  ;;  %v767_v58 = vld [vmem:[#allocation5 + $0x728] sm:$0xff]  ;;  %v766_v60 = vld [vmem:[#allocation5 + $0x720] sm:$0xff] }
  0xb2   :  { %1380 = vmatprep.subr.mxu1 %v879_v63  ;;  %1310 = vmatpush1.msra.mxu0 %v622_v0  ;;  %v959_v59 = vld [vmem:[#allocation5 + $0xd28] sm:$0xff]  ;;  %v958_v61 = vld [vmem:[#allocation5 + $0xd20] sm:$0xff] }
  0xb3   :  { %1381 = vmatpush1.msra.mxu1 %v878_v2  ;;  %1311 = vmatprep.subr.mxu0 %v615_v4  ;;  %v759_v62 = vld [vmem:[#allocation5 + $0x6e8] sm:$0xff]  ;;  %v758_v0 = vld [vmem:[#allocation5 + $0x6e0] sm:$0xff] }
  0xb4   :  { %1382 = vmatprep.subr.mxu1 %v871_v5  ;;  %1312 = vmatpush1.msra.mxu0 %v614_v6  ;;  %v951_v63 = vld [vmem:[#allocation5 + $0xce8] sm:$0xff]  ;;  %v950_v2 = vld [vmem:[#allocation5 + $0xce0] sm:$0xff] }
  0xb5   :  { %1383 = vmatpush1.msra.mxu1 %v870_v7  ;;  %1313 = vmatprep.subr.mxu0 %v607_v8  ;;  %v751_v4 = vld [vmem:[#allocation5 + $0x6a8] sm:$0xff]  ;;  %v750_v6 = vld [vmem:[#allocation5 + $0x6a0] sm:$0xff] }
  0xb6   :  { %1384 = vmatprep.subr.mxu1 %v863_v9  ;;  %1314 = vmatpush1.msra.mxu0 %v606_v10  ;;  %v943_v5 = vld [vmem:[#allocation5 + $0xca8] sm:$0xff]  ;;  %v942_v7 = vld [vmem:[#allocation5 + $0xca0] sm:$0xff] }
  0xb7   :  { %1385 = vmatpush1.msra.mxu1 %v862_v11  ;;  %1315 = vmatprep.subr.mxu0 %v599_v12  ;;  %v743_v8 = vld [vmem:[#allocation5 + $0x668] sm:$0xff]  ;;  %v742_v10 = vld [vmem:[#allocation5 + $0x660] sm:$0xff] }
  0xb8   :  { %1386 = vmatprep.subr.mxu1 %v855_v13  ;;  %1316 = vmatpush1.msra.mxu0 %v598_v14  ;;  %v935_v9 = vld [vmem:[#allocation5 + $0xc68] sm:$0xff]  ;;  %v934_v11 = vld [vmem:[#allocation5 + $0xc60] sm:$0xff] }
  0xb9   :  { %1387 = vmatpush1.msra.mxu1 %v854_v15  ;;  %1317 = vmatprep.subr.mxu0 %v591_v16  ;;  %v735_v12 = vld [vmem:[#allocation5 + $0x628] sm:$0xff]  ;;  %v734_v14 = vld [vmem:[#allocation5 + $0x620] sm:$0xff] }
  0xba   :  { %1388 = vmatprep.subr.mxu1 %v847_v17  ;;  %1318 = vmatpush1.msra.mxu0 %v590_v18  ;;  %v927_v13 = vld [vmem:[#allocation5 + $0xc28] sm:$0xff]  ;;  %v926_v15 = vld [vmem:[#allocation5 + $0xc20] sm:$0xff]  ;;  %v665_v17 = vld [vmem:[#allocation5 + $0x3f8] sm:$0xff] }
  0xbb   :  { %1389 = vmatpush1.msra.mxu1 %v846_v19  ;;  %1319 = vmatprep.subr.mxu0 %v583_v20  ;;  %v727_v16 = vld [vmem:[#allocation5 + $0x5e8] sm:$0xff]  ;;  %v726_v18 = vld [vmem:[#allocation5 + $0x5e0] sm:$0xff]  ;;  %v664_v19 = vld [vmem:[#allocation5 + $0x3f0] sm:$0xff] }
  0xbc   :  { %1390 = vmatprep.subr.mxu1 %v839_v21  ;;  %1320 = vmatpush1.msra.mxu0 %v582_v22  ;;  %v719_v20 = vld [vmem:[#allocation5 + $0x5a8] sm:$0xff]  ;;  %v657_v21 = vld [vmem:[#allocation5 + $0x3b8] sm:$0xff]  ;;  %v718_v22 = vld [vmem:[#allocation5 + $0x5a0] sm:$0xff] }
  0xbd   :  { %1391 = vmatpush1.msra.mxu1 %v838_v23  ;;  %1321 = vmatprep.subr.mxu0 %v575_v24  ;;  %v656_v23 = vld [vmem:[#allocation5 + $0x3b0] sm:$0xff]  ;;  %v711_v24 = vld [vmem:[#allocation5 + $0x568] sm:$0xff] }
  0xbe   :  { %1392 = vmatprep.subr.mxu1 %v831_v25  ;;  %1322 = vmatpush1.msra.mxu0 %v574_v26  ;;  %v649_v25 = vld [vmem:[#allocation5 + $0x378] sm:$0xff]  ;;  %v710_v26 = vld [vmem:[#allocation5 + $0x560] sm:$0xff] }
  0xbf   :  { %1393 = vmatpush1.msra.mxu1 %v830_v27  ;;  %1323 = vmatprep.subr.mxu0 %v567_v28  ;;  %v648_v27 = vld [vmem:[#allocation5 + $0x370] sm:$0xff]  ;;  %v703_v28 = vld [vmem:[#allocation5 + $0x528] sm:$0xff] }
  0xc0   :  { %1394 = vmatprep.subr.mxu1 %v823_v29  ;;  %1324 = vmatpush1.msra.mxu0 %v566_v30  ;;  %v702_v29 = vld [vmem:[#allocation5 + $0x520] sm:$0xff]  ;;  %v640_v30 = vld [vmem:[#allocation5 + $0x330] sm:$0xff] }
  0xc1   :  { %1395 = vmatpush1.msra.mxu1 %v822_v31  ;;  %1325 = vmatprep.subr.mxu0 %v559_v33  ;;  %v633_v31 = vld [vmem:[#allocation5 + $0x2f8] sm:$0xff]  ;;  %v694_v33 = vld [vmem:[#allocation5 + $0x4e0] sm:$0xff] }
  0xc2   :  { %1396 = vmatprep.subr.mxu1 %v815_v35  ;;  %1326 = vmatpush1.msra.mxu0 %v558_v36  ;;  %v632_v35 = vld [vmem:[#allocation5 + $0x2f0] sm:$0xff]  ;;  %v687_v36 = vld [vmem:[#allocation5 + $0x4a8] sm:$0xff] }
  0xc3   :  { %1397 = vmatpush1.msra.mxu1 %v814_v37  ;;  %1327 = vmatprep.subr.mxu0 %v551_v38  ;;  %v625_v37 = vld [vmem:[#allocation5 + $0x2b8] sm:$0xff]  ;;  %v686_v38 = vld [vmem:[#allocation5 + $0x4a0] sm:$0xff] }
  0xc4   :  { %1398 = vmatprep.subr.mxu1 %v807_v39  ;;  %1328 = vmatpush1.msra.mxu0 %v550_v40  ;;  %v624_v39 = vld [vmem:[#allocation5 + $0x2b0] sm:$0xff]  ;;  %v679_v40 = vld [vmem:[#allocation5 + $0x468] sm:$0xff] }
  0xc5   :  { %1399 = vmatpush1.msra.mxu1 %v806_v41  ;;  %1329 = vmatprep.subr.mxu0 %v543_v42  ;;  %v617_v41 = vld [vmem:[#allocation5 + $0x278] sm:$0xff]  ;;  %v678_v42 = vld [vmem:[#allocation5 + $0x460] sm:$0xff] }
  0xc6   :  { %1400 = vmatprep.subr.mxu1 %v799_v43  ;;  %1330 = vmatpush1.msra.mxu0 %v542_v44  ;;  %v616_v43 = vld [vmem:[#allocation5 + $0x270] sm:$0xff]  ;;  %v671_v44 = vld [vmem:[#allocation5 + $0x428] sm:$0xff] }
  0xc7   :  { %1401 = vmatpush1.msra.mxu1 %v798_v45  ;;  %1331 = vmatprep.subr.mxu0 %v791_v46  ;;  %v609_v45 = vld [vmem:[#allocation5 + $0x238] sm:$0xff]  ;;  %v670_v46 = vld [vmem:[#allocation5 + $0x420] sm:$0xff] }
  0xc8   :  { %3005 = vmatprep.subr.msk.mxu1 %vm990_vm0, %v983_v47  ;;  %1332 = vmatpush2.msra.mxu0 %v790_v48  ;;  %v608_v47 = vld [vmem:[#allocation5 + $0x230] sm:$0xff]  ;;  %v601_v48 = vld [vmem:[#allocation5 + $0x1f8] sm:$0xff] }
  0xc9   :  { %3006 = vmatpush2.msk.msra.mxu1 %vm990_vm0, %v982_v49  ;;  %1333 = vmatprep.subr.mxu0 %v783_v50  ;;  %v921_v49 = vld [vmem:[#allocation5 + $0xbf8] sm:$0xff]  ;;  %v600_v50 = vld [vmem:[#allocation5 + $0x1f0] sm:$0xff] }
  0xca   :  { %1420 = vmatprep.subr.mxu1 %v975_v51  ;;  %1334 = vmatpush2.msra.mxu0 %v782_v52  ;;  %v920_v51 = vld [vmem:[#allocation5 + $0xbf0] sm:$0xff]  ;;  %v593_v52 = vld [vmem:[#allocation5 + $0x1b8] sm:$0xff] }
  0xcb   :  { %1421 = vmatpush2.msra.mxu1 %v974_v53  ;;  %1335 = vmatprep.subr.mxu0 %v775_v54  ;;  %v913_v53 = vld [vmem:[#allocation5 + $0xbb8] sm:$0xff]  ;;  %v592_v54 = vld [vmem:[#allocation5 + $0x1b0] sm:$0xff] }
  0xcc   :  { %1422 = vmatprep.subr.mxu1 %v967_v55  ;;  %1336 = vmatpush2.msra.mxu0 %v774_v56  ;;  %v912_v55 = vld [vmem:[#allocation5 + $0xbb0] sm:$0xff]  ;;  %v585_v56 = vld [vmem:[#allocation5 + $0x178] sm:$0xff] }
  0xcd   :  { %1423 = vmatpush2.msra.mxu1 %v966_v57  ;;  %1337 = vmatprep.subr.mxu0 %v767_v58  ;;  %v905_v57 = vld [vmem:[#allocation5 + $0xb78] sm:$0xff]  ;;  %v584_v58 = vld [vmem:[#allocation5 + $0x170] sm:$0xff] }
  0xce   :  { %1424 = vmatprep.subr.mxu1 %v959_v59  ;;  %1338 = vmatpush2.msra.mxu0 %v766_v60  ;;  %v904_v59 = vld [vmem:[#allocation5 + $0xb70] sm:$0xff]  ;;  %v897_v60 = vld [vmem:[#allocation5 + $0xb38] sm:$0xff] }
  0xcf   :  { %1425 = vmatpush2.msra.mxu1 %v958_v61  ;;  %1339 = vmatprep.subr.mxu0 %v759_v62  ;;  %v896_v61 = vld [vmem:[#allocation5 + $0xb30] sm:$0xff]  ;;  %v569_v62 = vld [vmem:[#allocation5 + $0xf8] sm:$0xff] }
  0xd0   :  { %1426 = vmatprep.subr.mxu1 %v951_v63  ;;  %1340 = vmatpush2.msra.mxu0 %v758_v0  ;;  %v889_v63 = vld [vmem:[#allocation5 + $0xaf8] sm:$0xff]  ;;  %v568_v0 = vld [vmem:[#allocation5 + $0xf0] sm:$0xff] }
  0xd1   :  { %1427 = vmatpush2.msra.mxu1 %v950_v2  ;;  %1341 = vmatprep.subr.mxu0 %v751_v4  ;;  %v888_v2 = vld [vmem:[#allocation5 + $0xaf0] sm:$0xff]  ;;  %v561_v4 = vld [vmem:[#allocation5 + $0xb8] sm:$0xff] }
  0xd2   :  { %1428 = vmatprep.subr.mxu1 %v943_v5  ;;  %1342 = vmatpush2.msra.mxu0 %v750_v6  ;;  %v881_v5 = vld [vmem:[#allocation5 + $0xab8] sm:$0xff]  ;;  %v560_v6 = vld [vmem:[#allocation5 + $0xb0] sm:$0xff] }
  0xd3   :  { %1429 = vmatpush2.msra.mxu1 %v942_v7  ;;  %1343 = vmatprep.subr.mxu0 %v743_v8  ;;  %v880_v7 = vld [vmem:[#allocation5 + $0xab0] sm:$0xff]  ;;  %v553_v8 = vld [vmem:[#allocation5 + $0x78] sm:$0xff] }
  0xd4   :  { %1430 = vmatprep.subr.mxu1 %v935_v9  ;;  %1344 = vmatpush2.msra.mxu0 %v742_v10  ;;  %v873_v9 = vld [vmem:[#allocation5 + $0xa78] sm:$0xff]  ;;  %v552_v10 = vld [vmem:[#allocation5 + $0x70] sm:$0xff] }
  0xd5   :  { %1431 = vmatpush2.msra.mxu1 %v934_v11  ;;  %1345 = vmatprep.subr.mxu0 %v735_v12  ;;  %v872_v11 = vld [vmem:[#allocation5 + $0xa70] sm:$0xff]  ;;  %v545_v12 = vld [vmem:[#allocation5 + $0x38] sm:$0xff] }
  0xd6   :  { %1432 = vmatprep.subr.mxu1 %v927_v13  ;;  %1346 = vmatpush2.msra.mxu0 %v734_v14  ;;  %v865_v13 = vld [vmem:[#allocation5 + $0xa38] sm:$0xff]  ;;  %v544_v14 = vld [vmem:[#allocation5 + $0x30] sm:$0xff] }
  0xd7   :  { %1433 = vmatpush2.msra.mxu1 %v926_v15  ;;  %3007 = vmatprep.mubr.msk.f32.mxu1 %vm986_vm1, %v3294_v32  ;;  %v641_v32 = vld [vmem:[#allocation5 + $0x338] sm:$0xff]  ;;  %v864_v15 = vld [vmem:[#allocation5 + $0xa30] sm:$0xff] }
  0xd8   :  { %1347 = vmatprep.subr.mxu0 %v727_v16  ;;  %1435 = vmatmul.mubr.f32.vlgmr.msra.gmra.mxu1 %v3299_v34  ;;  %v695_v34 = vld [vmem:[#allocation5 + $0x4e8] sm:$0xff]  ;;  %v793_v16 = vld [vmem:[#allocation5 + $0x7f8] sm:$0xff] }
  0xd9   :  { %1441 = vmatprep.subr.mxu1 %v665_v17  ;;  %1348 = vmatpush2.msra.mxu0 %v726_v18  ;;  %v857_v17 = vld [vmem:[#allocation5 + $0x9f8] sm:$0xff]  ;;  %v792_v18 = vld [vmem:[#allocation5 + $0x7f0] sm:$0xff] }
  0xda   :  { %1442 = vmatpush1.msra.mxu1 %v664_v19  ;;  %1349 = vmatprep.subr.mxu0 %v719_v20  ;;  %v856_v19 = vld [vmem:[#allocation5 + $0x9f0] sm:$0xff]  ;;  %v785_v20 = vld [vmem:[#allocation5 + $0x7b8] sm:$0xff] }
  0xdb   :  { %1443 = vmatprep.subr.mxu1 %v657_v21  ;;  %1350 = vmatpush2.msra.mxu0 %v718_v22  ;;  %v849_v21 = vld [vmem:[#allocation5 + $0x9b8] sm:$0xff]  ;;  %v784_v22 = vld [vmem:[#allocation5 + $0x7b0] sm:$0xff] }
  0xdc   :  { %1444 = vmatpush1.msra.mxu1 %v656_v23  ;;  %1351 = vmatprep.subr.mxu0 %v711_v24  ;;  %v848_v23 = vld [vmem:[#allocation5 + $0x9b0] sm:$0xff]  ;;  %v777_v24 = vld [vmem:[#allocation5 + $0x778] sm:$0xff] }
  0xdd   :  { %1445 = vmatprep.subr.mxu1 %v649_v25  ;;  %1352 = vmatpush2.msra.mxu0 %v710_v26  ;;  %v841_v25 = vld [vmem:[#allocation5 + $0x978] sm:$0xff]  ;;  %v776_v26 = vld [vmem:[#allocation5 + $0x770] sm:$0xff] }
  0xde   :  { %1446 = vmatpush1.msra.mxu1 %v648_v27  ;;  %1353 = vmatprep.subr.mxu0 %v703_v28  ;;  %v840_v27 = vld [vmem:[#allocation5 + $0x970] sm:$0xff]  ;;  %v769_v28 = vld [vmem:[#allocation5 + $0x738] sm:$0xff] }
  0xdf   :  { %1447 = vmatprep.subr.mxu1 %v641_v32  ;;  %1354 = vmatpush2.msra.mxu0 %v702_v29  ;;  %v833_v32 = vld [vmem:[#allocation5 + $0x938] sm:$0xff]  ;;  %v768_v29 = vld [vmem:[#allocation5 + $0x730] sm:$0xff] }
  0xe0   :  { %1448 = vmatpush1.msra.mxu1 %v640_v30  ;;  %1355 = vmatprep.subr.mxu0 %v695_v34  ;;  %v832_v30 = vld [vmem:[#allocation5 + $0x930] sm:$0xff]  ;;  %v761_v34 = vld [vmem:[#allocation5 + $0x6f8] sm:$0xff] }
  0xe1   :  { %1449 = vmatprep.subr.mxu1 %v633_v31  ;;  %1356 = vmatpush2.msra.mxu0 %v694_v33  ;;  %v825_v31 = vld [vmem:[#allocation5 + $0x8f8] sm:$0xff]  ;;  %v760_v33 = vld [vmem:[#allocation5 + $0x6f0] sm:$0xff] }
  0xe2   :  { %1450 = vmatpush1.msra.mxu1 %v632_v35  ;;  %1357 = vmatprep.subr.mxu0 %v687_v36  ;;  %v824_v35 = vld [vmem:[#allocation5 + $0x8f0] sm:$0xff]  ;;  %v753_v36 = vld [vmem:[#allocation5 + $0x6b8] sm:$0xff] }
  0xe3   :  { %1451 = vmatprep.subr.mxu1 %v625_v37  ;;  %1358 = vmatpush2.msra.mxu0 %v686_v38  ;;  %v817_v37 = vld [vmem:[#allocation5 + $0x8b8] sm:$0xff]  ;;  %v752_v38 = vld [vmem:[#allocation5 + $0x6b0] sm:$0xff] }
  0xe4   :  { %1452 = vmatpush1.msra.mxu1 %v624_v39  ;;  %1359 = vmatprep.subr.mxu0 %v679_v40  ;;  %v816_v39 = vld [vmem:[#allocation5 + $0x8b0] sm:$0xff]  ;;  %v745_v40 = vld [vmem:[#allocation5 + $0x678] sm:$0xff] }
  0xe5   :  { %1453 = vmatprep.subr.mxu1 %v617_v41  ;;  %1360 = vmatpush2.msra.mxu0 %v678_v42  ;;  %v809_v41 = vld [vmem:[#allocation5 + $0x878] sm:$0xff]  ;;  %v744_v42 = vld [vmem:[#allocation5 + $0x670] sm:$0xff] }
  0xe6   :  { %1454 = vmatpush1.msra.mxu1 %v616_v43  ;;  %1361 = vmatprep.subr.mxu0 %v671_v44  ;;  %v808_v43 = vld [vmem:[#allocation5 + $0x870] sm:$0xff]  ;;  %v737_v44 = vld [vmem:[#allocation5 + $0x638] sm:$0xff] }
  0xe7   :  { %1455 = vmatprep.subr.mxu1 %v609_v45  ;;  %1362 = vmatpush2.msra.mxu0 %v670_v46  ;;  %v801_v45 = vld [vmem:[#allocation5 + $0x838] sm:$0xff]  ;;  %v736_v46 = vld [vmem:[#allocation5 + $0x630] sm:$0xff] }
  0xe8   :  { %1363 = vmatprep.mubr.f32.mxu0 %v3307_v1  ;;  %1456 = vmatpush1.msra.mxu1 %v608_v47  ;;  %v577_v1 = vld [vmem:[#allocation5 + $0x138] sm:$0xff]  ;;  %v800_v47 = vld [vmem:[#allocation5 + $0x830] sm:$0xff] }
  0xe9   :  { %1364 = vmatmul.mubr.f32.vlgmr.msra.gmra.mxu0 %v3312_v3  ;;  %1457 = vmatprep.subr.mxu1 %v601_v48  ;;  %v576_v3 = vld [vmem:[#allocation5 + $0x130] sm:$0xff]  ;;  %v729_v48 = vld [vmem:[#allocation5 + $0x5f8] sm:$0xff] }
  0xea   :  { %1512 = vmatprep.subr.mxu0 %v921_v49  ;;  %1458 = vmatpush1.msra.mxu1 %v600_v50  ;;  %v985_v49 = vld [vmem:[#allocation5 + $0xdf8] sm:$0x1]  ;;  %v728_v50 = vld [vmem:[#allocation5 + $0x5f0] sm:$0xff] }
  0xeb   :  { %1513 = vmatpush1.msra.mxu0 %v920_v51  ;;  %1459 = vmatprep.subr.mxu1 %v593_v52  ;;  %v984_v51 = vld [vmem:[#allocation5 + $0xdf0] sm:$0x1]  ;;  %v721_v52 = vld [vmem:[#allocation5 + $0x5b8] sm:$0xff] }
  0xec   :  { %1514 = vmatprep.subr.mxu0 %v913_v53  ;;  %1460 = vmatpush1.msra.mxu1 %v592_v54  ;;  %v977_v53 = vld [vmem:[#allocation5 + $0xdb8] sm:$0xff]  ;;  %v720_v54 = vld [vmem:[#allocation5 + $0x5b0] sm:$0xff] }
  0xed   :  { %1515 = vmatpush1.msra.mxu0 %v912_v55  ;;  %1461 = vmatprep.subr.mxu1 %v585_v56  ;;  %v976_v55 = vld [vmem:[#allocation5 + $0xdb0] sm:$0xff]  ;;  %v713_v56 = vld [vmem:[#allocation5 + $0x578] sm:$0xff] }
  0xee   :  { %1516 = vmatprep.subr.mxu0 %v905_v57  ;;  %1462 = vmatpush1.msra.mxu1 %v584_v58  ;;  %v969_v57 = vld [vmem:[#allocation5 + $0xd78] sm:$0xff]  ;;  %v712_v58 = vld [vmem:[#allocation5 + $0x570] sm:$0xff] }
  0xef   :  { %1517 = vmatpush1.msra.mxu0 %v904_v59  ;;  %1463 = vmatprep.subr.mxu1 %v577_v1  ;;  %v968_v59 = vld [vmem:[#allocation5 + $0xd70] sm:$0xff]  ;;  %v705_v1 = vld [vmem:[#allocation5 + $0x538] sm:$0xff] }
  0xf0   :  { %1518 = vmatprep.subr.mxu0 %v897_v60  ;;  %1464 = vmatpush1.msra.mxu1 %v576_v3  ;;  %v961_v60 = vld [vmem:[#allocation5 + $0xd38] sm:$0xff]  ;;  %v704_v3 = vld [vmem:[#allocation5 + $0x530] sm:$0xff] }
  0xf1   :  { %1519 = vmatpush1.msra.mxu0 %v896_v61  ;;  %1465 = vmatprep.subr.mxu1 %v569_v62  ;;  %v960_v61 = vld [vmem:[#allocation5 + $0xd30] sm:$0xff]  ;;  %v697_v62 = vld [vmem:[#allocation5 + $0x4f8] sm:$0xff] }
  0xf2   :  { %1520 = vmatprep.subr.mxu0 %v889_v63  ;;  %1466 = vmatpush1.msra.mxu1 %v568_v0  ;;  %v953_v63 = vld [vmem:[#allocation5 + $0xcf8] sm:$0xff]  ;;  %v696_v0 = vld [vmem:[#allocation5 + $0x4f0] sm:$0xff] }
  0xf3   :  { %1521 = vmatpush1.msra.mxu0 %v888_v2  ;;  %1467 = vmatprep.subr.mxu1 %v561_v4  ;;  %v952_v2 = vld [vmem:[#allocation5 + $0xcf0] sm:$0xff]  ;;  %v689_v4 = vld [vmem:[#allocation5 + $0x4b8] sm:$0xff] }
  0xf4   :  { %1522 = vmatprep.subr.mxu0 %v881_v5  ;;  %1468 = vmatpush1.msra.mxu1 %v560_v6  ;;  %v945_v5 = vld [vmem:[#allocation5 + $0xcb8] sm:$0xff]  ;;  %v688_v6 = vld [vmem:[#allocation5 + $0x4b0] sm:$0xff] }
  0xf5   :  { %1523 = vmatpush1.msra.mxu0 %v880_v7  ;;  %1469 = vmatprep.subr.mxu1 %v553_v8  ;;  %v944_v7 = vld [vmem:[#allocation5 + $0xcb0] sm:$0xff]  ;;  %v681_v8 = vld [vmem:[#allocation5 + $0x478] sm:$0xff] }
  0xf6   :  { %1524 = vmatprep.subr.mxu0 %v873_v9  ;;  %1470 = vmatpush1.msra.mxu1 %v552_v10  ;;  %v937_v9 = vld [vmem:[#allocation5 + $0xc78] sm:$0xff]  ;;  %v680_v10 = vld [vmem:[#allocation5 + $0x470] sm:$0xff] }
  0xf7   :  { %1525 = vmatpush1.msra.mxu0 %v872_v11  ;;  %1471 = vmatprep.subr.mxu1 %v545_v12  ;;  %v936_v11 = vld [vmem:[#allocation5 + $0xc70] sm:$0xff]  ;;  %v673_v12 = vld [vmem:[#allocation5 + $0x438] sm:$0xff] }
  0xf8   :  { %1526 = vmatprep.subr.mxu0 %v865_v13  ;;  %1472 = vmatpush1.msra.mxu1 %v544_v14  ;;  %v929_v13 = vld [vmem:[#allocation5 + $0xc38] sm:$0xff]  ;;  %v672_v14 = vld [vmem:[#allocation5 + $0x430] sm:$0xff] }
  0xf9   :  { %1527 = vmatpush1.msra.mxu0 %v864_v15  ;;  %1473 = vmatprep.subr.mxu1 %v793_v16  ;;  %v928_v15 = vld [vmem:[#allocation5 + $0xc30] sm:$0xff]  ;;  %v3112_v16 = vld [vmem:[%s3424_s1 + $0x8] sm:$0xff] }
  0xfa   :  { %1528 = vmatprep.subr.mxu0 %v857_v17  ;;  %1474 = vmatpush2.msra.mxu1 %v792_v18  ;;  %v207_v17 = vld [vmem:[#allocation2 + $0x3c8] sm:$0xff] }
  0xfb   :  { %1529 = vmatpush1.msra.mxu0 %v856_v19  ;;  %1475 = vmatprep.subr.mxu1 %v785_v20  ;;  %v463_v18 = vld [vmem:[#allocation2 + $0xbc8] sm:$0xff]  ;;  %v3113_v19 = vld [vmem:[%s3424_s1 + $0x18] sm:$0xff]  ;;  %v206_v20 = vld [vmem:[#allocation2 + $0x3c0] sm:$0xff] }
  0xfc   :  { %1530 = vmatprep.subr.mxu0 %v849_v21  ;;  %1476 = vmatpush2.msra.mxu1 %v784_v22  ;;  %v462_v21 = vld [vmem:[#allocation2 + $0xbc0] sm:$0xff] }
  0xfd   :  { %1531 = vmatpush1.msra.mxu0 %v848_v23  ;;  %1477 = vmatprep.subr.mxu1 %v777_v24  ;;  %v3114_v22 = vld [vmem:[%s3424_s1] sm:$0xff]  ;;  %v3115_v23 = vld [vmem:[%s3424_s1 + $0x10] sm:$0xff]  ;;  %v199_v24 = vld [vmem:[#allocation2 + $0x388] sm:$0xff] }
  0xfe   :  { %1532 = vmatprep.subr.mxu0 %v841_v25  ;;  %1478 = vmatpush2.msra.mxu1 %v776_v26  ;;  %v455_v25 = vld [vmem:[#allocation2 + $0xb88] sm:$0xff]  ;;  %v198_v26 = vld [vmem:[#allocation2 + $0x380] sm:$0xff] }
  0xff   :  { %1533 = vmatpush1.msra.mxu0 %v840_v27  ;;  %1479 = vmatprep.subr.mxu1 %v769_v28  ;;  %v454_v27 = vld [vmem:[#allocation2 + $0xb80] sm:$0xff]  ;;  %v191_v28 = vld [vmem:[#allocation2 + $0x348] sm:$0xff] }
 0x100   :  { %1534 = vmatprep.subr.mxu0 %v833_v32  ;;  %1480 = vmatpush2.msra.mxu1 %v768_v29  ;;  %v447_v32 = vld [vmem:[#allocation2 + $0xb48] sm:$0xff]  ;;  %v190_v29 = vld [vmem:[#allocation2 + $0x340] sm:$0xff] }
 0x101   :  { %1535 = vmatpush1.msra.mxu0 %v832_v30  ;;  %1481 = vmatprep.subr.mxu1 %v761_v34  ;;  %v446_v30 = vld [vmem:[#allocation2 + $0xb40] sm:$0xff]  ;;  %v183_v34 = vld [vmem:[#allocation2 + $0x308] sm:$0xff] }
 0x102   :  { %1536 = vmatprep.subr.mxu0 %v825_v31  ;;  %1482 = vmatpush2.msra.mxu1 %v760_v33  ;;  %v439_v31 = vld [vmem:[#allocation2 + $0xb08] sm:$0xff]  ;;  %v182_v33 = vld [vmem:[#allocation2 + $0x300] sm:$0xff] }
 0x103   :  { %1537 = vmatpush1.msra.mxu0 %v824_v35  ;;  %1483 = vmatprep.subr.mxu1 %v753_v36  ;;  %v438_v35 = vld [vmem:[#allocation2 + $0xb00] sm:$0xff]  ;;  %v175_v36 = vld [vmem:[#allocation2 + $0x2c8] sm:$0xff] }
 0x104   :  { %1538 = vmatprep.subr.mxu0 %v817_v37  ;;  %1484 = vmatpush2.msra.mxu1 %v752_v38  ;;  %v431_v37 = vld [vmem:[#allocation2 + $0xac8] sm:$0xff]  ;;  %v174_v38 = vld [vmem:[#allocation2 + $0x2c0] sm:$0xff] }
 0x105   :  { %1539 = vmatpush1.msra.mxu0 %v816_v39  ;;  %1485 = vmatprep.subr.mxu1 %v745_v40  ;;  %v430_v39 = vld [vmem:[#allocation2 + $0xac0] sm:$0xff]  ;;  %v167_v40 = vld [vmem:[#allocation2 + $0x288] sm:$0xff] }
 0x106   :  { %1540 = vmatprep.subr.mxu0 %v809_v41  ;;  %1486 = vmatpush2.msra.mxu1 %v744_v42  ;;  %v423_v41 = vld [vmem:[#allocation2 + $0xa88] sm:$0xff]  ;;  %v166_v42 = vld [vmem:[#allocation2 + $0x280] sm:$0xff] }
 0x107   :  { %1541 = vmatpush1.msra.mxu0 %v808_v43  ;;  %1487 = vmatprep.subr.mxu1 %v737_v44  ;;  %v422_v43 = vld [vmem:[#allocation2 + $0xa80] sm:$0xff]  ;;  %v159_v44 = vld [vmem:[#allocation2 + $0x248] sm:$0xff] }
 0x108   :  { %1542 = vmatprep.subr.mxu0 %v801_v45  ;;  %1488 = vmatpush2.msra.mxu1 %v736_v46  ;;  %v415_v45 = vld [vmem:[#allocation2 + $0xa48] sm:$0xff]  ;;  %v158_v46 = vld [vmem:[#allocation2 + $0x240] sm:$0xff] }
 0x109   :  { %1543 = vmatpush1.msra.mxu0 %v800_v47  ;;  %1489 = vmatprep.subr.mxu1 %v729_v48  ;;  %v414_v47 = vld [vmem:[#allocation2 + $0xa40] sm:$0xff]  ;;  %v151_v48 = vld [vmem:[#allocation2 + $0x208] sm:$0xff] }
 0x10a   :  { %3008 = vmatprep.subr.msk.mxu0 %vm990_vm0, %v985_v49  ;;  %1490 = vmatpush2.msra.mxu1 %v728_v50  ;;  %v407_v49 = vld [vmem:[#allocation2 + $0xa08] sm:$0xff]  ;;  %v150_v50 = vld [vmem:[#allocation2 + $0x200] sm:$0xff] }
 0x10b   :  { %3009 = vmatpush2.msk.msra.mxu0 %vm990_vm0, %v984_v51  ;;  %1491 = vmatprep.subr.mxu1 %v721_v52  ;;  %v406_v51 = vld [vmem:[#allocation2 + $0xa00] sm:$0xff]  ;;  %v143_v52 = vld [vmem:[#allocation2 + $0x1c8] sm:$0xff] }
 0x10c   :  { %1562 = vmatprep.subr.mxu0 %v977_v53  ;;  %1492 = vmatpush2.msra.mxu1 %v720_v54  ;;  %v399_v53 = vld [vmem:[#allocation2 + $0x9c8] sm:$0xff]  ;;  %v142_v54 = vld [vmem:[#allocation2 + $0x1c0] sm:$0xff] }
 0x10d   :  { %1563 = vmatpush2.msra.mxu0 %v976_v55  ;;  %1493 = vmatprep.subr.mxu1 %v713_v56  ;;  %v398_v55 = vld [vmem:[#allocation2 + $0x9c0] sm:$0xff]  ;;  %v135_v56 = vld [vmem:[#allocation2 + $0x188] sm:$0xff] }
 0x10e   :  { %1564 = vmatprep.subr.mxu0 %v969_v57  ;;  %1494 = vmatpush2.msra.mxu1 %v712_v58  ;;  %v391_v57 = vld [vmem:[#allocation2 + $0x988] sm:$0xff]  ;;  %v134_v58 = vld [vmem:[#allocation2 + $0x180] sm:$0xff] }
 0x10f   :  { %1565 = vmatpush2.msra.mxu0 %v968_v59  ;;  %1495 = vmatprep.subr.mxu1 %v705_v1  ;;  %v390_v59 = vld [vmem:[#allocation2 + $0x980] sm:$0xff]  ;;  %v127_v1 = vld [vmem:[#allocation2 + $0x148] sm:$0xff] }
 0x110   :  { %1566 = vmatprep.subr.mxu0 %v961_v60  ;;  %1496 = vmatpush2.msra.mxu1 %v704_v3  ;;  %v383_v60 = vld [vmem:[#allocation2 + $0x948] sm:$0xff]  ;;  %v126_v3 = vld [vmem:[#allocation2 + $0x140] sm:$0xff] }
 0x111   :  { %1567 = vmatpush2.msra.mxu0 %v960_v61  ;;  %1497 = vmatprep.subr.mxu1 %v697_v62  ;;  %v382_v61 = vld [vmem:[#allocation2 + $0x940] sm:$0xff]  ;;  %v119_v62 = vld [vmem:[#allocation2 + $0x108] sm:$0xff] }
 0x112   :  { %1568 = vmatprep.subr.mxu0 %v953_v63  ;;  %1498 = vmatpush2.msra.mxu1 %v696_v0  ;;  %v375_v63 = vld [vmem:[#allocation2 + $0x908] sm:$0xff]  ;;  %v118_v0 = vld [vmem:[#allocation2 + $0x100] sm:$0xff] }
 0x113   :  { %1569 = vmatpush2.msra.mxu0 %v952_v2  ;;  %1499 = vmatprep.subr.mxu1 %v689_v4  ;;  %v374_v2 = vld [vmem:[#allocation2 + $0x900] sm:$0xff]  ;;  %v111_v4 = vld [vmem:[#allocation2 + $0xc8] sm:$0xff] }
 0x114   :  { %1570 = vmatprep.subr.mxu0 %v945_v5  ;;  %1500 = vmatpush2.msra.mxu1 %v688_v6  ;;  %v367_v5 = vld [vmem:[#allocation2 + $0x8c8] sm:$0xff]  ;;  %v110_v6 = vld [vmem:[#allocation2 + $0xc0] sm:$0xff] }
 0x115   :  { %1571 = vmatpush2.msra.mxu0 %v944_v7  ;;  %1501 = vmatprep.subr.mxu1 %v681_v8  ;;  %v366_v7 = vld [vmem:[#allocation2 + $0x8c0] sm:$0xff]  ;;  %v103_v8 = vld [vmem:[#allocation2 + $0x88] sm:$0xff] }
 0x116   :  { %1572 = vmatprep.subr.mxu0 %v937_v9  ;;  %1502 = vmatpush2.msra.mxu1 %v680_v10  ;;  %v359_v9 = vld [vmem:[#allocation2 + $0x888] sm:$0xff]  ;;  %v102_v10 = vld [vmem:[#allocation2 + $0x80] sm:$0xff] }
 0x117   :  { %1573 = vmatpush2.msra.mxu0 %v936_v11  ;;  %1503 = vmatprep.subr.mxu1 %v673_v12  ;;  %v358_v11 = vld [vmem:[#allocation2 + $0x880] sm:$0xff]  ;;  %v95_v12 = vld [vmem:[#allocation2 + $0x48] sm:$0xff] }
 0x118   :  { %1574 = vmatprep.subr.mxu0 %v929_v13  ;;  %1504 = vmatpush2.msra.mxu1 %v672_v14  ;;  %v351_v13 = vld [vmem:[#allocation2 + $0x848] sm:$0xff]  ;;  %v94_v14 = vld [vmem:[#allocation2 + $0x40] sm:$0xff] }
 0x119   :  { %1505 = vmatprep.mubr.f32.mxu1 %v3112_v16  ;;  %1575 = vmatpush2.msra.mxu0 %v928_v15  ;;  %v350_v15 = vld [vmem:[#allocation2 + $0x840] sm:$0xff]  ;;  %v87_v16 = vld [vmem:[#allocation2 + $0x8] sm:$0xff] }
 0x11a   :  { %3010 = vmatprep.mubr.msk.f32.mxu0 %vm986_vm1, %v3113_v19  ;;  %1506 = vmatmul.mubr.f32.vlgmr.msra.gmra.mxu1 %v3114_v22  ;;  %v342_v19 = vld [vmem:[#allocation2 + $0x800] sm:$0xff] }
 0x11b   :  { %1577 = vmatmul.mubr.f32.vlgmr.msra.gmra.mxu0 %v3115_v23  ;;  %1610 = vmatprep.subr.mxu0 %v207_v17  ;;  %v343_v17 = vld [vmem:[#allocation2 + $0x808] sm:$0xff]  ;;  %v334_v22 = vld [vmem:[#allocation2 + $0x7c0] sm:$0xff] }
 0x11c   :  { %1681 = vmatprep.subr.mxu1 %v463_v18  ;;  %1611 = vmatpush1.msra.mxu0 %v206_v20  ;;  %v86_v18 = vld [vmem:[#allocation2] sm:$0xff]  ;;  %v335_v20 = vld [vmem:[#allocation2 + $0x7c8] sm:$0xff] }
 0x11d   :  { %1682 = vmatpush1.msra.mxu1 %v462_v21  ;;  %1612 = vmatprep.subr.mxu0 %v199_v24  ;;  %v527_v21 = vld [vmem:[#allocation2 + $0xdc8] sm:$0x1]  ;;  %v526_v23 = vld [vmem:[#allocation2 + $0xdc0] sm:$0x1] }
 0x11e   :  { %1683 = vmatprep.subr.mxu1 %v455_v25  ;;  %1613 = vmatpush1.msra.mxu0 %v198_v26  ;;  %v327_v24 = vld [vmem:[#allocation2 + $0x788] sm:$0xff]  ;;  %v326_v26 = vld [vmem:[#allocation2 + $0x780] sm:$0xff] }
 0x11f   :  { %1684 = vmatpush1.msra.mxu1 %v454_v27  ;;  %1614 = vmatprep.subr.mxu0 %v191_v28  ;;  %v519_v25 = vld [vmem:[#allocation2 + $0xd88] sm:$0xff]  ;;  %v518_v27 = vld [vmem:[#allocation2 + $0xd80] sm:$0xff] }
 0x120   :  { %1685 = vmatprep.subr.mxu1 %v447_v32  ;;  %1615 = vmatpush1.msra.mxu0 %v190_v29  ;;  %v319_v28 = vld [vmem:[#allocation2 + $0x748] sm:$0xff]  ;;  %v318_v29 = vld [vmem:[#allocation2 + $0x740] sm:$0xff] }
 0x121   :  { %1686 = vmatpush1.msra.mxu1 %v446_v30  ;;  %1616 = vmatprep.subr.mxu0 %v183_v34  ;;  %v511_v32 = vld [vmem:[#allocation2 + $0xd48] sm:$0xff]  ;;  %v510_v30 = vld [vmem:[#allocation2 + $0xd40] sm:$0xff] }
 0x122   :  { %1687 = vmatprep.subr.mxu1 %v439_v31  ;;  %1617 = vmatpush1.msra.mxu0 %v182_v33  ;;  %v311_v34 = vld [vmem:[#allocation2 + $0x708] sm:$0xff]  ;;  %v310_v33 = vld [vmem:[#allocation2 + $0x700] sm:$0xff] }
 0x123   :  { %1688 = vmatpush1.msra.mxu1 %v438_v35  ;;  %1618 = vmatprep.subr.mxu0 %v175_v36  ;;  %v503_v31 = vld [vmem:[#allocation2 + $0xd08] sm:$0xff]  ;;  %v502_v35 = vld [vmem:[#allocation2 + $0xd00] sm:$0xff] }
 0x124   :  { %1689 = vmatprep.subr.mxu1 %v431_v37  ;;  %1619 = vmatpush1.msra.mxu0 %v174_v38  ;;  %v303_v36 = vld [vmem:[#allocation2 + $0x6c8] sm:$0xff]  ;;  %v302_v38 = vld [vmem:[#allocation2 + $0x6c0] sm:$0xff] }
 0x125   :  { %1690 = vmatpush1.msra.mxu1 %v430_v39  ;;  %1620 = vmatprep.subr.mxu0 %v167_v40  ;;  %v495_v37 = vld [vmem:[#allocation2 + $0xcc8] sm:$0xff]  ;;  %v494_v39 = vld [vmem:[#allocation2 + $0xcc0] sm:$0xff] }
 0x126   :  { %1691 = vmatprep.subr.mxu1 %v423_v41  ;;  %1621 = vmatpush1.msra.mxu0 %v166_v42  ;;  %v295_v40 = vld [vmem:[#allocation2 + $0x688] sm:$0xff]  ;;  %v294_v42 = vld [vmem:[#allocation2 + $0x680] sm:$0xff] }
 0x127   :  { %1692 = vmatpush1.msra.mxu1 %v422_v43  ;;  %1622 = vmatprep.subr.mxu0 %v159_v44  ;;  %v487_v41 = vld [vmem:[#allocation2 + $0xc88] sm:$0xff]  ;;  %v486_v43 = vld [vmem:[#allocation2 + $0xc80] sm:$0xff] }
 0x128   :  { %1693 = vmatprep.subr.mxu1 %v415_v45  ;;  %1623 = vmatpush1.msra.mxu0 %v158_v46  ;;  %v287_v44 = vld [vmem:[#allocation2 + $0x648] sm:$0xff]  ;;  %v286_v46 = vld [vmem:[#allocation2 + $0x640] sm:$0xff] }
 0x129   :  { %1694 = vmatpush1.msra.mxu1 %v414_v47  ;;  %1624 = vmatprep.subr.mxu0 %v151_v48  ;;  %v479_v45 = vld [vmem:[#allocation2 + $0xc48] sm:$0xff]  ;;  %v478_v47 = vld [vmem:[#allocation2 + $0xc40] sm:$0xff] }
 0x12a   :  { %1695 = vmatprep.subr.mxu1 %v407_v49  ;;  %1625 = vmatpush1.msra.mxu0 %v150_v50  ;;  %v279_v48 = vld [vmem:[#allocation2 + $0x608] sm:$0xff]  ;;  %v278_v50 = vld [vmem:[#allocation2 + $0x600] sm:$0xff] }
 0x12b   :  { %1696 = vmatpush1.msra.mxu1 %v406_v51  ;;  %1626 = vmatprep.subr.mxu0 %v143_v52  ;;  %v471_v49 = vld [vmem:[#allocation2 + $0xc08] sm:$0xff]  ;;  %v470_v51 = vld [vmem:[#allocation2 + $0xc00] sm:$0xff]  ;;  %v3350_v52 = vld [vmem:[%s3423_s0 + $0x18] sm:$0xff] }
 0x12c   :  { %1697 = vmatprep.subr.mxu1 %v399_v53  ;;  %1627 = vmatpush1.msra.mxu0 %v142_v54  ;;  %v271_v53 = vld [vmem:[#allocation2 + $0x5c8] sm:$0xff]  ;;  %v3355_v54 = vld [vmem:[%s3423_s0 + $0x10] sm:$0xff] }
 0x12d   :  { %1698 = vmatpush1.msra.mxu1 %v398_v55  ;;  %1628 = vmatprep.subr.mxu0 %v135_v56  ;;  %v209_v55 = vld [vmem:[#allocation2 + $0x3d8] sm:$0xff]  ;;  %v270_v56 = vld [vmem:[#allocation2 + $0x5c0] sm:$0xff] }
 0x12e   :  { %1699 = vmatprep.subr.mxu1 %v391_v57  ;;  %1629 = vmatpush1.msra.mxu0 %v134_v58  ;;  %v208_v57 = vld [vmem:[#allocation2 + $0x3d0] sm:$0xff]  ;;  %v263_v58 = vld [vmem:[#allocation2 + $0x588] sm:$0xff] }
 0x12f   :  { %1700 = vmatpush1.msra.mxu1 %v390_v59  ;;  %1630 = vmatprep.subr.mxu0 %v127_v1  ;;  %v201_v59 = vld [vmem:[#allocation2 + $0x398] sm:$0xff]  ;;  %v262_v1 = vld [vmem:[#allocation2 + $0x580] sm:$0xff] }
 0x130   :  { %1701 = vmatprep.subr.mxu1 %v383_v60  ;;  %1631 = vmatpush1.msra.mxu0 %v126_v3  ;;  %v200_v60 = vld [vmem:[#allocation2 + $0x390] sm:$0xff]  ;;  %v255_v3 = vld [vmem:[#allocation2 + $0x548] sm:$0xff] }
 0x131   :  { %1702 = vmatpush1.msra.mxu1 %v382_v61  ;;  %1632 = vmatprep.subr.mxu0 %v119_v62  ;;  %v193_v61 = vld [vmem:[#allocation2 + $0x358] sm:$0xff]  ;;  %v254_v62 = vld [vmem:[#allocation2 + $0x540] sm:$0xff] }
 0x132   :  { %1703 = vmatprep.subr.mxu1 %v375_v63  ;;  %1633 = vmatpush1.msra.mxu0 %v118_v0  ;;  %v192_v63 = vld [vmem:[#allocation2 + $0x350] sm:$0xff]  ;;  %v247_v0 = vld [vmem:[#allocation2 + $0x508] sm:$0xff] }
 0x133   :  { %1704 = vmatpush1.msra.mxu1 %v374_v2  ;;  %1634 = vmatprep.subr.mxu0 %v111_v4  ;;  %v185_v2 = vld [vmem:[#allocation2 + $0x318] sm:$0xff]  ;;  %v246_v4 = vld [vmem:[#allocation2 + $0x500] sm:$0xff] }
 0x134   :  { %1705 = vmatprep.subr.mxu1 %v367_v5  ;;  %1635 = vmatpush1.msra.mxu0 %v110_v6  ;;  %v184_v5 = vld [vmem:[#allocation2 + $0x310] sm:$0xff]  ;;  %v239_v6 = vld [vmem:[#allocation2 + $0x4c8] sm:$0xff] }
 0x135   :  { %1706 = vmatpush1.msra.mxu1 %v366_v7  ;;  %1636 = vmatprep.subr.mxu0 %v103_v8  ;;  %v177_v7 = vld [vmem:[#allocation2 + $0x2d8] sm:$0xff]  ;;  %v238_v8 = vld [vmem:[#allocation2 + $0x4c0] sm:$0xff] }
 0x136   :  { %1707 = vmatprep.subr.mxu1 %v359_v9  ;;  %1637 = vmatpush1.msra.mxu0 %v102_v10  ;;  %v176_v9 = vld [vmem:[#allocation2 + $0x2d0] sm:$0xff]  ;;  %v231_v10 = vld [vmem:[#allocation2 + $0x488] sm:$0xff] }
 0x137   :  { %1708 = vmatpush1.msra.mxu1 %v358_v11  ;;  %1638 = vmatprep.subr.mxu0 %v95_v12  ;;  %v169_v11 = vld [vmem:[#allocation2 + $0x298] sm:$0xff]  ;;  %v230_v12 = vld [vmem:[#allocation2 + $0x480] sm:$0xff] }
 0x138   :  { %1709 = vmatprep.subr.mxu1 %v351_v13  ;;  %1639 = vmatpush1.msra.mxu0 %v94_v14  ;;  %v168_v13 = vld [vmem:[#allocation2 + $0x290] sm:$0xff]  ;;  %v223_v14 = vld [vmem:[#allocation2 + $0x448] sm:$0xff] }
 0x139   :  { %1710 = vmatpush1.msra.mxu1 %v350_v15  ;;  %1640 = vmatprep.subr.mxu0 %v87_v16  ;;  %v161_v15 = vld [vmem:[#allocation2 + $0x258] sm:$0xff]  ;;  %v222_v16 = vld [vmem:[#allocation2 + $0x440] sm:$0xff] }
 0x13a   :  { %1711 = vmatprep.subr.mxu1 %v343_v17  ;;  %1641 = vmatpush1.msra.mxu0 %v86_v18  ;;  %v160_v17 = vld [vmem:[#allocation2 + $0x250] sm:$0xff]  ;;  %v215_v18 = vld [vmem:[#allocation2 + $0x408] sm:$0xff] }
 0x13b   :  { %1712 = vmatpush1.msra.mxu1 %v342_v19  ;;  %1642 = vmatprep.subr.mxu0 %v335_v20  ;;  %v153_v19 = vld [vmem:[#allocation2 + $0x218] sm:$0xff]  ;;  %v214_v20 = vld [vmem:[#allocation2 + $0x400] sm:$0xff] }
 0x13c   :  { %3011 = vmatprep.subr.msk.mxu1 %vm990_vm0, %v527_v21  ;;  %1643 = vmatpush2.msra.mxu0 %v334_v22  ;;  %v3363_v21 = vld [vmem:[%s3423_s0 + $0x8] sm:$0xff]  ;;  %v152_v22 = vld [vmem:[#allocation2 + $0x210] sm:$0xff] }
 0x13d   :  { %3012 = vmatpush2.msk.msra.mxu1 %vm990_vm0, %v526_v23  ;;  %1644 = vmatprep.subr.mxu0 %v327_v24  ;;  %v3368_v23 = vld [vmem:[%s3423_s0] sm:$0xff]  ;;  %v145_v24 = vld [vmem:[#allocation2 + $0x1d8] sm:$0xff] }
 0x13e   :  { %1731 = vmatprep.subr.mxu1 %v519_v25  ;;  %1645 = vmatpush2.msra.mxu0 %v326_v26  ;;  %v465_v25 = vld [vmem:[#allocation2 + $0xbd8] sm:$0xff]  ;;  %v144_v26 = vld [vmem:[#allocation2 + $0x1d0] sm:$0xff] }
 0x13f   :  { %1732 = vmatpush2.msra.mxu1 %v518_v27  ;;  %1646 = vmatprep.subr.mxu0 %v319_v28  ;;  %v464_v27 = vld [vmem:[#allocation2 + $0xbd0] sm:$0xff]  ;;  %v137_v28 = vld [vmem:[#allocation2 + $0x198] sm:$0xff] }
 0x140   :  { %1733 = vmatprep.subr.mxu1 %v511_v32  ;;  %1647 = vmatpush2.msra.mxu0 %v318_v29  ;;  %v457_v32 = vld [vmem:[#allocation2 + $0xb98] sm:$0xff]  ;;  %v136_v29 = vld [vmem:[#allocation2 + $0x190] sm:$0xff] }
 0x141   :  { %1734 = vmatpush2.msra.mxu1 %v510_v30  ;;  %1648 = vmatprep.subr.mxu0 %v311_v34  ;;  %v456_v30 = vld [vmem:[#allocation2 + $0xb90] sm:$0xff]  ;;  %v129_v34 = vld [vmem:[#allocation2 + $0x158] sm:$0xff] }
 0x142   :  { %1735 = vmatprep.subr.mxu1 %v503_v31  ;;  %1649 = vmatpush2.msra.mxu0 %v310_v33  ;;  %v449_v31 = vld [vmem:[#allocation2 + $0xb58] sm:$0xff]  ;;  %v128_v33 = vld [vmem:[#allocation2 + $0x150] sm:$0xff] }
 0x143   :  { %1736 = vmatpush2.msra.mxu1 %v502_v35  ;;  %1650 = vmatprep.subr.mxu0 %v303_v36  ;;  %v448_v35 = vld [vmem:[#allocation2 + $0xb50] sm:$0xff]  ;;  %v121_v36 = vld [vmem:[#allocation2 + $0x118] sm:$0xff] }
 0x144   :  { %1737 = vmatprep.subr.mxu1 %v495_v37  ;;  %1651 = vmatpush2.msra.mxu0 %v302_v38  ;;  %v441_v37 = vld [vmem:[#allocation2 + $0xb18] sm:$0xff]  ;;  %v120_v38 = vld [vmem:[#allocation2 + $0x110] sm:$0xff] }
 0x145   :  { %1738 = vmatpush2.msra.mxu1 %v494_v39  ;;  %1652 = vmatprep.subr.mxu0 %v295_v40  ;;  %v440_v39 = vld [vmem:[#allocation2 + $0xb10] sm:$0xff]  ;;  %v113_v40 = vld [vmem:[#allocation2 + $0xd8] sm:$0xff] }
 0x146   :  { %1739 = vmatprep.subr.mxu1 %v487_v41  ;;  %1653 = vmatpush2.msra.mxu0 %v294_v42  ;;  %v433_v41 = vld [vmem:[#allocation2 + $0xad8] sm:$0xff]  ;;  %v112_v42 = vld [vmem:[#allocation2 + $0xd0] sm:$0xff] }
 0x147   :  { %1740 = vmatpush2.msra.mxu1 %v486_v43  ;;  %1654 = vmatprep.subr.mxu0 %v287_v44  ;;  %v432_v43 = vld [vmem:[#allocation2 + $0xad0] sm:$0xff]  ;;  %v105_v44 = vld [vmem:[#allocation2 + $0x98] sm:$0xff] }
 0x148   :  { %1741 = vmatprep.subr.mxu1 %v479_v45  ;;  %1655 = vmatpush2.msra.mxu0 %v286_v46  ;;  %v425_v45 = vld [vmem:[#allocation2 + $0xa98] sm:$0xff]  ;;  %v104_v46 = vld [vmem:[#allocation2 + $0x90] sm:$0xff] }
 0x149   :  { %1742 = vmatpush2.msra.mxu1 %v478_v47  ;;  %1656 = vmatprep.subr.mxu0 %v279_v48  ;;  %v424_v47 = vld [vmem:[#allocation2 + $0xa90] sm:$0xff]  ;;  %v97_v48 = vld [vmem:[#allocation2 + $0x58] sm:$0xff] }
 0x14a   :  { %1743 = vmatprep.subr.mxu1 %v471_v49  ;;  %1657 = vmatpush2.msra.mxu0 %v278_v50  ;;  %v417_v49 = vld [vmem:[#allocation2 + $0xa58] sm:$0xff]  ;;  %v96_v50 = vld [vmem:[#allocation2 + $0x50] sm:$0xff] }
 0x14b   :  { %1744 = vmatpush2.msra.mxu1 %v470_v51  ;;  %3013 = vmatprep.mubr.msk.f32.mxu1 %vm986_vm1, %v3350_v52  ;;  %v416_v51 = vld [vmem:[#allocation2 + $0xa50] sm:$0xff] }
 0x14c   :  { %1658 = vmatprep.subr.mxu0 %v271_v53  ;;  %1746 = vmatmul.mubr.f32.vlgmr.msra.gmra.mxu1 %v3355_v54  ;;  %v89_v53 = vld [vmem:[#allocation2 + $0x18] sm:$0xff] }
 0x14d   :  { %1752 = vmatprep.subr.mxu1 %v209_v55  ;;  %1659 = vmatpush2.msra.mxu0 %v270_v56  ;;  %v409_v55 = vld [vmem:[#allocation2 + $0xa18] sm:$0xff]  ;;  %v88_v56 = vld [vmem:[#allocation2 + $0x10] sm:$0xff] }
 0x14e   :  { %1753 = vmatpush1.msra.mxu1 %v208_v57  ;;  %1660 = vmatprep.subr.mxu0 %v263_v58  ;;  %v408_v57 = vld [vmem:[#allocation2 + $0xa10] sm:$0xff]  ;;  %v337_v58 = vld [vmem:[#allocation2 + $0x7d8] sm:$0xff] }
 0x14f   :  { %1754 = vmatprep.subr.mxu1 %v201_v59  ;;  %1661 = vmatpush2.msra.mxu0 %v262_v1  ;;  %v401_v59 = vld [vmem:[#allocation2 + $0x9d8] sm:$0xff]  ;;  %v336_v1 = vld [vmem:[#allocation2 + $0x7d0] sm:$0xff] }
 0x150   :  { %1755 = vmatpush1.msra.mxu1 %v200_v60  ;;  %1662 = vmatprep.subr.mxu0 %v255_v3  ;;  %v400_v60 = vld [vmem:[#allocation2 + $0x9d0] sm:$0xff]  ;;  %v329_v3 = vld [vmem:[#allocation2 + $0x798] sm:$0xff] }
 0x151   :  { %1756 = vmatprep.subr.mxu1 %v193_v61  ;;  %1663 = vmatpush2.msra.mxu0 %v254_v62  ;;  %v393_v61 = vld [vmem:[#allocation2 + $0x998] sm:$0xff]  ;;  %v328_v62 = vld [vmem:[#allocation2 + $0x790] sm:$0xff] }
 0x152   :  { %1757 = vmatpush1.msra.mxu1 %v192_v63  ;;  %1664 = vmatprep.subr.mxu0 %v247_v0  ;;  %v392_v63 = vld [vmem:[#allocation2 + $0x990] sm:$0xff]  ;;  %v321_v0 = vld [vmem:[#allocation2 + $0x758] sm:$0xff] }
 0x153   :  { %1758 = vmatprep.subr.mxu1 %v185_v2  ;;  %1665 = vmatpush2.msra.mxu0 %v246_v4  ;;  %v385_v2 = vld [vmem:[#allocation2 + $0x958] sm:$0xff]  ;;  %v320_v4 = vld [vmem:[#allocation2 + $0x750] sm:$0xff] }
 0x154   :  { %1759 = vmatpush1.msra.mxu1 %v184_v5  ;;  %1666 = vmatprep.subr.mxu0 %v239_v6  ;;  %v384_v5 = vld [vmem:[#allocation2 + $0x950] sm:$0xff]  ;;  %v313_v6 = vld [vmem:[#allocation2 + $0x718] sm:$0xff] }
 0x155   :  { %1760 = vmatprep.subr.mxu1 %v177_v7  ;;  %1667 = vmatpush2.msra.mxu0 %v238_v8  ;;  %v377_v7 = vld [vmem:[#allocation2 + $0x918] sm:$0xff]  ;;  %v312_v8 = vld [vmem:[#allocation2 + $0x710] sm:$0xff] }
 0x156   :  { %1761 = vmatpush1.msra.mxu1 %v176_v9  ;;  %1668 = vmatprep.subr.mxu0 %v231_v10  ;;  %v376_v9 = vld [vmem:[#allocation2 + $0x910] sm:$0xff]  ;;  %v305_v10 = vld [vmem:[#allocation2 + $0x6d8] sm:$0xff] }
 0x157   :  { %1762 = vmatprep.subr.mxu1 %v169_v11  ;;  %1669 = vmatpush2.msra.mxu0 %v230_v12  ;;  %v369_v11 = vld [vmem:[#allocation2 + $0x8d8] sm:$0xff]  ;;  %v304_v12 = vld [vmem:[#allocation2 + $0x6d0] sm:$0xff] }
 0x158   :  { %1763 = vmatpush1.msra.mxu1 %v168_v13  ;;  %1670 = vmatprep.subr.mxu0 %v223_v14  ;;  %v368_v13 = vld [vmem:[#allocation2 + $0x8d0] sm:$0xff]  ;;  %v297_v14 = vld [vmem:[#allocation2 + $0x698] sm:$0xff] }
 0x159   :  { %1764 = vmatprep.subr.mxu1 %v161_v15  ;;  %1671 = vmatpush2.msra.mxu0 %v222_v16  ;;  %v361_v15 = vld [vmem:[#allocation2 + $0x898] sm:$0xff]  ;;  %v296_v16 = vld [vmem:[#allocation2 + $0x690] sm:$0xff] }
 0x15a   :  { %1765 = vmatpush1.msra.mxu1 %v160_v17  ;;  %1672 = vmatprep.subr.mxu0 %v215_v18  ;;  %v360_v17 = vld [vmem:[#allocation2 + $0x890] sm:$0xff]  ;;  %v289_v18 = vld [vmem:[#allocation2 + $0x658] sm:$0xff] }
 0x15b   :  { %1766 = vmatprep.subr.mxu1 %v153_v19  ;;  %1673 = vmatpush2.msra.mxu0 %v214_v20  ;;  %v353_v19 = vld [vmem:[#allocation2 + $0x858] sm:$0xff]  ;;  %v288_v20 = vld [vmem:[#allocation2 + $0x650] sm:$0xff] }
 0x15c   :  { %1674 = vmatprep.mubr.f32.mxu0 %v3363_v21  ;;  %1767 = vmatpush1.msra.mxu1 %v152_v22  ;;  %v352_v22 = vld [vmem:[#allocation2 + $0x850] sm:$0xff] }
 0x15d   :  { %1675 = vmatmul.mubr.f32.vlgmr.msra.gmra.mxu0 %v3368_v23  ;;  %1768 = vmatprep.subr.mxu1 %v145_v24  ;;  %v281_v24 = vld [vmem:[#allocation2 + $0x618] sm:$0xff] }
 0x15e   :  { %1823 = vmatprep.subr.mxu0 %v465_v25  ;;  %1769 = vmatpush1.msra.mxu1 %v144_v26  ;;  %v345_v25 = vld [vmem:[#allocation2 + $0x818] sm:$0xff]  ;;  %v280_v26 = vld [vmem:[#allocation2 + $0x610] sm:$0xff] }
 0x15f   :  { %1824 = vmatpush1.msra.mxu0 %v464_v27  ;;  %1770 = vmatprep.subr.mxu1 %v137_v28  ;;  %v344_v27 = vld [vmem:[#allocation2 + $0x810] sm:$0xff]  ;;  %v273_v28 = vld [vmem:[#allocation2 + $0x5d8] sm:$0xff] }
 0x160   :  { %1825 = vmatprep.subr.mxu0 %v457_v32  ;;  %1771 = vmatpush1.msra.mxu1 %v136_v29  ;;  %v529_v32 = vld [vmem:[#allocation2 + $0xdd8] sm:$0x1]  ;;  %v272_v29 = vld [vmem:[#allocation2 + $0x5d0] sm:$0xff] }
 0x161   :  { %1826 = vmatpush1.msra.mxu0 %v456_v30  ;;  %1772 = vmatprep.subr.mxu1 %v129_v34  ;;  %v528_v30 = vld [vmem:[#allocation2 + $0xdd0] sm:$0x1]  ;;  %v265_v34 = vld [vmem:[#allocation2 + $0x598] sm:$0xff] }
 0x162   :  { %1827 = vmatprep.subr.mxu0 %v449_v31  ;;  %1773 = vmatpush1.msra.mxu1 %v128_v33  ;;  %v521_v31 = vld [vmem:[#allocation2 + $0xd98] sm:$0xff]  ;;  %v264_v33 = vld [vmem:[#allocation2 + $0x590] sm:$0xff] }
 0x163   :  { %1828 = vmatpush1.msra.mxu0 %v448_v35  ;;  %1774 = vmatprep.subr.mxu1 %v121_v36  ;;  %v520_v35 = vld [vmem:[#allocation2 + $0xd90] sm:$0xff]  ;;  %v257_v36 = vld [vmem:[#allocation2 + $0x558] sm:$0xff] }
 0x164   :  { %1829 = vmatprep.subr.mxu0 %v441_v37  ;;  %1775 = vmatpush1.msra.mxu1 %v120_v38  ;;  %v513_v37 = vld [vmem:[#allocation2 + $0xd58] sm:$0xff]  ;;  %v256_v38 = vld [vmem:[#allocation2 + $0x550] sm:$0xff] }
 0x165   :  { %1830 = vmatpush1.msra.mxu0 %v440_v39  ;;  %1776 = vmatprep.subr.mxu1 %v113_v40  ;;  %v512_v39 = vld [vmem:[#allocation2 + $0xd50] sm:$0xff]  ;;  %v249_v40 = vld [vmem:[#allocation2 + $0x518] sm:$0xff] }
 0x166   :  { %1831 = vmatprep.subr.mxu0 %v433_v41  ;;  %1777 = vmatpush1.msra.mxu1 %v112_v42  ;;  %v505_v41 = vld [vmem:[#allocation2 + $0xd18] sm:$0xff]  ;;  %v248_v42 = vld [vmem:[#allocation2 + $0x510] sm:$0xff] }
 0x167   :  { %1832 = vmatpush1.msra.mxu0 %v432_v43  ;;  %1778 = vmatprep.subr.mxu1 %v105_v44  ;;  %v504_v43 = vld [vmem:[#allocation2 + $0xd10] sm:$0xff]  ;;  %v241_v44 = vld [vmem:[#allocation2 + $0x4d8] sm:$0xff] }
 0x168   :  { %1833 = vmatprep.subr.mxu0 %v425_v45  ;;  %1779 = vmatpush1.msra.mxu1 %v104_v46  ;;  %v497_v45 = vld [vmem:[#allocation2 + $0xcd8] sm:$0xff]  ;;  %v240_v46 = vld [vmem:[#allocation2 + $0x4d0] sm:$0xff] }
 0x169   :  { %1834 = vmatpush1.msra.mxu0 %v424_v47  ;;  %1780 = vmatprep.subr.mxu1 %v97_v48  ;;  %v496_v47 = vld [vmem:[#allocation2 + $0xcd0] sm:$0xff]  ;;  %v233_v48 = vld [vmem:[#allocation2 + $0x498] sm:$0xff] }
 0x16a   :  { %1835 = vmatprep.subr.mxu0 %v417_v49  ;;  %1781 = vmatpush1.msra.mxu1 %v96_v50  ;;  %v489_v49 = vld [vmem:[#allocation2 + $0xc98] sm:$0xff]  ;;  %v232_v50 = vld [vmem:[#allocation2 + $0x490] sm:$0xff] }
 0x16b   :  { %1836 = vmatpush1.msra.mxu0 %v416_v51  ;;  %1782 = vmatprep.subr.mxu1 %v89_v53  ;;  %v488_v51 = vld [vmem:[#allocation2 + $0xc90] sm:$0xff]  ;;  %v225_v53 = vld [vmem:[#allocation2 + $0x458] sm:$0xff] }
 0x16c   :  { %1837 = vmatprep.subr.mxu0 %v409_v55  ;;  %1783 = vmatpush1.msra.mxu1 %v88_v56  ;;  %v481_v55 = vld [vmem:[#allocation2 + $0xc58] sm:$0xff]  ;;  %v224_v56 = vld [vmem:[#allocation2 + $0x450] sm:$0xff] }
 0x16d   :  { %1838 = vmatpush1.msra.mxu0 %v408_v57  ;;  %1784 = vmatprep.subr.mxu1 %v337_v58  ;;  %v480_v57 = vld [vmem:[#allocation2 + $0xc50] sm:$0xff]  ;;  %v217_v58 = vld [vmem:[#allocation2 + $0x418] sm:$0xff] }
 0x16e   :  { %1839 = vmatprep.subr.mxu0 %v401_v59  ;;  %1785 = vmatpush2.msra.mxu1 %v336_v1  ;;  %v473_v59 = vld [vmem:[#allocation2 + $0xc18] sm:$0xff]  ;;  %v216_v1 = vld [vmem:[#allocation2 + $0x410] sm:$0xff] }
 0x16f   :  { %1840 = vmatpush1.msra.mxu0 %v400_v60  ;;  %1786 = vmatprep.subr.mxu1 %v329_v3  ;;  %v472_v60 = vld [vmem:[#allocation2 + $0xc10] sm:$0xff]  ;;  %v211_v3 = vld [vmem:[#allocation2 + $0x3e8] sm:$0xff] }
 0x170   :  { %1841 = vmatprep.subr.mxu0 %v393_v61  ;;  %1787 = vmatpush2.msra.mxu1 %v328_v62  ;;  %v467_v61 = vld [vmem:[#allocation2 + $0xbe8] sm:$0xff]  ;;  %v210_v62 = vld [vmem:[#allocation2 + $0x3e0] sm:$0xff] }
 0x171   :  { %1842 = vmatpush1.msra.mxu0 %v392_v63  ;;  %1788 = vmatprep.subr.mxu1 %v321_v0  ;;  %v466_v63 = vld [vmem:[#allocation2 + $0xbe0] sm:$0xff]  ;;  %v203_v0 = vld [vmem:[#allocation2 + $0x3a8] sm:$0xff] }
 0x172   :  { %1843 = vmatprep.subr.mxu0 %v385_v2  ;;  %1789 = vmatpush2.msra.mxu1 %v320_v4  ;;  %v459_v2 = vld [vmem:[#allocation2 + $0xba8] sm:$0xff]  ;;  %v202_v4 = vld [vmem:[#allocation2 + $0x3a0] sm:$0xff] }
 0x173   :  { %1844 = vmatpush1.msra.mxu0 %v384_v5  ;;  %1790 = vmatprep.subr.mxu1 %v313_v6  ;;  %v458_v5 = vld [vmem:[#allocation2 + $0xba0] sm:$0xff]  ;;  %v195_v6 = vld [vmem:[#allocation2 + $0x368] sm:$0xff] }
 0x174   :  { %1845 = vmatprep.subr.mxu0 %v377_v7  ;;  %1791 = vmatpush2.msra.mxu1 %v312_v8  ;;  %v451_v7 = vld [vmem:[#allocation2 + $0xb68] sm:$0xff]  ;;  %v194_v8 = vld [vmem:[#allocation2 + $0x360] sm:$0xff] }
 0x175   :  { %1846 = vmatpush1.msra.mxu0 %v376_v9  ;;  %1792 = vmatprep.subr.mxu1 %v305_v10  ;;  %v450_v9 = vld [vmem:[#allocation2 + $0xb60] sm:$0xff]  ;;  %v187_v10 = vld [vmem:[#allocation2 + $0x328] sm:$0xff] }
 0x176   :  { %1847 = vmatprep.subr.mxu0 %v369_v11  ;;  %1793 = vmatpush2.msra.mxu1 %v304_v12  ;;  %v443_v11 = vld [vmem:[#allocation2 + $0xb28] sm:$0xff]  ;;  %v186_v12 = vld [vmem:[#allocation2 + $0x320] sm:$0xff] }
 0x177   :  { %1848 = vmatpush1.msra.mxu0 %v368_v13  ;;  %1794 = vmatprep.subr.mxu1 %v297_v14  ;;  %v442_v13 = vld [vmem:[#allocation2 + $0xb20] sm:$0xff]  ;;  %v179_v14 = vld [vmem:[#allocation2 + $0x2e8] sm:$0xff] }
 0x178   :  { %1849 = vmatprep.subr.mxu0 %v361_v15  ;;  %1795 = vmatpush2.msra.mxu1 %v296_v16  ;;  %v435_v15 = vld [vmem:[#allocation2 + $0xae8] sm:$0xff]  ;;  %v178_v16 = vld [vmem:[#allocation2 + $0x2e0] sm:$0xff] }
 0x179   :  { %1850 = vmatpush1.msra.mxu0 %v360_v17  ;;  %1796 = vmatprep.subr.mxu1 %v289_v18  ;;  %v434_v17 = vld [vmem:[#allocation2 + $0xae0] sm:$0xff]  ;;  %v171_v18 = vld [vmem:[#allocation2 + $0x2a8] sm:$0xff] }
 0x17a   :  { %1851 = vmatprep.subr.mxu0 %v353_v19  ;;  %1797 = vmatpush2.msra.mxu1 %v288_v20  ;;  %v427_v19 = vld [vmem:[#allocation2 + $0xaa8] sm:$0xff]  ;;  %v170_v20 = vld [vmem:[#allocation2 + $0x2a0] sm:$0xff] }
 0x17b   :  { %1852 = vmatpush1.msra.mxu0 %v352_v22  ;;  %1798 = vmatprep.subr.mxu1 %v281_v24  ;;  %v426_v22 = vld [vmem:[#allocation2 + $0xaa0] sm:$0xff]  ;;  %v163_v24 = vld [vmem:[#allocation2 + $0x268] sm:$0xff] }
 0x17c   :  { %1853 = vmatprep.subr.mxu0 %v345_v25  ;;  %1799 = vmatpush2.msra.mxu1 %v280_v26  ;;  %v419_v25 = vld [vmem:[#allocation2 + $0xa68] sm:$0xff]  ;;  %v162_v26 = vld [vmem:[#allocation2 + $0x260] sm:$0xff] }
 0x17d   :  { %1854 = vmatpush1.msra.mxu0 %v344_v27  ;;  %1800 = vmatprep.subr.mxu1 %v273_v28  ;;  %v418_v27 = vld [vmem:[#allocation2 + $0xa60] sm:$0xff]  ;;  %v155_v28 = vld [vmem:[#allocation2 + $0x228] sm:$0xff] }
 0x17e   :  { %3014 = vmatprep.subr.msk.mxu0 %vm990_vm0, %v529_v32  ;;  %1801 = vmatpush2.msra.mxu1 %v272_v29  ;;  %v411_v32 = vld [vmem:[#allocation2 + $0xa28] sm:$0xff]  ;;  %v154_v29 = vld [vmem:[#allocation2 + $0x220] sm:$0xff] }
 0x17f   :  { %3015 = vmatpush2.msk.msra.mxu0 %vm990_vm0, %v528_v30  ;;  %1802 = vmatprep.subr.mxu1 %v265_v34  ;;  %v410_v30 = vld [vmem:[#allocation2 + $0xa20] sm:$0xff]  ;;  %v147_v34 = vld [vmem:[#allocation2 + $0x1e8] sm:$0xff] }
 0x180   :  { %1873 = vmatprep.subr.mxu0 %v521_v31  ;;  %1803 = vmatpush2.msra.mxu1 %v264_v33  ;;  %v403_v31 = vld [vmem:[#allocation2 + $0x9e8] sm:$0xff]  ;;  %v146_v33 = vld [vmem:[#allocation2 + $0x1e0] sm:$0xff] }
 0x181   :  { %1874 = vmatpush2.msra.mxu0 %v520_v35  ;;  %1804 = vmatprep.subr.mxu1 %v257_v36  ;;  %v402_v35 = vld [vmem:[#allocation2 + $0x9e0] sm:$0xff]  ;;  %v139_v36 = vld [vmem:[#allocation2 + $0x1a8] sm:$0xff] }
 0x182   :  { %1875 = vmatprep.subr.mxu0 %v513_v37  ;;  %1805 = vmatpush2.msra.mxu1 %v256_v38  ;;  %v395_v37 = vld [vmem:[#allocation2 + $0x9a8] sm:$0xff]  ;;  %v138_v38 = vld [vmem:[#allocation2 + $0x1a0] sm:$0xff] }
 0x183   :  { %1876 = vmatpush2.msra.mxu0 %v512_v39  ;;  %1806 = vmatprep.subr.mxu1 %v249_v40  ;;  %v394_v39 = vld [vmem:[#allocation2 + $0x9a0] sm:$0xff]  ;;  %v131_v40 = vld [vmem:[#allocation2 + $0x168] sm:$0xff] }
 0x184   :  { %1877 = vmatprep.subr.mxu0 %v505_v41  ;;  %1807 = vmatpush2.msra.mxu1 %v248_v42  ;;  %v387_v41 = vld [vmem:[#allocation2 + $0x968] sm:$0xff]  ;;  %v130_v42 = vld [vmem:[#allocation2 + $0x160] sm:$0xff] }
 0x185   :  { %1878 = vmatpush2.msra.mxu0 %v504_v43  ;;  %1808 = vmatprep.subr.mxu1 %v241_v44  ;;  %v386_v43 = vld [vmem:[#allocation2 + $0x960] sm:$0xff]  ;;  %v123_v44 = vld [vmem:[#allocation2 + $0x128] sm:$0xff] }
 0x186   :  { %1879 = vmatprep.subr.mxu0 %v497_v45  ;;  %1809 = vmatpush2.msra.mxu1 %v240_v46  ;;  %v379_v45 = vld [vmem:[#allocation2 + $0x928] sm:$0xff]  ;;  %v122_v46 = vld [vmem:[#allocation2 + $0x120] sm:$0xff] }
 0x187   :  { %1880 = vmatpush2.msra.mxu0 %v496_v47  ;;  %1810 = vmatprep.subr.mxu1 %v233_v48  ;;  %v378_v47 = vld [vmem:[#allocation2 + $0x920] sm:$0xff]  ;;  %v115_v48 = vld [vmem:[#allocation2 + $0xe8] sm:$0xff] }
 0x188   :  { %1881 = vmatprep.subr.mxu0 %v489_v49  ;;  %1811 = vmatpush2.msra.mxu1 %v232_v50  ;;  %v371_v49 = vld [vmem:[#allocation2 + $0x8e8] sm:$0xff]  ;;  %v114_v50 = vld [vmem:[#allocation2 + $0xe0] sm:$0xff] }
 0x189   :  { %1882 = vmatpush2.msra.mxu0 %v488_v51  ;;  %1812 = vmatprep.subr.mxu1 %v225_v53  ;;  %v370_v51 = vld [vmem:[#allocation2 + $0x8e0] sm:$0xff]  ;;  %v107_v53 = vld [vmem:[#allocation2 + $0xa8] sm:$0xff] }
 0x18a   :  { %1883 = vmatprep.subr.mxu0 %v481_v55  ;;  %1813 = vmatpush2.msra.mxu1 %v224_v56  ;;  %v363_v55 = vld [vmem:[#allocation2 + $0x8a8] sm:$0xff]  ;;  %v106_v56 = vld [vmem:[#allocation2 + $0xa0] sm:$0xff] }
 0x18b   :  { %1884 = vmatpush2.msra.mxu0 %v480_v57  ;;  %1814 = vmatprep.subr.mxu1 %v217_v58  ;;  %v362_v57 = vld [vmem:[#allocation2 + $0x8a0] sm:$0xff]  ;;  %v99_v58 = vld [vmem:[#allocation2 + $0x68] sm:$0xff] }
 0x18c   :  { %1885 = vmatprep.subr.mxu0 %v473_v59  ;;  %1815 = vmatpush2.msra.mxu1 %v216_v1  ;;  %v355_v59 = vld [vmem:[#allocation2 + $0x868] sm:$0xff]  ;;  %v98_v1 = vld [vmem:[#allocation2 + $0x60] sm:$0xff] }
 0x18d   :  { %1816 = vmatprep.mubr.f32.mxu1 %v3363_v21  ;;  %1886 = vmatpush2.msra.mxu0 %v472_v60  ;;  %v354_v60 = vld [vmem:[#allocation2 + $0x860] sm:$0xff] }
 0x18e   :  { %3016 = vmatprep.mubr.msk.f32.mxu0 %vm986_vm1, %v3350_v52  ;;  %1817 = vmatmul.mubr.f32.vlgmr.msra.gmra.mxu1 %v3368_v23 }
 0x18f   :  { %1888 = vmatmul.mubr.f32.vlgmr.msra.gmra.mxu0 %v3355_v54  ;;  %1894 = vmatprep.subr.mxu0 %v211_v3  ;;  %v91_v3 = vld [vmem:[#allocation2 + $0x28] sm:$0xff] }
 0x190   :  { %1965 = vmatprep.subr.mxu1 %v467_v61  ;;  %1895 = vmatpush1.msra.mxu0 %v210_v62  ;;  %v347_v61 = vld [vmem:[#allocation2 + $0x828] sm:$0xff]  ;;  %v90_v62 = vld [vmem:[#allocation2 + $0x20] sm:$0xff] }
 0x191   :  { %1966 = vmatpush1.msra.mxu1 %v466_v63  ;;  %1896 = vmatprep.subr.mxu0 %v203_v0  ;;  %v346_v63 = vld [vmem:[#allocation2 + $0x820] sm:$0xff]  ;;  %v339_v0 = vld [vmem:[#allocation2 + $0x7e8] sm:$0xff] }
 0x192   :  { %1967 = vmatprep.subr.mxu1 %v459_v2  ;;  %1897 = vmatpush1.msra.mxu0 %v202_v4  ;;  %v531_v2 = vld [vmem:[#allocation2 + $0xde8] sm:$0x1]  ;;  %v338_v4 = vld [vmem:[#allocation2 + $0x7e0] sm:$0xff] }
 0x193   :  { %1968 = vmatpush1.msra.mxu1 %v458_v5  ;;  %1898 = vmatprep.subr.mxu0 %v195_v6  ;;  %v530_v5 = vld [vmem:[#allocation2 + $0xde0] sm:$0x1]  ;;  %v331_v6 = vld [vmem:[#allocation2 + $0x7a8] sm:$0xff] }
 0x194   :  { %1969 = vmatprep.subr.mxu1 %v451_v7  ;;  %1899 = vmatpush1.msra.mxu0 %v194_v8  ;;  %v523_v7 = vld [vmem:[#allocation2 + $0xda8] sm:$0xff]  ;;  %v330_v8 = vld [vmem:[#allocation2 + $0x7a0] sm:$0xff] }
 0x195   :  { %1970 = vmatpush1.msra.mxu1 %v450_v9  ;;  %1900 = vmatprep.subr.mxu0 %v187_v10  ;;  %v522_v9 = vld [vmem:[#allocation2 + $0xda0] sm:$0xff]  ;;  %v323_v10 = vld [vmem:[#allocation2 + $0x768] sm:$0xff] }
 0x196   :  { %1971 = vmatprep.subr.mxu1 %v443_v11  ;;  %1901 = vmatpush1.msra.mxu0 %v186_v12  ;;  %v515_v11 = vld [vmem:[#allocation2 + $0xd68] sm:$0xff]  ;;  %v322_v12 = vld [vmem:[#allocation2 + $0x760] sm:$0xff] }
 0x197   :  { %1972 = vmatpush1.msra.mxu1 %v442_v13  ;;  %1902 = vmatprep.subr.mxu0 %v179_v14  ;;  %v514_v13 = vld [vmem:[#allocation2 + $0xd60] sm:$0xff]  ;;  %v315_v14 = vld [vmem:[#allocation2 + $0x728] sm:$0xff] }
 0x198   :  { %1973 = vmatprep.subr.mxu1 %v435_v15  ;;  %1903 = vmatpush1.msra.mxu0 %v178_v16  ;;  %v507_v15 = vld [vmem:[#allocation2 + $0xd28] sm:$0xff]  ;;  %v314_v16 = vld [vmem:[#allocation2 + $0x720] sm:$0xff] }
 0x199   :  { %1974 = vmatpush1.msra.mxu1 %v434_v17  ;;  %1904 = vmatprep.subr.mxu0 %v171_v18  ;;  %v506_v17 = vld [vmem:[#allocation2 + $0xd20] sm:$0xff]  ;;  %v307_v18 = vld [vmem:[#allocation2 + $0x6e8] sm:$0xff] }
 0x19a   :  { %1975 = vmatprep.subr.mxu1 %v427_v19  ;;  %1905 = vmatpush1.msra.mxu0 %v170_v20  ;;  %v499_v19 = vld [vmem:[#allocation2 + $0xce8] sm:$0xff]  ;;  %v306_v20 = vld [vmem:[#allocation2 + $0x6e0] sm:$0xff] }
 0x19b   :  { %1976 = vmatpush1.msra.mxu1 %v426_v22  ;;  %1906 = vmatprep.subr.mxu0 %v163_v24  ;;  %v498_v22 = vld [vmem:[#allocation2 + $0xce0] sm:$0xff]  ;;  %v299_v24 = vld [vmem:[#allocation2 + $0x6a8] sm:$0xff] }
 0x19c   :  { %1977 = vmatprep.subr.mxu1 %v419_v25  ;;  %1907 = vmatpush1.msra.mxu0 %v162_v26  ;;  %v491_v25 = vld [vmem:[#allocation2 + $0xca8] sm:$0xff]  ;;  %v298_v26 = vld [vmem:[#allocation2 + $0x6a0] sm:$0xff] }
 0x19d   :  { %1978 = vmatpush1.msra.mxu1 %v418_v27  ;;  %1908 = vmatprep.subr.mxu0 %v155_v28  ;;  %v490_v27 = vld [vmem:[#allocation2 + $0xca0] sm:$0xff]  ;;  %v291_v28 = vld [vmem:[#allocation2 + $0x668] sm:$0xff] }
 0x19e   :  { %1979 = vmatprep.subr.mxu1 %v411_v32  ;;  %1909 = vmatpush1.msra.mxu0 %v154_v29  ;;  %v483_v32 = vld [vmem:[#allocation2 + $0xc68] sm:$0xff]  ;;  %v290_v29 = vld [vmem:[#allocation2 + $0x660] sm:$0xff] }
 0x19f   :  { %1980 = vmatpush1.msra.mxu1 %v410_v30  ;;  %1910 = vmatprep.subr.mxu0 %v147_v34  ;;  %v482_v30 = vld [vmem:[#allocation2 + $0xc60] sm:$0xff]  ;;  %v283_v34 = vld [vmem:[#allocation2 + $0x628] sm:$0xff] }
 0x1a0   :  { %1981 = vmatprep.subr.mxu1 %v403_v31  ;;  %1911 = vmatpush1.msra.mxu0 %v146_v33  ;;  %v475_v31 = vld [vmem:[#allocation2 + $0xc28] sm:$0xff]  ;;  %v282_v33 = vld [vmem:[#allocation2 + $0x620] sm:$0xff] }
 0x1a1   :  { %1982 = vmatpush1.msra.mxu1 %v402_v35  ;;  %1912 = vmatprep.subr.mxu0 %v139_v36  ;;  %v474_v35 = vld [vmem:[#allocation2 + $0xc20] sm:$0xff]  ;;  %v275_v36 = vld [vmem:[#allocation2 + $0x5e8] sm:$0xff] }
 0x1a2   :  { %1983 = vmatprep.subr.mxu1 %v395_v37  ;;  %1913 = vmatpush1.msra.mxu0 %v138_v38  ;;  %v213_v37 = vld [vmem:[#allocation2 + $0x3f8] sm:$0xff]  ;;  %v274_v38 = vld [vmem:[#allocation2 + $0x5e0] sm:$0xff] }
 0x1a3   :  { %1984 = vmatpush1.msra.mxu1 %v394_v39  ;;  %1914 = vmatprep.subr.mxu0 %v131_v40  ;;  %v212_v39 = vld [vmem:[#allocation2 + $0x3f0] sm:$0xff]  ;;  %v267_v40 = vld [vmem:[#allocation2 + $0x5a8] sm:$0xff] }
 0x1a4   :  { %1985 = vmatprep.subr.mxu1 %v387_v41  ;;  %1915 = vmatpush1.msra.mxu0 %v130_v42  ;;  %v205_v41 = vld [vmem:[#allocation2 + $0x3b8] sm:$0xff]  ;;  %v266_v42 = vld [vmem:[#allocation2 + $0x5a0] sm:$0xff] }
 0x1a5   :  { %1986 = vmatpush1.msra.mxu1 %v386_v43  ;;  %1916 = vmatprep.subr.mxu0 %v123_v44  ;;  %v204_v43 = vld [vmem:[#allocation2 + $0x3b0] sm:$0xff]  ;;  %v259_v44 = vld [vmem:[#allocation2 + $0x568] sm:$0xff] }
 0x1a6   :  { %1987 = vmatprep.subr.mxu1 %v379_v45  ;;  %1917 = vmatpush1.msra.mxu0 %v122_v46  ;;  %v197_v45 = vld [vmem:[#allocation2 + $0x378] sm:$0xff]  ;;  %v258_v46 = vld [vmem:[#allocation2 + $0x560] sm:$0xff] }
 0x1a7   :  { %1988 = vmatpush1.msra.mxu1 %v378_v47  ;;  %1918 = vmatprep.subr.mxu0 %v115_v48  ;;  %v196_v47 = vld [vmem:[#allocation2 + $0x370] sm:$0xff]  ;;  %v251_v48 = vld [vmem:[#allocation2 + $0x528] sm:$0xff] }
 0x1a8   :  { %1989 = vmatprep.subr.mxu1 %v371_v49  ;;  %1919 = vmatpush1.msra.mxu0 %v114_v50  ;;  %v250_v49 = vld [vmem:[#allocation2 + $0x520] sm:$0xff]  ;;  %v188_v50 = vld [vmem:[#allocation2 + $0x330] sm:$0xff] }
 0x1a9   :  { %1990 = vmatpush1.msra.mxu1 %v370_v51  ;;  %1920 = vmatprep.subr.mxu0 %v107_v53  ;;  %v181_v51 = vld [vmem:[#allocation2 + $0x2f8] sm:$0xff]  ;;  %v242_v53 = vld [vmem:[#allocation2 + $0x4e0] sm:$0xff] }
 0x1aa   :  { %1991 = vmatprep.subr.mxu1 %v363_v55  ;;  %1921 = vmatpush1.msra.mxu0 %v106_v56  ;;  %v180_v55 = vld [vmem:[#allocation2 + $0x2f0] sm:$0xff]  ;;  %v235_v56 = vld [vmem:[#allocation2 + $0x4a8] sm:$0xff] }
 0x1ab   :  { %1992 = vmatpush1.msra.mxu1 %v362_v57  ;;  %1922 = vmatprep.subr.mxu0 %v99_v58  ;;  %v173_v57 = vld [vmem:[#allocation2 + $0x2b8] sm:$0xff]  ;;  %v234_v58 = vld [vmem:[#allocation2 + $0x4a0] sm:$0xff] }
 0x1ac   :  { %1993 = vmatprep.subr.mxu1 %v355_v59  ;;  %1923 = vmatpush1.msra.mxu0 %v98_v1  ;;  %v172_v59 = vld [vmem:[#allocation2 + $0x2b0] sm:$0xff]  ;;  %v227_v1 = vld [vmem:[#allocation2 + $0x468] sm:$0xff] }
 0x1ad   :  { %1994 = vmatpush1.msra.mxu1 %v354_v60  ;;  %1924 = vmatprep.subr.mxu0 %v91_v3  ;;  %v165_v60 = vld [vmem:[#allocation2 + $0x278] sm:$0xff]  ;;  %v226_v3 = vld [vmem:[#allocation2 + $0x460] sm:$0xff] }
 0x1ae   :  { %1995 = vmatprep.subr.mxu1 %v347_v61  ;;  %1925 = vmatpush1.msra.mxu0 %v90_v62  ;;  %v164_v61 = vld [vmem:[#allocation2 + $0x270] sm:$0xff]  ;;  %v219_v62 = vld [vmem:[#allocation2 + $0x428] sm:$0xff] }
 0x1af   :  { %1996 = vmatpush1.msra.mxu1 %v346_v63  ;;  %1926 = vmatprep.subr.mxu0 %v339_v0  ;;  %v157_v63 = vld [vmem:[#allocation2 + $0x238] sm:$0xff]  ;;  %v218_v0 = vld [vmem:[#allocation2 + $0x420] sm:$0xff] }
 0x1b0   :  { %3017 = vmatprep.subr.msk.mxu1 %vm990_vm0, %v531_v2  ;;  %1927 = vmatpush2.msra.mxu0 %v338_v4  ;;  %v156_v2 = vld [vmem:[#allocation2 + $0x230] sm:$0xff]  ;;  %v149_v4 = vld [vmem:[#allocation2 + $0x1f8] sm:$0xff] }
 0x1b1   :  { %3018 = vmatpush2.msk.msra.mxu1 %vm990_vm0, %v530_v5  ;;  %1928 = vmatprep.subr.mxu0 %v331_v6  ;;  %v469_v5 = vld [vmem:[#allocation2 + $0xbf8] sm:$0xff]  ;;  %v148_v6 = vld [vmem:[#allocation2 + $0x1f0] sm:$0xff] }
 0x1b2   :  { %2015 = vmatprep.subr.mxu1 %v523_v7  ;;  %1929 = vmatpush2.msra.mxu0 %v330_v8  ;;  %v468_v7 = vld [vmem:[#allocation2 + $0xbf0] sm:$0xff]  ;;  %v141_v8 = vld [vmem:[#allocation2 + $0x1b8] sm:$0xff] }
 0x1b3   :  { %2016 = vmatpush2.msra.mxu1 %v522_v9  ;;  %1930 = vmatprep.subr.mxu0 %v323_v10  ;;  %v461_v9 = vld [vmem:[#allocation2 + $0xbb8] sm:$0xff]  ;;  %v140_v10 = vld [vmem:[#allocation2 + $0x1b0] sm:$0xff] }
 0x1b4   :  { %2017 = vmatprep.subr.mxu1 %v515_v11  ;;  %1931 = vmatpush2.msra.mxu0 %v322_v12  ;;  %v460_v11 = vld [vmem:[#allocation2 + $0xbb0] sm:$0xff]  ;;  %v133_v12 = vld [vmem:[#allocation2 + $0x178] sm:$0xff] }
 0x1b5   :  { %2018 = vmatpush2.msra.mxu1 %v514_v13  ;;  %1932 = vmatprep.subr.mxu0 %v315_v14  ;;  %v453_v13 = vld [vmem:[#allocation2 + $0xb78] sm:$0xff]  ;;  %v132_v14 = vld [vmem:[#allocation2 + $0x170] sm:$0xff] }
 0x1b6   :  { %2019 = vmatprep.subr.mxu1 %v507_v15  ;;  %1933 = vmatpush2.msra.mxu0 %v314_v16  ;;  %v452_v15 = vld [vmem:[#allocation2 + $0xb70] sm:$0xff]  ;;  %v445_v16 = vld [vmem:[#allocation2 + $0xb38] sm:$0xff] }
 0x1b7   :  { %2020 = vmatpush2.msra.mxu1 %v506_v17  ;;  %1934 = vmatprep.subr.mxu0 %v307_v18  ;;  %v444_v17 = vld [vmem:[#allocation2 + $0xb30] sm:$0xff]  ;;  %v117_v18 = vld [vmem:[#allocation2 + $0xf8] sm:$0xff] }
 0x1b8   :  { %2021 = vmatprep.subr.mxu1 %v499_v19  ;;  %1935 = vmatpush2.msra.mxu0 %v306_v20  ;;  %v437_v19 = vld [vmem:[#allocation2 + $0xaf8] sm:$0xff]  ;;  %v116_v20 = vld [vmem:[#allocation2 + $0xf0] sm:$0xff] }
 0x1b9   :  { %2022 = vmatpush2.msra.mxu1 %v498_v22  ;;  %1936 = vmatprep.subr.mxu0 %v299_v24  ;;  %v436_v22 = vld [vmem:[#allocation2 + $0xaf0] sm:$0xff]  ;;  %v109_v24 = vld [vmem:[#allocation2 + $0xb8] sm:$0xff] }
 0x1ba   :  { %2023 = vmatprep.subr.mxu1 %v491_v25  ;;  %1937 = vmatpush2.msra.mxu0 %v298_v26  ;;  %v429_v25 = vld [vmem:[#allocation2 + $0xab8] sm:$0xff]  ;;  %v108_v26 = vld [vmem:[#allocation2 + $0xb0] sm:$0xff] }
 0x1bb   :  { %2024 = vmatpush2.msra.mxu1 %v490_v27  ;;  %1938 = vmatprep.subr.mxu0 %v291_v28  ;;  %v428_v27 = vld [vmem:[#allocation2 + $0xab0] sm:$0xff]  ;;  %v101_v28 = vld [vmem:[#allocation2 + $0x78] sm:$0xff] }
 0x1bc   :  { %2025 = vmatprep.subr.mxu1 %v483_v32  ;;  %1939 = vmatpush2.msra.mxu0 %v290_v29  ;;  %v421_v32 = vld [vmem:[#allocation2 + $0xa78] sm:$0xff]  ;;  %v100_v29 = vld [vmem:[#allocation2 + $0x70] sm:$0xff] }
 0x1bd   :  { %2026 = vmatpush2.msra.mxu1 %v482_v30  ;;  %1940 = vmatprep.subr.mxu0 %v283_v34  ;;  %v420_v30 = vld [vmem:[#allocation2 + $0xa70] sm:$0xff]  ;;  %v93_v34 = vld [vmem:[#allocation2 + $0x38] sm:$0xff] }
 0x1be   :  { %2027 = vmatprep.subr.mxu1 %v475_v31  ;;  %1941 = vmatpush2.msra.mxu0 %v282_v33  ;;  %v413_v31 = vld [vmem:[#allocation2 + $0xa38] sm:$0xff]  ;;  %v92_v33 = vld [vmem:[#allocation2 + $0x30] sm:$0xff] }
 0x1bf   :  { %2028 = vmatpush2.msra.mxu1 %v474_v35  ;;  %3019 = vmatprep.mubr.msk.f32.mxu1 %vm986_vm1, %v3350_v52  ;;  %v189_v52 = vld [vmem:[#allocation2 + $0x338] sm:$0xff]  ;;  %v412_v35 = vld [vmem:[#allocation2 + $0xa30] sm:$0xff] }
 0x1c0   :  { %1942 = vmatprep.subr.mxu0 %v275_v36  ;;  %2030 = vmatmul.mubr.f32.vlgmr.msra.gmra.mxu1 %v3355_v54  ;;  %v243_v54 = vld [vmem:[#allocation2 + $0x4e8] sm:$0xff]  ;;  %v341_v36 = vld [vmem:[#allocation2 + $0x7f8] sm:$0xff] }
 0x1c1   :  { %2036 = vmatprep.subr.mxu1 %v213_v37  ;;  %1943 = vmatpush2.msra.mxu0 %v274_v38  ;;  %v405_v37 = vld [vmem:[#allocation2 + $0x9f8] sm:$0xff]  ;;  %v340_v38 = vld [vmem:[#allocation2 + $0x7f0] sm:$0xff] }
 0x1c2   :  { %2037 = vmatpush1.msra.mxu1 %v212_v39  ;;  %1944 = vmatprep.subr.mxu0 %v267_v40  ;;  %v404_v39 = vld [vmem:[#allocation2 + $0x9f0] sm:$0xff]  ;;  %v333_v40 = vld [vmem:[#allocation2 + $0x7b8] sm:$0xff] }
 0x1c3   :  { %2038 = vmatprep.subr.mxu1 %v205_v41  ;;  %1945 = vmatpush2.msra.mxu0 %v266_v42  ;;  %v397_v41 = vld [vmem:[#allocation2 + $0x9b8] sm:$0xff]  ;;  %v332_v42 = vld [vmem:[#allocation2 + $0x7b0] sm:$0xff] }
 0x1c4   :  { %2039 = vmatpush1.msra.mxu1 %v204_v43  ;;  %1946 = vmatprep.subr.mxu0 %v259_v44  ;;  %v396_v43 = vld [vmem:[#allocation2 + $0x9b0] sm:$0xff]  ;;  %v325_v44 = vld [vmem:[#allocation2 + $0x778] sm:$0xff] }
 0x1c5   :  { %2040 = vmatprep.subr.mxu1 %v197_v45  ;;  %1947 = vmatpush2.msra.mxu0 %v258_v46  ;;  %v389_v45 = vld [vmem:[#allocation2 + $0x978] sm:$0xff]  ;;  %v324_v46 = vld [vmem:[#allocation2 + $0x770] sm:$0xff] }
 0x1c6   :  { %2041 = vmatpush1.msra.mxu1 %v196_v47  ;;  %1948 = vmatprep.subr.mxu0 %v251_v48  ;;  %v388_v47 = vld [vmem:[#allocation2 + $0x970] sm:$0xff]  ;;  %v317_v48 = vld [vmem:[#allocation2 + $0x738] sm:$0xff] }
 0x1c7   :  { %2042 = vmatprep.subr.mxu1 %v189_v52  ;;  %1949 = vmatpush2.msra.mxu0 %v250_v49  ;;  %v381_v52 = vld [vmem:[#allocation2 + $0x938] sm:$0xff]  ;;  %v316_v49 = vld [vmem:[#allocation2 + $0x730] sm:$0xff] }
 0x1c8   :  { %2043 = vmatpush1.msra.mxu1 %v188_v50  ;;  %1950 = vmatprep.subr.mxu0 %v243_v54  ;;  %v380_v50 = vld [vmem:[#allocation2 + $0x930] sm:$0xff]  ;;  %v309_v54 = vld [vmem:[#allocation2 + $0x6f8] sm:$0xff] }
 0x1c9   :  { %2044 = vmatprep.subr.mxu1 %v181_v51  ;;  %1951 = vmatpush2.msra.mxu0 %v242_v53  ;;  %v373_v51 = vld [vmem:[#allocation2 + $0x8f8] sm:$0xff]  ;;  %v308_v53 = vld [vmem:[#allocation2 + $0x6f0] sm:$0xff] }
 0x1ca   :  { %2045 = vmatpush1.msra.mxu1 %v180_v55  ;;  %1952 = vmatprep.subr.mxu0 %v235_v56  ;;  %v372_v55 = vld [vmem:[#allocation2 + $0x8f0] sm:$0xff]  ;;  %v301_v56 = vld [vmem:[#allocation2 + $0x6b8] sm:$0xff] }
 0x1cb   :  { %2046 = vmatprep.subr.mxu1 %v173_v57  ;;  %1953 = vmatpush2.msra.mxu0 %v234_v58  ;;  %v365_v57 = vld [vmem:[#allocation2 + $0x8b8] sm:$0xff]  ;;  %v300_v58 = vld [vmem:[#allocation2 + $0x6b0] sm:$0xff] }
 0x1cc   :  { %2047 = vmatpush1.msra.mxu1 %v172_v59  ;;  %1954 = vmatprep.subr.mxu0 %v227_v1  ;;  %v364_v59 = vld [vmem:[#allocation2 + $0x8b0] sm:$0xff]  ;;  %v293_v1 = vld [vmem:[#allocation2 + $0x678] sm:$0xff] }
 0x1cd   :  { %2048 = vmatprep.subr.mxu1 %v165_v60  ;;  %1955 = vmatpush2.msra.mxu0 %v226_v3  ;;  %v357_v60 = vld [vmem:[#allocation2 + $0x878] sm:$0xff]  ;;  %v292_v3 = vld [vmem:[#allocation2 + $0x670] sm:$0xff] }
 0x1ce   :  { %2049 = vmatpush1.msra.mxu1 %v164_v61  ;;  %1956 = vmatprep.subr.mxu0 %v219_v62  ;;  %v356_v61 = vld [vmem:[#allocation2 + $0x870] sm:$0xff]  ;;  %v285_v62 = vld [vmem:[#allocation2 + $0x638] sm:$0xff] }
 0x1cf   :  { %2050 = vmatprep.subr.mxu1 %v157_v63  ;;  %1957 = vmatpush2.msra.mxu0 %v218_v0  ;;  %v349_v63 = vld [vmem:[#allocation2 + $0x838] sm:$0xff]  ;;  %v284_v0 = vld [vmem:[#allocation2 + $0x630] sm:$0xff] }
 0x1d0   :  { %1958 = vmatprep.mubr.f32.mxu0 %v3363_v21  ;;  %2051 = vmatpush1.msra.mxu1 %v156_v2  ;;  %v125_v21 = vld [vmem:[#allocation2 + $0x138] sm:$0xff]  ;;  %v348_v2 = vld [vmem:[#allocation2 + $0x830] sm:$0xff] }
 0x1d1   :  { %1959 = vmatmul.mubr.f32.vlgmr.msra.gmra.mxu0 %v3368_v23  ;;  %2052 = vmatprep.subr.mxu1 %v149_v4  ;;  %v124_v23 = vld [vmem:[#allocation2 + $0x130] sm:$0xff]  ;;  %v277_v4 = vld [vmem:[#allocation2 + $0x5f8] sm:$0xff] }
 0x1d2   :  { %2107 = vmatprep.subr.mxu0 %v469_v5  ;;  %2053 = vmatpush1.msra.mxu1 %v148_v6  ;;  %v533_v5 = vld [vmem:[#allocation2 + $0xdf8] sm:$0x1]  ;;  %v276_v6 = vld [vmem:[#allocation2 + $0x5f0] sm:$0xff] }
 0x1d3   :  { %2108 = vmatpush1.msra.mxu0 %v468_v7  ;;  %2054 = vmatprep.subr.mxu1 %v141_v8  ;;  %v532_v7 = vld [vmem:[#allocation2 + $0xdf0] sm:$0x1]  ;;  %v269_v8 = vld [vmem:[#allocation2 + $0x5b8] sm:$0xff] }
 0x1d4   :  { %2109 = vmatprep.subr.mxu0 %v461_v9  ;;  %2055 = vmatpush1.msra.mxu1 %v140_v10  ;;  %v525_v9 = vld [vmem:[#allocation2 + $0xdb8] sm:$0xff]  ;;  %v268_v10 = vld [vmem:[#allocation2 + $0x5b0] sm:$0xff] }
 0x1d5   :  { %2110 = vmatpush1.msra.mxu0 %v460_v11  ;;  %2056 = vmatprep.subr.mxu1 %v133_v12  ;;  %v524_v11 = vld [vmem:[#allocation2 + $0xdb0] sm:$0xff]  ;;  %v261_v12 = vld [vmem:[#allocation2 + $0x578] sm:$0xff] }
 0x1d6   :  { %2111 = vmatprep.subr.mxu0 %v453_v13  ;;  %2057 = vmatpush1.msra.mxu1 %v132_v14  ;;  %v517_v13 = vld [vmem:[#allocation2 + $0xd78] sm:$0xff]  ;;  %v260_v14 = vld [vmem:[#allocation2 + $0x570] sm:$0xff] }
 0x1d7   :  { %2112 = vmatpush1.msra.mxu0 %v452_v15  ;;  %2058 = vmatprep.subr.mxu1 %v125_v21  ;;  %v516_v15 = vld [vmem:[#allocation2 + $0xd70] sm:$0xff]  ;;  %v253_v21 = vld [vmem:[#allocation2 + $0x538] sm:$0xff] }
 0x1d8   :  { %2113 = vmatprep.subr.mxu0 %v445_v16  ;;  %2059 = vmatpush1.msra.mxu1 %v124_v23  ;;  %v509_v16 = vld [vmem:[#allocation2 + $0xd38] sm:$0xff]  ;;  %v252_v23 = vld [vmem:[#allocation2 + $0x530] sm:$0xff] }
 0x1d9   :  { %2114 = vmatpush1.msra.mxu0 %v444_v17  ;;  %2060 = vmatprep.subr.mxu1 %v117_v18  ;;  %v508_v17 = vld [vmem:[#allocation2 + $0xd30] sm:$0xff]  ;;  %v245_v18 = vld [vmem:[#allocation2 + $0x4f8] sm:$0xff] }
 0x1da   :  { %2115 = vmatprep.subr.mxu0 %v437_v19  ;;  %2061 = vmatpush1.msra.mxu1 %v116_v20  ;;  %v501_v19 = vld [vmem:[#allocation2 + $0xcf8] sm:$0xff]  ;;  %v244_v20 = vld [vmem:[#allocation2 + $0x4f0] sm:$0xff] }
 0x1db   :  { %2116 = vmatpush1.msra.mxu0 %v436_v22  ;;  %2062 = vmatprep.subr.mxu1 %v109_v24  ;;  %v500_v22 = vld [vmem:[#allocation2 + $0xcf0] sm:$0xff]  ;;  %v237_v24 = vld [vmem:[#allocation2 + $0x4b8] sm:$0xff] }
 0x1dc   :  { %2117 = vmatprep.subr.mxu0 %v429_v25  ;;  %2063 = vmatpush1.msra.mxu1 %v108_v26  ;;  %v493_v25 = vld [vmem:[#allocation2 + $0xcb8] sm:$0xff]  ;;  %v236_v26 = vld [vmem:[#allocation2 + $0x4b0] sm:$0xff] }
 0x1dd   :  { %2118 = vmatpush1.msra.mxu0 %v428_v27  ;;  %2064 = vmatprep.subr.mxu1 %v101_v28  ;;  %v492_v27 = vld [vmem:[#allocation2 + $0xcb0] sm:$0xff]  ;;  %v229_v28 = vld [vmem:[#allocation2 + $0x478] sm:$0xff] }
 0x1de   :  { %2119 = vmatprep.subr.mxu0 %v421_v32  ;;  %2065 = vmatpush1.msra.mxu1 %v100_v29  ;;  %v485_v32 = vld [vmem:[#allocation2 + $0xc78] sm:$0xff]  ;;  %v228_v29 = vld [vmem:[#allocation2 + $0x470] sm:$0xff] }
 0x1df   :  { %2120 = vmatpush1.msra.mxu0 %v420_v30  ;;  %2066 = vmatprep.subr.mxu1 %v93_v34  ;;  %v484_v30 = vld [vmem:[#allocation2 + $0xc70] sm:$0xff]  ;;  %v221_v34 = vld [vmem:[#allocation2 + $0x438] sm:$0xff] }
 0x1e0   :  { %2121 = vmatprep.subr.mxu0 %v413_v31  ;;  %2067 = vmatpush1.msra.mxu1 %v92_v33  ;;  %v477_v31 = vld [vmem:[#allocation2 + $0xc38] sm:$0xff]  ;;  %v220_v33 = vld [vmem:[#allocation2 + $0x430] sm:$0xff] }
 0x1e1   :  { %2122 = vmatpush1.msra.mxu0 %v412_v35  ;;  %2068 = vmatprep.subr.mxu1 %v341_v36  ;;  %v476_v35 = vld [vmem:[#allocation2 + $0xc30] sm:$0xff]  ;;  %v3116_v36 = vld [vmem:[%s3423_s0 + $0x8] sm:$0xff] }
 0x1e2   :  { %2123 = vmatprep.subr.mxu0 %v405_v37  ;;  %2069 = vmatpush2.msra.mxu1 %v340_v38  ;;  %v2301_v37 = vld [vmem:[#allocation7 + $0x3c8] sm:$0xff]  ;;  %v2303_v38 = vld [vmem:[#allocation7 + $0x3d8] sm:$0xff] }
 0x1e3   :  { %2124 = vmatpush1.msra.mxu0 %v404_v39  ;;  %2070 = vmatprep.subr.mxu1 %v333_v40  ;;  %v3117_v39 = vld [vmem:[%s3423_s0 + $0x18] sm:$0xff]  ;;  %v2300_v40 = vld [vmem:[#allocation7 + $0x3c0] sm:$0xff] }
 0x1e4   :  { %2125 = vmatprep.subr.mxu0 %v397_v41  ;;  %2071 = vmatpush2.msra.mxu1 %v332_v42  ;;  %v2302_v41 = vld [vmem:[#allocation7 + $0x3d0] sm:$0xff]  ;;  %v3118_v42 = vld [vmem:[%s3423_s0] sm:$0xff] }
 0x1e5   :  { %2126 = vmatpush1.msra.mxu0 %v396_v43  ;;  %2072 = vmatprep.subr.mxu1 %v325_v44  ;;  %v3119_v43 = vld [vmem:[%s3423_s0 + $0x10] sm:$0xff]  ;;  %v2293_v44 = vld [vmem:[#allocation7 + $0x388] sm:$0xff] }
 0x1e6   :  { %2127 = vmatprep.subr.mxu0 %v389_v45  ;;  %2073 = vmatpush2.msra.mxu1 %v324_v46  ;;  %v2295_v45 = vld [vmem:[#allocation7 + $0x398] sm:$0xff]  ;;  %v2292_v46 = vld [vmem:[#allocation7 + $0x380] sm:$0xff] }
 0x1e7   :  { %2128 = vmatpush1.msra.mxu0 %v388_v47  ;;  %2074 = vmatprep.subr.mxu1 %v317_v48  ;;  %v2294_v47 = vld [vmem:[#allocation7 + $0x390] sm:$0xff]  ;;  %v2285_v48 = vld [vmem:[#allocation7 + $0x348] sm:$0xff] }
 0x1e8   :  { %2129 = vmatprep.subr.mxu0 %v381_v52  ;;  %2075 = vmatpush2.msra.mxu1 %v316_v49  ;;  %v2287_v52 = vld [vmem:[#allocation7 + $0x358] sm:$0xff]  ;;  %v2284_v49 = vld [vmem:[#allocation7 + $0x340] sm:$0xff] }
 0x1e9   :  { %2130 = vmatpush1.msra.mxu0 %v380_v50  ;;  %2076 = vmatprep.subr.mxu1 %v309_v54  ;;  %v2286_v50 = vld [vmem:[#allocation7 + $0x350] sm:$0xff]  ;;  %v2277_v54 = vld [vmem:[#allocation7 + $0x308] sm:$0xff] }
 0x1ea   :  { %2131 = vmatprep.subr.mxu0 %v373_v51  ;;  %2077 = vmatpush2.msra.mxu1 %v308_v53  ;;  %v2279_v51 = vld [vmem:[#allocation7 + $0x318] sm:$0xff]  ;;  %v2276_v53 = vld [vmem:[#allocation7 + $0x300] sm:$0xff] }
 0x1eb   :  { %2132 = vmatpush1.msra.mxu0 %v372_v55  ;;  %2078 = vmatprep.subr.mxu1 %v301_v56  ;;  %v2278_v55 = vld [vmem:[#allocation7 + $0x310] sm:$0xff]  ;;  %v2269_v56 = vld [vmem:[#allocation7 + $0x2c8] sm:$0xff] }
 0x1ec   :  { %2133 = vmatprep.subr.mxu0 %v365_v57  ;;  %2079 = vmatpush2.msra.mxu1 %v300_v58  ;;  %v2271_v57 = vld [vmem:[#allocation7 + $0x2d8] sm:$0xff]  ;;  %v2268_v58 = vld [vmem:[#allocation7 + $0x2c0] sm:$0xff] }
 0x1ed   :  { %2134 = vmatpush1.msra.mxu0 %v364_v59  ;;  %2080 = vmatprep.subr.mxu1 %v293_v1  ;;  %v2270_v59 = vld [vmem:[#allocation7 + $0x2d0] sm:$0xff]  ;;  %v2261_v1 = vld [vmem:[#allocation7 + $0x288] sm:$0xff] }
 0x1ee   :  { %2135 = vmatprep.subr.mxu0 %v357_v60  ;;  %2081 = vmatpush2.msra.mxu1 %v292_v3  ;;  %v2263_v60 = vld [vmem:[#allocation7 + $0x298] sm:$0xff]  ;;  %v2260_v3 = vld [vmem:[#allocation7 + $0x280] sm:$0xff] }
 0x1ef   :  { %2136 = vmatpush1.msra.mxu0 %v356_v61  ;;  %2082 = vmatprep.subr.mxu1 %v285_v62  ;;  %v2262_v61 = vld [vmem:[#allocation7 + $0x290] sm:$0xff]  ;;  %v2253_v62 = vld [vmem:[#allocation7 + $0x248] sm:$0xff] }
 0x1f0   :  { %2137 = vmatprep.subr.mxu0 %v349_v63  ;;  %2083 = vmatpush2.msra.mxu1 %v284_v0  ;;  %v2255_v63 = vld [vmem:[#allocation7 + $0x258] sm:$0xff]  ;;  %v2252_v0 = vld [vmem:[#allocation7 + $0x240] sm:$0xff] }
 0x1f1   :  { %2138 = vmatpush1.msra.mxu0 %v348_v2  ;;  %2084 = vmatprep.subr.mxu1 %v277_v4  ;;  %v2254_v2 = vld [vmem:[#allocation7 + $0x250] sm:$0xff]  ;;  %v2245_v4 = vld [vmem:[#allocation7 + $0x208] sm:$0xff] }
 0x1f2   :  { %3020 = vmatprep.subr.msk.mxu0 %vm990_vm0, %v533_v5  ;;  %2085 = vmatpush2.msra.mxu1 %v276_v6  ;;  %v2247_v5 = vld [vmem:[#allocation7 + $0x218] sm:$0xff]  ;;  %v2244_v6 = vld [vmem:[#allocation7 + $0x200] sm:$0xff] }
 0x1f3   :  { %3021 = vmatpush2.msk.msra.mxu0 %vm990_vm0, %v532_v7  ;;  %2086 = vmatprep.subr.mxu1 %v269_v8  ;;  %v2246_v7 = vld [vmem:[#allocation7 + $0x210] sm:$0xff]  ;;  %v2237_v8 = vld [vmem:[#allocation7 + $0x1c8] sm:$0xff] }
 0x1f4   :  { %2157 = vmatprep.subr.mxu0 %v525_v9  ;;  %2087 = vmatpush2.msra.mxu1 %v268_v10  ;;  %v2239_v9 = vld [vmem:[#allocation7 + $0x1d8] sm:$0xff]  ;;  %v2236_v10 = vld [vmem:[#allocation7 + $0x1c0] sm:$0xff] }
 0x1f5   :  { %2158 = vmatpush2.msra.mxu0 %v524_v11  ;;  %2088 = vmatprep.subr.mxu1 %v261_v12  ;;  %v2238_v11 = vld [vmem:[#allocation7 + $0x1d0] sm:$0xff]  ;;  %v2229_v12 = vld [vmem:[#allocation7 + $0x188] sm:$0xff] }
 0x1f6   :  { %2159 = vmatprep.subr.mxu0 %v517_v13  ;;  %2089 = vmatpush2.msra.mxu1 %v260_v14  ;;  %v2231_v13 = vld [vmem:[#allocation7 + $0x198] sm:$0xff]  ;;  %v2228_v14 = vld [vmem:[#allocation7 + $0x180] sm:$0xff] }
 0x1f7   :  { %2160 = vmatpush2.msra.mxu0 %v516_v15  ;;  %2090 = vmatprep.subr.mxu1 %v253_v21  ;;  %v2230_v15 = vld [vmem:[#allocation7 + $0x190] sm:$0xff]  ;;  %v2221_v21 = vld [vmem:[#allocation7 + $0x148] sm:$0xff] }
 0x1f8   :  { %2161 = vmatprep.subr.mxu0 %v509_v16  ;;  %2091 = vmatpush2.msra.mxu1 %v252_v23  ;;  %v2223_v16 = vld [vmem:[#allocation7 + $0x158] sm:$0xff]  ;;  %v2220_v23 = vld [vmem:[#allocation7 + $0x140] sm:$0xff] }
 0x1f9   :  { %2162 = vmatpush2.msra.mxu0 %v508_v17  ;;  %2092 = vmatprep.subr.mxu1 %v245_v18  ;;  %v2222_v17 = vld [vmem:[#allocation7 + $0x150] sm:$0xff]  ;;  %v2213_v18 = vld [vmem:[#allocation7 + $0x108] sm:$0xff] }
 0x1fa   :  { %2163 = vmatprep.subr.mxu0 %v501_v19  ;;  %2093 = vmatpush2.msra.mxu1 %v244_v20  ;;  %v2215_v19 = vld [vmem:[#allocation7 + $0x118] sm:$0xff]  ;;  %v2212_v20 = vld [vmem:[#allocation7 + $0x100] sm:$0xff] }
 0x1fb   :  { %2164 = vmatpush2.msra.mxu0 %v500_v22  ;;  %2094 = vmatprep.subr.mxu1 %v237_v24  ;;  %v2214_v22 = vld [vmem:[#allocation7 + $0x110] sm:$0xff]  ;;  %v2205_v24 = vld [vmem:[#allocation7 + $0xc8] sm:$0xff] }
 0x1fc   :  { %2165 = vmatprep.subr.mxu0 %v493_v25  ;;  %2095 = vmatpush2.msra.mxu1 %v236_v26  ;;  %v2207_v25 = vld [vmem:[#allocation7 + $0xd8] sm:$0xff]  ;;  %v2204_v26 = vld [vmem:[#allocation7 + $0xc0] sm:$0xff] }
 0x1fd   :  { %2166 = vmatpush2.msra.mxu0 %v492_v27  ;;  %2096 = vmatprep.subr.mxu1 %v229_v28  ;;  %v2206_v27 = vld [vmem:[#allocation7 + $0xd0] sm:$0xff]  ;;  %v2197_v28 = vld [vmem:[#allocation7 + $0x88] sm:$0xff] }
 0x1fe   :  { %2167 = vmatprep.subr.mxu0 %v485_v32  ;;  %2097 = vmatpush2.msra.mxu1 %v228_v29  ;;  %v2199_v32 = vld [vmem:[#allocation7 + $0x98] sm:$0xff]  ;;  %v2196_v29 = vld [vmem:[#allocation7 + $0x80] sm:$0xff] }
 0x1ff   :  { %2168 = vmatpush2.msra.mxu0 %v484_v30  ;;  %2098 = vmatprep.subr.mxu1 %v221_v34  ;;  %v2198_v30 = vld [vmem:[#allocation7 + $0x90] sm:$0xff]  ;;  %v2189_v34 = vld [vmem:[#allocation7 + $0x48] sm:$0xff] }
 0x200   :  { %2169 = vmatprep.subr.mxu0 %v477_v31  ;;  %2099 = vmatpush2.msra.mxu1 %v220_v33  ;;  %v2191_v31 = vld [vmem:[#allocation7 + $0x58] sm:$0xff]  ;;  %v2188_v33 = vld [vmem:[#allocation7 + $0x40] sm:$0xff] }
 0x201   :  { %2100 = vmatprep.mubr.f32.mxu1 %v3116_v36  ;;  %2170 = vmatpush2.msra.mxu0 %v476_v35  ;;  %v2190_v35 = vld [vmem:[#allocation7 + $0x50] sm:$0xff]  ;;  %v2181_v36 = vld [vmem:[#allocation7 + $0x8] sm:$0xff] }
 0x202   :  { %3022 = vmatprep.mubr.msk.f32.mxu0 %vm986_vm1, %v3117_v39  ;;  %2101 = vmatmul.mubr.f32.vlgmr.msra.gmra.mxu1 %v3118_v42  ;;  %v2182_v39 = vld [vmem:[#allocation7 + $0x10] sm:$0xff]  ;;  %v2428_v42 = vld [vmem:[#allocation7 + $0x7c0] sm:$0xff] }
 0x203   :  { %2172 = vmatmul.mubr.f32.vlgmr.msra.gmra.mxu0 %v3119_v43  ;;  %2436 = vmatprep.subr.mxu0 %v2301_v37  ;;  %v2183_v37 = vld [vmem:[#allocation7 + $0x18] sm:$0xff]  ;;  %v2430_v43 = vld [vmem:[#allocation7 + $0x7d0] sm:$0xff] }
 0x204   :  { %2507 = vmatprep.subr.mxu1 %v2303_v38  ;;  %2437 = vmatpush1.msra.mxu0 %v2300_v40  ;;  %v2180_v38 = vld [vmem:[#allocation7] sm:$0xff]  ;;  %v2429_v40 = vld [vmem:[#allocation7 + $0x7c8] sm:$0xff] }
 0x205   :  { %2508 = vmatpush1.msra.mxu1 %v2302_v41  ;;  %2438 = vmatprep.subr.mxu0 %v2293_v44  ;;  %v2431_v41 = vld [vmem:[#allocation7 + $0x7d8] sm:$0xff]  ;;  %v2421_v44 = vld [vmem:[#allocation7 + $0x788] sm:$0xff] }
 0x206   :  { %2509 = vmatprep.subr.mxu1 %v2295_v45  ;;  %2439 = vmatpush1.msra.mxu0 %v2292_v46  ;;  %v2423_v45 = vld [vmem:[#allocation7 + $0x798] sm:$0xff]  ;;  %v2420_v46 = vld [vmem:[#allocation7 + $0x780] sm:$0xff] }
 0x207   :  { %2510 = vmatpush1.msra.mxu1 %v2294_v47  ;;  %2440 = vmatprep.subr.mxu0 %v2285_v48  ;;  %v2422_v47 = vld [vmem:[#allocation7 + $0x790] sm:$0xff]  ;;  %v2413_v48 = vld [vmem:[#allocation7 + $0x748] sm:$0xff] }
 0x208   :  { %2511 = vmatprep.subr.mxu1 %v2287_v52  ;;  %2441 = vmatpush1.msra.mxu0 %v2284_v49  ;;  %v2415_v52 = vld [vmem:[#allocation7 + $0x758] sm:$0xff]  ;;  %v2412_v49 = vld [vmem:[#allocation7 + $0x740] sm:$0xff] }
 0x209   :  { %2512 = vmatpush1.msra.mxu1 %v2286_v50  ;;  %2442 = vmatprep.subr.mxu0 %v2277_v54  ;;  %v2414_v50 = vld [vmem:[#allocation7 + $0x750] sm:$0xff]  ;;  %v2405_v54 = vld [vmem:[#allocation7 + $0x708] sm:$0xff] }
 0x20a   :  { %2513 = vmatprep.subr.mxu1 %v2279_v51  ;;  %2443 = vmatpush1.msra.mxu0 %v2276_v53  ;;  %v2407_v51 = vld [vmem:[#allocation7 + $0x718] sm:$0xff]  ;;  %v2404_v53 = vld [vmem:[#allocation7 + $0x700] sm:$0xff] }
 0x20b   :  { %2514 = vmatpush1.msra.mxu1 %v2278_v55  ;;  %2444 = vmatprep.subr.mxu0 %v2269_v56  ;;  %v2406_v55 = vld [vmem:[#allocation7 + $0x710] sm:$0xff]  ;;  %v2397_v56 = vld [vmem:[#allocation7 + $0x6c8] sm:$0xff] }
 0x20c   :  { %2515 = vmatprep.subr.mxu1 %v2271_v57  ;;  %2445 = vmatpush1.msra.mxu0 %v2268_v58  ;;  %v2399_v57 = vld [vmem:[#allocation7 + $0x6d8] sm:$0xff]  ;;  %v2396_v58 = vld [vmem:[#allocation7 + $0x6c0] sm:$0xff] }
 0x20d   :  { %2516 = vmatpush1.msra.mxu1 %v2270_v59  ;;  %2446 = vmatprep.subr.mxu0 %v2261_v1  ;;  %v2398_v59 = vld [vmem:[#allocation7 + $0x6d0] sm:$0xff]  ;;  %v2389_v1 = vld [vmem:[#allocation7 + $0x688] sm:$0xff] }
 0x20e   :  { %2517 = vmatprep.subr.mxu1 %v2263_v60  ;;  %2447 = vmatpush1.msra.mxu0 %v2260_v3  ;;  %v2391_v60 = vld [vmem:[#allocation7 + $0x698] sm:$0xff]  ;;  %v2388_v3 = vld [vmem:[#allocation7 + $0x680] sm:$0xff] }
 0x20f   :  { %2518 = vmatpush1.msra.mxu1 %v2262_v61  ;;  %2448 = vmatprep.subr.mxu0 %v2253_v62  ;;  %v2390_v61 = vld [vmem:[#allocation7 + $0x690] sm:$0xff]  ;;  %v2381_v62 = vld [vmem:[#allocation7 + $0x648] sm:$0xff] }
 0x210   :  { %2519 = vmatprep.subr.mxu1 %v2255_v63  ;;  %2449 = vmatpush1.msra.mxu0 %v2252_v0  ;;  %v2383_v63 = vld [vmem:[#allocation7 + $0x658] sm:$0xff]  ;;  %v2380_v0 = vld [vmem:[#allocation7 + $0x640] sm:$0xff] }
 0x211   :  { %2520 = vmatpush1.msra.mxu1 %v2254_v2  ;;  %2450 = vmatprep.subr.mxu0 %v2245_v4  ;;  %v2382_v2 = vld [vmem:[#allocation7 + $0x650] sm:$0xff]  ;;  %v2373_v4 = vld [vmem:[#allocation7 + $0x608] sm:$0xff] }
 0x212   :  { %2521 = vmatprep.subr.mxu1 %v2247_v5  ;;  %2451 = vmatpush1.msra.mxu0 %v2244_v6  ;;  %v2375_v5 = vld [vmem:[#allocation7 + $0x618] sm:$0xff]  ;;  %v2372_v6 = vld [vmem:[#allocation7 + $0x600] sm:$0xff] }
 0x213   :  { %2522 = vmatpush1.msra.mxu1 %v2246_v7  ;;  %2452 = vmatprep.subr.mxu0 %v2237_v8  ;;  %v2374_v7 = vld [vmem:[#allocation7 + $0x610] sm:$0xff]  ;;  %v2365_v8 = vld [vmem:[#allocation7 + $0x5c8] sm:$0xff] }
 0x214   :  { %2523 = vmatprep.subr.mxu1 %v2239_v9  ;;  %2453 = vmatpush1.msra.mxu0 %v2236_v10  ;;  %v2367_v9 = vld [vmem:[#allocation7 + $0x5d8] sm:$0xff]  ;;  %v2364_v10 = vld [vmem:[#allocation7 + $0x5c0] sm:$0xff] }
 0x215   :  { %2524 = vmatpush1.msra.mxu1 %v2238_v11  ;;  %2454 = vmatprep.subr.mxu0 %v2229_v12  ;;  %v2366_v11 = vld [vmem:[#allocation7 + $0x5d0] sm:$0xff]  ;;  %v2357_v12 = vld [vmem:[#allocation7 + $0x588] sm:$0xff] }
 0x216   :  { %2525 = vmatprep.subr.mxu1 %v2231_v13  ;;  %2455 = vmatpush1.msra.mxu0 %v2228_v14  ;;  %v2359_v13 = vld [vmem:[#allocation7 + $0x598] sm:$0xff]  ;;  %v2356_v14 = vld [vmem:[#allocation7 + $0x580] sm:$0xff] }
 0x217   :  { %2526 = vmatpush1.msra.mxu1 %v2230_v15  ;;  %2456 = vmatprep.subr.mxu0 %v2221_v21  ;;  %v2358_v15 = vld [vmem:[#allocation7 + $0x590] sm:$0xff]  ;;  %v2349_v21 = vld [vmem:[#allocation7 + $0x548] sm:$0xff] }
 0x218   :  { %2527 = vmatprep.subr.mxu1 %v2223_v16  ;;  %2457 = vmatpush1.msra.mxu0 %v2220_v23  ;;  %v2351_v16 = vld [vmem:[#allocation7 + $0x558] sm:$0xff]  ;;  %v2348_v23 = vld [vmem:[#allocation7 + $0x540] sm:$0xff] }
 0x219   :  { %2528 = vmatpush1.msra.mxu1 %v2222_v17  ;;  %2458 = vmatprep.subr.mxu0 %v2213_v18  ;;  %v2350_v17 = vld [vmem:[#allocation7 + $0x550] sm:$0xff]  ;;  %v2341_v18 = vld [vmem:[#allocation7 + $0x508] sm:$0xff] }
 0x21a   :  { %2529 = vmatprep.subr.mxu1 %v2215_v19  ;;  %2459 = vmatpush1.msra.mxu0 %v2212_v20  ;;  %v2343_v19 = vld [vmem:[#allocation7 + $0x518] sm:$0xff]  ;;  %v2340_v20 = vld [vmem:[#allocation7 + $0x500] sm:$0xff] }
 0x21b   :  { %2530 = vmatpush1.msra.mxu1 %v2214_v22  ;;  %2460 = vmatprep.subr.mxu0 %v2205_v24  ;;  %v2342_v22 = vld [vmem:[#allocation7 + $0x510] sm:$0xff]  ;;  %v2333_v24 = vld [vmem:[#allocation7 + $0x4c8] sm:$0xff] }
 0x21c   :  { %2531 = vmatprep.subr.mxu1 %v2207_v25  ;;  %2461 = vmatpush1.msra.mxu0 %v2204_v26  ;;  %v2335_v25 = vld [vmem:[#allocation7 + $0x4d8] sm:$0xff]  ;;  %v2332_v26 = vld [vmem:[#allocation7 + $0x4c0] sm:$0xff] }
 0x21d   :  { %2532 = vmatpush1.msra.mxu1 %v2206_v27  ;;  %2462 = vmatprep.subr.mxu0 %v2197_v28  ;;  %v2334_v27 = vld [vmem:[#allocation7 + $0x4d0] sm:$0xff]  ;;  %v2325_v28 = vld [vmem:[#allocation7 + $0x488] sm:$0xff] }
 0x21e   :  { %2533 = vmatprep.subr.mxu1 %v2199_v32  ;;  %2463 = vmatpush1.msra.mxu0 %v2196_v29  ;;  %v2327_v32 = vld [vmem:[#allocation7 + $0x498] sm:$0xff]  ;;  %v2324_v29 = vld [vmem:[#allocation7 + $0x480] sm:$0xff] }
 0x21f   :  { %2534 = vmatpush1.msra.mxu1 %v2198_v30  ;;  %2464 = vmatprep.subr.mxu0 %v2189_v34  ;;  %v2326_v30 = vld [vmem:[#allocation7 + $0x490] sm:$0xff]  ;;  %v2317_v34 = vld [vmem:[#allocation7 + $0x448] sm:$0xff] }
 0x220   :  { %2535 = vmatprep.subr.mxu1 %v2191_v31  ;;  %2465 = vmatpush1.msra.mxu0 %v2188_v33  ;;  %v2319_v31 = vld [vmem:[#allocation7 + $0x458] sm:$0xff]  ;;  %v2316_v33 = vld [vmem:[#allocation7 + $0x440] sm:$0xff] }
 0x221   :  { %2536 = vmatpush1.msra.mxu1 %v2190_v35  ;;  %2466 = vmatprep.subr.mxu0 %v2181_v36  ;;  %v2318_v35 = vld [vmem:[#allocation7 + $0x450] sm:$0xff]  ;;  %v2309_v36 = vld [vmem:[#allocation7 + $0x408] sm:$0xff] }
 0x222   :  { %2537 = vmatprep.subr.mxu1 %v2183_v37  ;;  %2467 = vmatpush1.msra.mxu0 %v2180_v38  ;;  %v2311_v37 = vld [vmem:[#allocation7 + $0x418] sm:$0xff]  ;;  %v2308_v38 = vld [vmem:[#allocation7 + $0x400] sm:$0xff] }
 0x223   :  { %2538 = vmatpush1.msra.mxu1 %v2182_v39  ;;  %2468 = vmatprep.subr.mxu0 %v2429_v40  ;;  %v3404_v39 = vld [vmem:[%s3425_s2 + $0x8] sm:$0xff]  ;;  %v2310_v40 = vld [vmem:[#allocation7 + $0x410] sm:$0xff] }
 0x224   :  { %2539 = vmatprep.subr.mxu1 %v2431_v41  ;;  %2469 = vmatpush2.msra.mxu0 %v2428_v42  ;;  %v3409_v41 = vld [vmem:[%s3425_s2] sm:$0xff]  ;;  %v2305_v42 = vld [vmem:[#allocation7 + $0x3e8] sm:$0xff]  ;;  %s3236_s2 = smov [#allocation10]  }
 0x225   :  { %2540 = vmatpush2.msra.mxu1 %v2430_v43  ;;  %2470 = vmatprep.subr.mxu0 %v2421_v44  ;;  %v2307_v43 = vld [vmem:[#allocation7 + $0x3f8] sm:$0xff]  ;;  %v2304_v44 = vld [vmem:[#allocation7 + $0x3e0] sm:$0xff]  ;;  %s2988_s28 = sshll.u32 %s3236_s2, 4  ;;  %s2989_s28 = int_to_ptr.vmem [resolvable:$true] %s2988_s28 }
 0x226   :  { %2541 = vmatprep.subr.mxu1 %v2423_v45  ;;  %2471 = vmatpush2.msra.mxu0 %v2420_v46  ;;  %v2306_v45 = vld [vmem:[#allocation7 + $0x3f0] sm:$0xff]  ;;  %v2297_v46 = vld [vmem:[#allocation7 + $0x3a8] sm:$0xff]  ;;  %s3200_s29 = scalar_lea.vmem %s2989_s28, 128  ;;  %p3205_p7 = scmp.lt.s32.totalorder %s2989_s28, %s2989_s28 }
 0x227   :  { %2542 = vmatpush2.msra.mxu1 %v2422_v47  ;;  %2472 = vmatprep.subr.mxu0 %v2413_v48  ;;  %v2299_v47 = vld [vmem:[#allocation7 + $0x3b8] sm:$0xff]  ;;  %v2296_v48 = vld [vmem:[#allocation7 + $0x3a0] sm:$0xff]  ;;  %p3201_p6 = scmp.ne.s32.totalorder %s2989_s28, %s3200_s29  ;;  %p3206_p8 = scmp.lt.s32.totalorder %s3200_s29, %s3200_s29 }
 0x228   :  { %2543 = vmatprep.subr.mxu1 %v2415_v52  ;;  %2473 = vmatpush2.msra.mxu0 %v2412_v49  ;;  %v2298_v52 = vld [vmem:[#allocation7 + $0x3b0] sm:$0xff]  ;;  %v2289_v49 = vld [vmem:[#allocation7 + $0x368] sm:$0xff] }
 0x229   :  { %2544 = vmatpush2.msra.mxu1 %v2414_v50  ;;  %2474 = vmatprep.subr.mxu0 %v2405_v54  ;;  %v2291_v50 = vld [vmem:[#allocation7 + $0x378] sm:$0xff]  ;;  %v2288_v54 = vld [vmem:[#allocation7 + $0x360] sm:$0xff]  ;;  %p3207_p9 = por %p3206_p8, %p3205_p7 }
 0x22a   :  { %2545 = vmatprep.subr.mxu1 %v2407_v51  ;;  %2475 = vmatpush2.msra.mxu0 %v2404_v53  ;;  %v2290_v51 = vld [vmem:[#allocation7 + $0x370] sm:$0xff]  ;;  %v2281_v53 = vld [vmem:[#allocation7 + $0x328] sm:$0xff] }
 0x22b   :  { %2546 = vmatpush2.msra.mxu1 %v2406_v55  ;;  %2476 = vmatprep.subr.mxu0 %v2397_v56  ;;  %v2283_v55 = vld [vmem:[#allocation7 + $0x338] sm:$0xff]  ;;  %v2280_v56 = vld [vmem:[#allocation7 + $0x320] sm:$0xff]  ;;  %p3208_p10 = pnand %p3207_p9, %p3201_p6 }
 0x22c   :  { %2547 = vmatprep.subr.mxu1 %v2399_v57  ;;  %2477 = vmatpush2.msra.mxu0 %v2396_v58  ;;  %v2282_v57 = vld [vmem:[#allocation7 + $0x330] sm:$0xff]  ;;  %v2273_v58 = vld [vmem:[#allocation7 + $0x2e8] sm:$0xff] }
 0x22d   :  { %2548 = vmatpush2.msra.mxu1 %v2398_v59  ;;  %2478 = vmatprep.subr.mxu0 %v2389_v1  ;;  %v2275_v59 = vld [vmem:[#allocation7 + $0x2f8] sm:$0xff]  ;;  %v2272_v1 = vld [vmem:[#allocation7 + $0x2e0] sm:$0xff] }
 0x22e   :  { %2549 = vmatprep.subr.mxu1 %v2391_v60  ;;  %2479 = vmatpush2.msra.mxu0 %v2388_v3  ;;  %v2274_v60 = vld [vmem:[#allocation7 + $0x2f0] sm:$0xff]  ;;  %v2265_v3 = vld [vmem:[#allocation7 + $0x2a8] sm:$0xff] }
 0x22f   :  { %2550 = vmatpush2.msra.mxu1 %v2390_v61  ;;  %2480 = vmatprep.subr.mxu0 %v2381_v62  ;;  %v2267_v61 = vld [vmem:[#allocation7 + $0x2b8] sm:$0xff]  ;;  %v2264_v62 = vld [vmem:[#allocation7 + $0x2a0] sm:$0xff] }
 0x230   :  { %2551 = vmatprep.subr.mxu1 %v2383_v63  ;;  %2481 = vmatpush2.msra.mxu0 %v2380_v0  ;;  %v2266_v63 = vld [vmem:[#allocation7 + $0x2b0] sm:$0xff]  ;;  %v2257_v0 = vld [vmem:[#allocation7 + $0x268] sm:$0xff] }
 0x231   :  { %2552 = vmatpush2.msra.mxu1 %v2382_v2  ;;  %2482 = vmatprep.subr.mxu0 %v2373_v4  ;;  %v2259_v2 = vld [vmem:[#allocation7 + $0x278] sm:$0xff]  ;;  %v2256_v4 = vld [vmem:[#allocation7 + $0x260] sm:$0xff] }
 0x232   :  { %2553 = vmatprep.subr.mxu1 %v2375_v5  ;;  %2483 = vmatpush2.msra.mxu0 %v2372_v6  ;;  %v2258_v5 = vld [vmem:[#allocation7 + $0x270] sm:$0xff]  ;;  %v2249_v6 = vld [vmem:[#allocation7 + $0x228] sm:$0xff] }
 0x233   :  { %2554 = vmatpush2.msra.mxu1 %v2374_v7  ;;  %2484 = vmatprep.subr.mxu0 %v2365_v8  ;;  %v2251_v7 = vld [vmem:[#allocation7 + $0x238] sm:$0xff]  ;;  %v2248_v8 = vld [vmem:[#allocation7 + $0x220] sm:$0xff] }
 0x234   :  { %2555 = vmatprep.subr.mxu1 %v2367_v9  ;;  %2485 = vmatpush2.msra.mxu0 %v2364_v10  ;;  %v2250_v9 = vld [vmem:[#allocation7 + $0x230] sm:$0xff]  ;;  %v2241_v10 = vld [vmem:[#allocation7 + $0x1e8] sm:$0xff] }
 0x235   :  { %2556 = vmatpush2.msra.mxu1 %v2366_v11  ;;  %2486 = vmatprep.subr.mxu0 %v2357_v12  ;;  %v2243_v11 = vld [vmem:[#allocation7 + $0x1f8] sm:$0xff]  ;;  %v2240_v12 = vld [vmem:[#allocation7 + $0x1e0] sm:$0xff] }
 0x236   :  { %2557 = vmatprep.subr.mxu1 %v2359_v13  ;;  %2487 = vmatpush2.msra.mxu0 %v2356_v14  ;;  %v2242_v13 = vld [vmem:[#allocation7 + $0x1f0] sm:$0xff]  ;;  %v2233_v14 = vld [vmem:[#allocation7 + $0x1a8] sm:$0xff] }
 0x237   :  { %2558 = vmatpush2.msra.mxu1 %v2358_v15  ;;  %2488 = vmatprep.subr.mxu0 %v2349_v21  ;;  %v2235_v15 = vld [vmem:[#allocation7 + $0x1b8] sm:$0xff]  ;;  %v2232_v21 = vld [vmem:[#allocation7 + $0x1a0] sm:$0xff] }
 0x238   :  { %2559 = vmatprep.subr.mxu1 %v2351_v16  ;;  %2489 = vmatpush2.msra.mxu0 %v2348_v23  ;;  %v2234_v16 = vld [vmem:[#allocation7 + $0x1b0] sm:$0xff]  ;;  %v2225_v23 = vld [vmem:[#allocation7 + $0x168] sm:$0xff] }
 0x239   :  { %2560 = vmatpush2.msra.mxu1 %v2350_v17  ;;  %2490 = vmatprep.subr.mxu0 %v2341_v18  ;;  %v2227_v17 = vld [vmem:[#allocation7 + $0x178] sm:$0xff]  ;;  %v2224_v18 = vld [vmem:[#allocation7 + $0x160] sm:$0xff] }
 0x23a   :  { %2561 = vmatprep.subr.mxu1 %v2343_v19  ;;  %2491 = vmatpush2.msra.mxu0 %v2340_v20  ;;  %v2226_v19 = vld [vmem:[#allocation7 + $0x170] sm:$0xff]  ;;  %v2217_v20 = vld [vmem:[#allocation7 + $0x128] sm:$0xff] }
 0x23b   :  { %2562 = vmatpush2.msra.mxu1 %v2342_v22  ;;  %2492 = vmatprep.subr.mxu0 %v2333_v24  ;;  %v2219_v22 = vld [vmem:[#allocation7 + $0x138] sm:$0xff]  ;;  %v2216_v24 = vld [vmem:[#allocation7 + $0x120] sm:$0xff] }
 0x23c   :  { %2563 = vmatprep.subr.mxu1 %v2335_v25  ;;  %2493 = vmatpush2.msra.mxu0 %v2332_v26  ;;  %v2218_v25 = vld [vmem:[#allocation7 + $0x130] sm:$0xff]  ;;  %v2209_v26 = vld [vmem:[#allocation7 + $0xe8] sm:$0xff] }
 0x23d   :  { %2564 = vmatpush2.msra.mxu1 %v2334_v27  ;;  %2494 = vmatprep.subr.mxu0 %v2325_v28  ;;  %v2211_v27 = vld [vmem:[#allocation7 + $0xf8] sm:$0xff]  ;;  %v2208_v28 = vld [vmem:[#allocation7 + $0xe0] sm:$0xff] }
 0x23e   :  { %2565 = vmatprep.subr.mxu1 %v2327_v32  ;;  %2495 = vmatpush2.msra.mxu0 %v2324_v29  ;;  %v2210_v32 = vld [vmem:[#allocation7 + $0xf0] sm:$0xff]  ;;  %v2201_v29 = vld [vmem:[#allocation7 + $0xa8] sm:$0xff] }
 0x23f   :  { %2566 = vmatpush2.msra.mxu1 %v2326_v30  ;;  %2496 = vmatprep.subr.mxu0 %v2317_v34  ;;  %v2203_v30 = vld [vmem:[#allocation7 + $0xb8] sm:$0xff]  ;;  %v2200_v34 = vld [vmem:[#allocation7 + $0xa0] sm:$0xff] }
 0x240   :  { %2567 = vmatprep.subr.mxu1 %v2319_v31  ;;  %2497 = vmatpush2.msra.mxu0 %v2316_v33  ;;  %v2202_v31 = vld [vmem:[#allocation7 + $0xb0] sm:$0xff]  ;;  %v2193_v33 = vld [vmem:[#allocation7 + $0x68] sm:$0xff] }
 0x241   :  { %2568 = vmatpush2.msra.mxu1 %v2318_v35  ;;  %2498 = vmatprep.subr.mxu0 %v2309_v36  ;;  %v2195_v35 = vld [vmem:[#allocation7 + $0x78] sm:$0xff]  ;;  %v2192_v36 = vld [vmem:[#allocation7 + $0x60] sm:$0xff] }
 0x242   :  { %2569 = vmatprep.subr.mxu1 %v2311_v37  ;;  %2499 = vmatpush2.msra.mxu0 %v2308_v38  ;;  %v2194_v37 = vld [vmem:[#allocation7 + $0x70] sm:$0xff]  ;;  %v2185_v38 = vld [vmem:[#allocation7 + $0x28] sm:$0xff] }
 0x243   :  { %2500 = vmatprep.mubr.f32.mxu0 %v3404_v39  ;;  %2570 = vmatpush2.msra.mxu1 %v2310_v40  ;;  %v2187_v40 = vld [vmem:[#allocation7 + $0x38] sm:$0xff] }
 0x244   :  { %2571 = vmatprep.mubr.f32.mxu1 %v3404_v39  ;;  %2501 = vmatmul.mubr.f32.vlgmr.msra.gmra.mxu0 %v3409_v41 }
 0x245   :  { %2572 = vmatmul.mubr.f32.vlgmr.msra.gmra.mxu1 %v3409_v41  ;;  %2578 = vmatprep.subr.mxu0 %v2305_v42  ;;  %v2184_v42 = vld [vmem:[#allocation7 + $0x20] sm:$0xff] }
 0x246   :  { %2649 = vmatprep.subr.mxu1 %v2307_v43  ;;  %2579 = vmatpush1.msra.mxu0 %v2304_v44  ;;  %v2186_v43 = vld [vmem:[#allocation7 + $0x30] sm:$0xff]  ;;  %v2433_v44 = vld [vmem:[#allocation7 + $0x7e8] sm:$0xff] }
 0x247   :  { %2650 = vmatpush1.msra.mxu1 %v2306_v45  ;;  %2580 = vmatprep.subr.mxu0 %v2297_v46  ;;  %v2435_v45 = vld [vmem:[#allocation7 + $0x7f8] sm:$0xff]  ;;  %v2432_v46 = vld [vmem:[#allocation7 + $0x7e0] sm:$0xff] }
 0x248   :  { %2651 = vmatprep.subr.mxu1 %v2299_v47  ;;  %2581 = vmatpush1.msra.mxu0 %v2296_v48  ;;  %v2434_v47 = vld [vmem:[#allocation7 + $0x7f0] sm:$0xff]  ;;  %v2425_v48 = vld [vmem:[#allocation7 + $0x7a8] sm:$0xff] }
 0x249   :  { %2652 = vmatpush1.msra.mxu1 %v2298_v52  ;;  %2582 = vmatprep.subr.mxu0 %v2289_v49  ;;  %v2427_v52 = vld [vmem:[#allocation7 + $0x7b8] sm:$0xff]  ;;  %v2424_v49 = vld [vmem:[#allocation7 + $0x7a0] sm:$0xff] }
 0x24a   :  { %2653 = vmatprep.subr.mxu1 %v2291_v50  ;;  %2583 = vmatpush1.msra.mxu0 %v2288_v54  ;;  %v2426_v50 = vld [vmem:[#allocation7 + $0x7b0] sm:$0xff]  ;;  %v2417_v54 = vld [vmem:[#allocation7 + $0x768] sm:$0xff] }
 0x24b   :  { %2654 = vmatpush1.msra.mxu1 %v2290_v51  ;;  %2584 = vmatprep.subr.mxu0 %v2281_v53  ;;  %v2419_v51 = vld [vmem:[#allocation7 + $0x778] sm:$0xff]  ;;  %v2416_v53 = vld [vmem:[#allocation7 + $0x760] sm:$0xff] }
 0x24c   :  { %2655 = vmatprep.subr.mxu1 %v2283_v55  ;;  %2585 = vmatpush1.msra.mxu0 %v2280_v56  ;;  %v2418_v55 = vld [vmem:[#allocation7 + $0x770] sm:$0xff]  ;;  %v2409_v56 = vld [vmem:[#allocation7 + $0x728] sm:$0xff] }
 0x24d   :  { %2656 = vmatpush1.msra.mxu1 %v2282_v57  ;;  %2586 = vmatprep.subr.mxu0 %v2273_v58  ;;  %v2411_v57 = vld [vmem:[#allocation7 + $0x738] sm:$0xff]  ;;  %v2408_v58 = vld [vmem:[#allocation7 + $0x720] sm:$0xff] }
 0x24e   :  { %2657 = vmatprep.subr.mxu1 %v2275_v59  ;;  %2587 = vmatpush1.msra.mxu0 %v2272_v1  ;;  %v2410_v59 = vld [vmem:[#allocation7 + $0x730] sm:$0xff]  ;;  %v2401_v1 = vld [vmem:[#allocation7 + $0x6e8] sm:$0xff] }
 0x24f   :  { %2658 = vmatpush1.msra.mxu1 %v2274_v60  ;;  %2588 = vmatprep.subr.mxu0 %v2265_v3  ;;  %v2403_v60 = vld [vmem:[#allocation7 + $0x6f8] sm:$0xff]  ;;  %v2400_v3 = vld [vmem:[#allocation7 + $0x6e0] sm:$0xff] }
 0x250   :  { %2659 = vmatprep.subr.mxu1 %v2267_v61  ;;  %2589 = vmatpush1.msra.mxu0 %v2264_v62  ;;  %v2402_v61 = vld [vmem:[#allocation7 + $0x6f0] sm:$0xff]  ;;  %v2393_v62 = vld [vmem:[#allocation7 + $0x6a8] sm:$0xff] }
 0x251   :  { %2660 = vmatpush1.msra.mxu1 %v2266_v63  ;;  %2590 = vmatprep.subr.mxu0 %v2257_v0  ;;  %v2395_v63 = vld [vmem:[#allocation7 + $0x6b8] sm:$0xff]  ;;  %v2392_v0 = vld [vmem:[#allocation7 + $0x6a0] sm:$0xff] }
 0x252   :  { %2661 = vmatprep.subr.mxu1 %v2259_v2  ;;  %2591 = vmatpush1.msra.mxu0 %v2256_v4  ;;  %v2394_v2 = vld [vmem:[#allocation7 + $0x6b0] sm:$0xff]  ;;  %v2385_v4 = vld [vmem:[#allocation7 + $0x668] sm:$0xff] }
 0x253   :  { %2662 = vmatpush1.msra.mxu1 %v2258_v5  ;;  %2592 = vmatprep.subr.mxu0 %v2249_v6  ;;  %v2387_v5 = vld [vmem:[#allocation7 + $0x678] sm:$0xff]  ;;  %v2384_v6 = vld [vmem:[#allocation7 + $0x660] sm:$0xff] }
 0x254   :  { %2663 = vmatprep.subr.mxu1 %v2251_v7  ;;  %2593 = vmatpush1.msra.mxu0 %v2248_v8  ;;  %v2386_v7 = vld [vmem:[#allocation7 + $0x670] sm:$0xff]  ;;  %v2377_v8 = vld [vmem:[#allocation7 + $0x628] sm:$0xff] }
 0x255   :  { %2664 = vmatpush1.msra.mxu1 %v2250_v9  ;;  %2594 = vmatprep.subr.mxu0 %v2241_v10  ;;  %v2379_v9 = vld [vmem:[#allocation7 + $0x638] sm:$0xff]  ;;  %v2376_v10 = vld [vmem:[#allocation7 + $0x620] sm:$0xff] }
 0x256   :  { %2665 = vmatprep.subr.mxu1 %v2243_v11  ;;  %2595 = vmatpush1.msra.mxu0 %v2240_v12  ;;  %v2378_v11 = vld [vmem:[#allocation7 + $0x630] sm:$0xff]  ;;  %v2369_v12 = vld [vmem:[#allocation7 + $0x5e8] sm:$0xff] }
 0x257   :  { %2666 = vmatpush1.msra.mxu1 %v2242_v13  ;;  %2596 = vmatprep.subr.mxu0 %v2233_v14  ;;  %v2371_v13 = vld [vmem:[#allocation7 + $0x5f8] sm:$0xff]  ;;  %v2368_v14 = vld [vmem:[#allocation7 + $0x5e0] sm:$0xff] }
 0x258   :  { %2667 = vmatprep.subr.mxu1 %v2235_v15  ;;  %2597 = vmatpush1.msra.mxu0 %v2232_v21  ;;  %v2370_v15 = vld [vmem:[#allocation7 + $0x5f0] sm:$0xff]  ;;  %v2361_v21 = vld [vmem:[#allocation7 + $0x5a8] sm:$0xff] }
 0x259   :  { %2668 = vmatpush1.msra.mxu1 %v2234_v16  ;;  %2598 = vmatprep.subr.mxu0 %v2225_v23  ;;  %v2363_v16 = vld [vmem:[#allocation7 + $0x5b8] sm:$0xff]  ;;  %v2360_v23 = vld [vmem:[#allocation7 + $0x5a0] sm:$0xff] }
 0x25a   :  { %2669 = vmatprep.subr.mxu1 %v2227_v17  ;;  %2599 = vmatpush1.msra.mxu0 %v2224_v18  ;;  %v2362_v17 = vld [vmem:[#allocation7 + $0x5b0] sm:$0xff]  ;;  %v2353_v18 = vld [vmem:[#allocation7 + $0x568] sm:$0xff] }
 0x25b   :  { %2670 = vmatpush1.msra.mxu1 %v2226_v19  ;;  %2600 = vmatprep.subr.mxu0 %v2217_v20  ;;  %v2355_v19 = vld [vmem:[#allocation7 + $0x578] sm:$0xff]  ;;  %v2352_v20 = vld [vmem:[#allocation7 + $0x560] sm:$0xff] }
 0x25c   :  { %2671 = vmatprep.subr.mxu1 %v2219_v22  ;;  %2601 = vmatpush1.msra.mxu0 %v2216_v24  ;;  %v2354_v22 = vld [vmem:[#allocation7 + $0x570] sm:$0xff]  ;;  %v2345_v24 = vld [vmem:[#allocation7 + $0x528] sm:$0xff] }
 0x25d   :  { %2672 = vmatpush1.msra.mxu1 %v2218_v25  ;;  %2602 = vmatprep.subr.mxu0 %v2209_v26  ;;  %v2347_v25 = vld [vmem:[#allocation7 + $0x538] sm:$0xff]  ;;  %v2344_v26 = vld [vmem:[#allocation7 + $0x520] sm:$0xff] }
 0x25e   :  { %2673 = vmatprep.subr.mxu1 %v2211_v27  ;;  %2603 = vmatpush1.msra.mxu0 %v2208_v28  ;;  %v2346_v27 = vld [vmem:[#allocation7 + $0x530] sm:$0xff]  ;;  %v2337_v28 = vld [vmem:[#allocation7 + $0x4e8] sm:$0xff] }
 0x25f   :  { %2674 = vmatpush1.msra.mxu1 %v2210_v32  ;;  %2604 = vmatprep.subr.mxu0 %v2201_v29  ;;  %v2339_v32 = vld [vmem:[#allocation7 + $0x4f8] sm:$0xff]  ;;  %v2336_v29 = vld [vmem:[#allocation7 + $0x4e0] sm:$0xff] }
 0x260   :  { %2675 = vmatprep.subr.mxu1 %v2203_v30  ;;  %2605 = vmatpush1.msra.mxu0 %v2200_v34  ;;  %v2338_v30 = vld [vmem:[#allocation7 + $0x4f0] sm:$0xff]  ;;  %v2329_v34 = vld [vmem:[#allocation7 + $0x4a8] sm:$0xff] }
 0x261   :  { %2676 = vmatpush1.msra.mxu1 %v2202_v31  ;;  %2606 = vmatprep.subr.mxu0 %v2193_v33  ;;  %v2331_v31 = vld [vmem:[#allocation7 + $0x4b8] sm:$0xff]  ;;  %v2328_v33 = vld [vmem:[#allocation7 + $0x4a0] sm:$0xff] }
 0x262   :  { %2677 = vmatprep.subr.mxu1 %v2195_v35  ;;  %2607 = vmatpush1.msra.mxu0 %v2192_v36  ;;  %v2330_v35 = vld [vmem:[#allocation7 + $0x4b0] sm:$0xff]  ;;  %v2321_v36 = vld [vmem:[#allocation7 + $0x468] sm:$0xff] }
 0x263   :  { %2678 = vmatpush1.msra.mxu1 %v2194_v37  ;;  %2608 = vmatprep.subr.mxu0 %v2185_v38  ;;  %v2323_v37 = vld [vmem:[#allocation7 + $0x478] sm:$0xff]  ;;  %v2320_v38 = vld [vmem:[#allocation7 + $0x460] sm:$0xff] }
 0x264   :  { %2679 = vmatprep.subr.mxu1 %v2187_v40  ;;  %2609 = vmatpush1.msra.mxu0 %v2184_v42  ;;  %v2322_v40 = vld [vmem:[#allocation7 + $0x470] sm:$0xff]  ;;  %v2313_v42 = vld [vmem:[#allocation7 + $0x428] sm:$0xff] }
 0x265   :  { %2680 = vmatpush1.msra.mxu1 %v2186_v43  ;;  %2610 = vmatprep.subr.mxu0 %v2433_v44  ;;  %v2315_v43 = vld [vmem:[#allocation7 + $0x438] sm:$0xff]  ;;  %v2312_v44 = vld [vmem:[#allocation7 + $0x420] sm:$0xff] }
 0x266   :  { %2681 = vmatprep.subr.mxu1 %v2435_v45  ;;  %2611 = vmatpush2.msra.mxu0 %v2432_v46  ;;  %v2314_v45 = vld [vmem:[#allocation7 + $0x430] sm:$0xff]  ;;  %v2799_v46 = vld [vmem:[#allocation8 + $0xf8] sm:$0xff] }
 0x267   :  { %2682 = vmatpush2.msra.mxu1 %v2434_v47  ;;  %2612 = vmatprep.subr.mxu0 %v2425_v48  ;;  %v2831_v47 = vld [vmem:[#allocation8 + $0x1f8] sm:$0xff] }
 0x268   :  { %2683 = vmatprep.subr.mxu1 %v2427_v52  ;;  %2613 = vmatpush2.msra.mxu0 %v2424_v49  ;;  %v2783_v48 = vld [vmem:[#allocation8 + $0x78] sm:$0xff]  ;;  %v2798_v49 = vld [vmem:[#allocation8 + $0xf0] sm:$0xff] }
 0x269   :  { %2684 = vmatpush2.msra.mxu1 %v2426_v50  ;;  %2614 = vmatprep.subr.mxu0 %v2417_v54  ;;  %v2815_v52 = vld [vmem:[#allocation8 + $0x178] sm:$0xff]  ;;  %v2830_v50 = vld [vmem:[#allocation8 + $0x1f0] sm:$0xff] }
 0x26a   :  { %2685 = vmatprep.subr.mxu1 %v2419_v51  ;;  %2615 = vmatpush2.msra.mxu0 %v2416_v53  ;;  %v2782_v54 = vld [vmem:[#allocation8 + $0x70] sm:$0xff]  ;;  %v2829_v53 = vld [vmem:[#allocation8 + $0x1e8] sm:$0xff] }
 0x26b   :  { %2686 = vmatpush2.msra.mxu1 %v2418_v55  ;;  %2616 = vmatprep.subr.mxu0 %v2409_v56  ;;  %v2814_v51 = vld [vmem:[#allocation8 + $0x170] sm:$0xff]  ;;  %v2813_v55 = vld [vmem:[#allocation8 + $0x168] sm:$0xff]  ;;  %v2796_v56 = vld [vmem:[#allocation8 + $0xe0] sm:$0xff] }
 0x26c   :  { %2687 = vmatprep.subr.mxu1 %v2411_v57  ;;  %2617 = vmatpush2.msra.mxu0 %v2408_v58  ;;  %v2828_v57 = vld [vmem:[#allocation8 + $0x1e0] sm:$0xff] }
 0x26d   :  { %2688 = vmatpush2.msra.mxu1 %v2410_v59  ;;  %2618 = vmatprep.subr.mxu0 %v2401_v1  ;;  %v2780_v58 = vld [vmem:[#allocation8 + $0x60] sm:$0xff]  ;;  %v2795_v1 = vld [vmem:[#allocation8 + $0xd8] sm:$0xff] }
 0x26e   :  { %2689 = vmatprep.subr.mxu1 %v2403_v60  ;;  %2619 = vmatpush2.msra.mxu0 %v2400_v3  ;;  %v2812_v59 = vld [vmem:[#allocation8 + $0x160] sm:$0xff]  ;;  %v2827_v60 = vld [vmem:[#allocation8 + $0x1d8] sm:$0xff] }
 0x26f   :  { %2690 = vmatpush2.msra.mxu1 %v2402_v61  ;;  %2620 = vmatprep.subr.mxu0 %v2393_v62  ;;  %v2779_v3 = vld [vmem:[#allocation8 + $0x58] sm:$0xff]  ;;  %v2794_v62 = vld [vmem:[#allocation8 + $0xd0] sm:$0xff] }
 0x270   :  { %2691 = vmatprep.subr.mxu1 %v2395_v63  ;;  %2621 = vmatpush2.msra.mxu0 %v2392_v0  ;;  %v2811_v61 = vld [vmem:[#allocation8 + $0x158] sm:$0xff]  ;;  %v2826_v63 = vld [vmem:[#allocation8 + $0x1d0] sm:$0xff] }
 0x271   :  { %2692 = vmatpush2.msra.mxu1 %v2394_v2  ;;  %2622 = vmatprep.subr.mxu0 %v2385_v4  ;;  %v2778_v0 = vld [vmem:[#allocation8 + $0x50] sm:$0xff]  ;;  %v2793_v4 = vld [vmem:[#allocation8 + $0xc8] sm:$0xff] }
 0x272   :  { %2693 = vmatprep.subr.mxu1 %v2387_v5  ;;  %2623 = vmatpush2.msra.mxu0 %v2384_v6  ;;  %v2810_v2 = vld [vmem:[#allocation8 + $0x150] sm:$0xff]  ;;  %v2825_v5 = vld [vmem:[#allocation8 + $0x1c8] sm:$0xff] }
 0x273   :  { %2694 = vmatpush2.msra.mxu1 %v2386_v7  ;;  %2624 = vmatprep.subr.mxu0 %v2377_v8  ;;  %v2777_v6 = vld [vmem:[#allocation8 + $0x48] sm:$0xff]  ;;  %v2792_v8 = vld [vmem:[#allocation8 + $0xc0] sm:$0xff] }
 0x274   :  { %2695 = vmatprep.subr.mxu1 %v2379_v9  ;;  %2625 = vmatpush2.msra.mxu0 %v2376_v10  ;;  %v2809_v7 = vld [vmem:[#allocation8 + $0x148] sm:$0xff]  ;;  %v2824_v9 = vld [vmem:[#allocation8 + $0x1c0] sm:$0xff] }
 0x275   :  { %2696 = vmatpush2.msra.mxu1 %v2378_v11  ;;  %2626 = vmatprep.subr.mxu0 %v2369_v12  ;;  %v2776_v10 = vld [vmem:[#allocation8 + $0x40] sm:$0xff]  ;;  %v2791_v12 = vld [vmem:[#allocation8 + $0xb8] sm:$0xff] }
 0x276   :  { %2697 = vmatprep.subr.mxu1 %v2371_v13  ;;  %2627 = vmatpush2.msra.mxu0 %v2368_v14  ;;  %v2808_v11 = vld [vmem:[#allocation8 + $0x140] sm:$0xff]  ;;  %v2823_v13 = vld [vmem:[#allocation8 + $0x1b8] sm:$0xff] }
 0x277   :  { %2698 = vmatpush2.msra.mxu1 %v2370_v15  ;;  %2628 = vmatprep.subr.mxu0 %v2361_v21  ;;  %v2775_v14 = vld [vmem:[#allocation8 + $0x38] sm:$0xff]  ;;  %v2790_v21 = vld [vmem:[#allocation8 + $0xb0] sm:$0xff] }
 0x278   :  { %2699 = vmatprep.subr.mxu1 %v2363_v16  ;;  %2629 = vmatpush2.msra.mxu0 %v2360_v23  ;;  %v2807_v15 = vld [vmem:[#allocation8 + $0x138] sm:$0xff]  ;;  %v2822_v16 = vld [vmem:[#allocation8 + $0x1b0] sm:$0xff] }
 0x279   :  { %2700 = vmatpush2.msra.mxu1 %v2362_v17  ;;  %2630 = vmatprep.subr.mxu0 %v2353_v18  ;;  %v2774_v23 = vld [vmem:[#allocation8 + $0x30] sm:$0xff]  ;;  %v2789_v18 = vld [vmem:[#allocation8 + $0xa8] sm:$0xff] }
 0x27a   :  { %2701 = vmatprep.subr.mxu1 %v2355_v19  ;;  %2631 = vmatpush2.msra.mxu0 %v2352_v20  ;;  %v2806_v17 = vld [vmem:[#allocation8 + $0x130] sm:$0xff]  ;;  %v2821_v19 = vld [vmem:[#allocation8 + $0x1a8] sm:$0xff] }
 0x27b   :  { %2702 = vmatpush2.msra.mxu1 %v2354_v22  ;;  %2632 = vmatprep.subr.mxu0 %v2345_v24  ;;  %v2773_v20 = vld [vmem:[#allocation8 + $0x28] sm:$0xff]  ;;  %v2788_v24 = vld [vmem:[#allocation8 + $0xa0] sm:$0xff] }
 0x27c   :  { %2703 = vmatprep.subr.mxu1 %v2347_v25  ;;  %2633 = vmatpush2.msra.mxu0 %v2344_v26  ;;  %v2805_v22 = vld [vmem:[#allocation8 + $0x128] sm:$0xff]  ;;  %v2820_v25 = vld [vmem:[#allocation8 + $0x1a0] sm:$0xff] }
 0x27d   :  { %2704 = vmatpush2.msra.mxu1 %v2346_v27  ;;  %2634 = vmatprep.subr.mxu0 %v2337_v28  ;;  %v2772_v26 = vld [vmem:[#allocation8 + $0x20] sm:$0xff]  ;;  %v2787_v28 = vld [vmem:[#allocation8 + $0x98] sm:$0xff] }
 0x27e   :  { %2705 = vmatprep.subr.mxu1 %v2339_v32  ;;  %2635 = vmatpush2.msra.mxu0 %v2336_v29  ;;  %v2804_v27 = vld [vmem:[#allocation8 + $0x120] sm:$0xff]  ;;  %v2819_v32 = vld [vmem:[#allocation8 + $0x198] sm:$0xff] }
 0x27f   :  { %2706 = vmatpush2.msra.mxu1 %v2338_v30  ;;  %2636 = vmatprep.subr.mxu0 %v2329_v34  ;;  %v2771_v29 = vld [vmem:[#allocation8 + $0x18] sm:$0xff]  ;;  %v2786_v34 = vld [vmem:[#allocation8 + $0x90] sm:$0xff] }
 0x280   :  { %2707 = vmatprep.subr.mxu1 %v2331_v31  ;;  %2637 = vmatpush2.msra.mxu0 %v2328_v33  ;;  %v2803_v30 = vld [vmem:[#allocation8 + $0x118] sm:$0xff]  ;;  %v2818_v31 = vld [vmem:[#allocation8 + $0x190] sm:$0xff] }
 0x281   :  { %2708 = vmatpush2.msra.mxu1 %v2330_v35  ;;  %2638 = vmatprep.subr.mxu0 %v2321_v36  ;;  %v2770_v33 = vld [vmem:[#allocation8 + $0x10] sm:$0xff]  ;;  %v2785_v36 = vld [vmem:[#allocation8 + $0x88] sm:$0xff] }
 0x282   :  { %2709 = vmatprep.subr.mxu1 %v2323_v37  ;;  %2639 = vmatpush2.msra.mxu0 %v2320_v38  ;;  %v2802_v35 = vld [vmem:[#allocation8 + $0x110] sm:$0xff]  ;;  %v2817_v37 = vld [vmem:[#allocation8 + $0x188] sm:$0xff] }
 0x283   :  { %2710 = vmatpush2.msra.mxu1 %v2322_v40  ;;  %2640 = vmatprep.subr.mxu0 %v2313_v42  ;;  %v2769_v38 = vld [vmem:[#allocation8 + $0x8] sm:$0xff]  ;;  %v2784_v42 = vld [vmem:[#allocation8 + $0x80] sm:$0xff] }
 0x284   :  { %2711 = vmatprep.subr.mxu1 %v2315_v43  ;;  %2641 = vmatpush2.msra.mxu0 %v2312_v44  ;;  %v2801_v40 = vld [vmem:[#allocation8 + $0x108] sm:$0xff]  ;;  %v2816_v43 = vld [vmem:[#allocation8 + $0x180] sm:$0xff] }
 0x285   :  { %2642 = vmatprep.mubr.f32.mxu0 %v3404_v39  ;;  %2712 = vmatpush2.msra.mxu1 %v2314_v45  ;;  %v2768_v44 = vld [vmem:[#allocation8] sm:$0xff] }
 0x286   :  { %2713 = vmatprep.mubr.f32.mxu1 %v3404_v39  ;;  %2643 = vmatmul.mubr.f32.vlgmr.msra.gmra.mxu0 %v3409_v41  ;;  %v2797_v39 = vld [vmem:[#allocation8 + $0xe8] sm:$0xff]  ;;  %v2800_v45 = vld [vmem:[#allocation8 + $0x100] sm:$0xff] }
 0x287   :  { %2714 = vmatmul.mubr.f32.vlgmr.msra.gmra.mxu1 %v3409_v41  ;;  %3023 = vmatprep.subr.mxu0 %v2799_v46  ;;  %v2781_v41 = vld [vmem:[#allocation8 + $0x68] sm:$0xff]  ;;  %v1152_v46 = vpop.f32.mrf.mxu1 }
 0x288   :  { %3058 = vmatprep.subr.mxu1 %v2831_v47  ;;  %3024 = vmatpush3.msra.mxu0 %v2783_v48  ;;  %v1081_v47 = vpop.f32.mrf.mxu0 }
 0x289   :  { %3059 = vmatpush3.msra.mxu1 %v2815_v52  ;;  %3025 = vmatprep.subr.mxu0 %v2798_v49  ;;  %v1154_v48 = vpop.f32.mrf.mxu1 }
 0x28a   :  { %3060 = vmatprep.subr.mxu1 %v2830_v50  ;;  %3026 = vmatpush3.msra.mxu0 %v2782_v54  ;;  %v1083_v52 = vpop.f32.mrf.mxu0 }
 0x28b   :  { %3061 = vmatpush3.msra.mxu1 %v2814_v51  ;;  %3027 = vmatprep.subr.mxu0 %v2797_v39  ;;  %v1223_v49 = vpop.f32.mrf.mxu1 }
 0x28c   :  { %3062 = vmatprep.subr.mxu1 %v2829_v53  ;;  %3028 = vmatpush3.msra.mxu0 %v2781_v41  ;;  %v1294_v50 = vpop.f32.mrf.mxu0 }
 0x28d   :  { %3063 = vmatpush3.msra.mxu1 %v2813_v55  ;;  %3029 = vmatprep.subr.mxu0 %v2796_v56  ;;  %v1225_v54 = vpop.f32.mrf.mxu1 }
 0x28e   :  { %3064 = vmatprep.subr.mxu1 %v2828_v57  ;;  %3030 = vmatpush3.msra.mxu0 %v2780_v58  ;;  %v1296_v51 = vpop.f32.mrf.mxu0 }
 0x28f   :  { %3065 = vmatpush3.msra.mxu1 %v2812_v59  ;;  %3031 = vmatprep.subr.mxu0 %v2795_v1  ;;  %v1436_v39 = vpop.f32.mrf.mxu1 }
 0x290   :  { %3066 = vmatprep.subr.mxu1 %v2827_v60  ;;  %3032 = vmatpush3.msra.mxu0 %v2779_v3  ;;  %v1365_v53 = vpop.f32.mrf.mxu0 }
 0x291   :  { %3067 = vmatpush3.msra.mxu1 %v2811_v61  ;;  %3033 = vmatprep.subr.mxu0 %v2794_v62  ;;  %v1438_v41 = vpop.f32.mrf.mxu1 }
 0x292   :  { %3068 = vmatprep.subr.mxu1 %v2826_v63  ;;  %3034 = vmatpush3.msra.mxu0 %v2778_v0  ;;  %v1367_v55 = vpop.f32.mrf.mxu0 }
 0x293   :  { %3069 = vmatpush3.msra.mxu1 %v2810_v2  ;;  %3035 = vmatprep.subr.mxu0 %v2793_v4  ;;  %v1507_v56 = vpop.f32.mrf.mxu1 }
 0x294   :  { %3070 = vmatprep.subr.mxu1 %v2825_v5  ;;  %3036 = vmatpush3.msra.mxu0 %v2777_v6  ;;  %v1578_v57 = vpop.f32.mrf.mxu0 }
 0x295   :  { %3071 = vmatpush3.msra.mxu1 %v2809_v7  ;;  %3037 = vmatprep.subr.mxu0 %v2792_v8  ;;  %v1509_v58 = vpop.f32.mrf.mxu1 }
 0x296   :  { %3072 = vmatprep.subr.mxu1 %v2824_v9  ;;  %3038 = vmatpush3.msra.mxu0 %v2776_v10  ;;  %v1580_v59 = vpop.f32.mrf.mxu0  ;;  %v1153_v10 = vadd.f32 %v1152_v46, %v1081_v47 }
 0x297   :  { %3073 = vmatpush3.msra.mxu1 %v2808_v11  ;;  %3039 = vmatprep.subr.mxu0 %v2791_v12  ;;  %v1747_v1 = vpop.f32.mrf.mxu1  ;;  %v1295_v11 = vadd.f32 %v1294_v50, %v1223_v49 }
 0x298   :  { %3074 = vmatprep.subr.mxu1 %v2823_v13  ;;  %3040 = vmatpush3.msra.mxu0 %v2775_v14  ;;  %v1676_v60 = vpop.f32.mrf.mxu0  ;;  %v1155_v14 = vadd.f32 %v1154_v48, %v1083_v52 }
 0x299   :  { %3075 = vmatpush3.msra.mxu1 %v2807_v15  ;;  %3041 = vmatprep.subr.mxu0 %v2790_v21  ;;  %v1749_v3 = vpop.f32.mrf.mxu1  ;;  %v1297_v15 = vadd.f32 %v1296_v51, %v1225_v54  ;;  %v1677_v21 = vadd.f32 %v1676_v60, %v1153_v10 }
 0x29a   :  { %3076 = vmatprep.subr.mxu1 %v2822_v16  ;;  %3042 = vmatpush3.msra.mxu0 %v2774_v23  ;;  %v1678_v61 = vpop.f32.mrf.mxu0  ;;  %v1437_v23 = vadd.f32 %v1436_v39, %v1365_v53 }
 0x29b   :  { %3077 = vmatpush3.msra.mxu1 %v2806_v17  ;;  %3043 = vmatprep.subr.mxu0 %v2789_v18  ;;  %v1818_v62 = vpop.f32.mrf.mxu1  ;;  %v1579_v17 = vadd.f32 %v1578_v57, %v1507_v56 }
 0x29c   :  { %3078 = vmatprep.subr.mxu1 %v2821_v19  ;;  %3044 = vmatpush3.msra.mxu0 %v2773_v20  ;;  %v1889_v63 = vpop.f32.mrf.mxu0  ;;  %v1819_v16 = vadd.f32 %v1818_v62, %v1295_v11  ;;  %v1679_v20 = vadd.f32 %v1678_v61, %v1155_v14 }
 0x29d   :  { %3079 = vmatpush3.msra.mxu1 %v2805_v22  ;;  %3045 = vmatprep.subr.mxu0 %v2788_v24  ;;  %v1820_v0 = vpop.f32.mrf.mxu1  ;;  %v1439_v24 = vadd.f32 %v1438_v41, %v1367_v55 }
 0x29e   :  { %3080 = vmatprep.subr.mxu1 %v2820_v25  ;;  %3046 = vmatpush3.msra.mxu0 %v2772_v26  ;;  %v1891_v2 = vpop.f32.mrf.mxu0  ;;  %v1821_v22 = vadd.f32 %v1820_v0, %v1297_v15  ;;  %v1581_v25 = vadd.f32 %v1580_v59, %v1509_v58 }
 0x29f   :  { %3081 = vmatpush3.msra.mxu1 %v2804_v27  ;;  %3047 = vmatprep.subr.mxu0 %v2787_v28  ;;  %v2031_v4 = vpop.f32.mrf.mxu1  ;;  %v1890_v28 = vadd.f32 %v1889_v63, %v1819_v16 }
 0x2a0   :  { %3082 = vmatprep.subr.mxu1 %v2819_v32  ;;  %3048 = vmatpush3.msra.mxu0 %v2771_v29  ;;  %v1960_v5 = vpop.f32.mrf.mxu0  ;;  %v1748_v32 = vadd.f32 %v1747_v1, %v1677_v21 }
 0x2a1   :  { %3083 = vmatpush3.msra.mxu1 %v2803_v30  ;;  %3049 = vmatprep.subr.mxu0 %v2786_v34  ;;  %v2033_v6 = vpop.f32.mrf.mxu1  ;;  %v1961_v26 = vadd.f32 %v1960_v5, %v1437_v23 }
 0x2a2   :  { %3084 = vmatprep.subr.mxu1 %v2818_v31  ;;  %3050 = vmatpush3.msra.mxu0 %v2770_v33  ;;  %v1962_v7 = vpop.f32.mrf.mxu0  ;;  %v1892_v33 = vadd.f32 %v1891_v2, %v1821_v22 }
 0x2a3   :  { %3085 = vmatpush3.msra.mxu1 %v2802_v35  ;;  %3051 = vmatprep.subr.mxu0 %v2785_v36  ;;  %v1963_v29 = vadd.f32 %v1962_v7, %v1439_v24 }
 0x2a4   :  { %3086 = vmatprep.subr.mxu1 %v2817_v37  ;;  %3052 = vmatpush3.msra.mxu0 %v2769_v38  ;;  %v1750_v37 = vadd.f32 %v1749_v3, %v1679_v20 }
 0x2a5   :  { %3087 = vmatpush3.msra.mxu1 %v2801_v40  ;;  %3053 = vmatprep.subr.mxu0 %v2784_v42  ;;  %v2032_v40 = vadd.f32 %v2031_v4, %v1961_v26  ;;  %v2034_v52 = vadd.f32 %v2033_v6, %v1963_v29 }
 0x2a6   :  { %3088 = vmatprep.subr.mxu1 %v2816_v43  ;;  %3054 = vmatpush3.msra.mxu0 %v2768_v44 }
 0x2a7   :  { %3089 = vmatpush3.msra.mxu1 %v2800_v45 }
 0x2c2   :  { %v2102_v8 = vpop.f32.mrf.mxu1 }
 0x2c3   :  { %v2173_v9 = vpop.f32.mrf.mxu0  ;;  %v2103_v27 = vadd.f32 %v2102_v8, %v1579_v17 }
 0x2c4   :  { %v2104_v12 = vpop.f32.mrf.mxu1 }
 0x2c5   :  { %v2175_v13 = vpop.f32.mrf.mxu0  ;;  %v2105_v30 = vadd.f32 %v2104_v12, %v1581_v25  ;;  %v2174_v38 = vadd.f32 %v2173_v9, %v2103_v27 }
 0x2c7   :  { %v2176_v46 = vadd.f32 %v2175_v13, %v2105_v30 }
 0x304   :  { %v2502_v18 = vpop.f32.mrf.mxu0 }
 0x305   :  { %v2573_v19 = vpop.f32.mrf.mxu1  ;;  %v2720_v35 = vadd.f32 %v2502_v18, %v1748_v32 }
 0x306   :  { %v2504_v34 = vpop.f32.mrf.mxu0  ;;  %v2722_v36 = vadd.f32 %v2573_v19, %v1890_v28 }
 0x307   :  { %v2575_v31 = vpop.f32.mrf.mxu1  ;;  %v2721_v42 = vadd.f32 %v2504_v34, %v1750_v37  ;;  %v2728_v49 = vmul.f32 %v2720_v35, %v2720_v35 }
 0x308   :  { %v2723_v43 = vadd.f32 %v2575_v31, %v1892_v33  ;;  %v2730_v50 = vmul.f32 %v2722_v36, %v2722_v36 }
 0x309   :  { %v2729_v56 = vmul.f32 %v2721_v42, %v2721_v42 }
 0x30a   :  { %v2731_v57 = vmul.f32 %v2723_v43, %v2723_v43 }
 0x346   :  { %v2644_v44 = vpop.f32.mrf.mxu0 }
 0x347   :  { %v2715_v45 = vpop.f32.mrf.mxu1  ;;  %v2724_v47 = vadd.f32 %v2644_v44, %v2032_v40 }
 0x348   :  { %v2726_v48 = vadd.f32 %v2715_v45, %v2174_v38  ;;  %v2646_v54 = vpop.f32.mrf.mxu0 }
 0x349   :  { %v2717_v51 = vpop.f32.mrf.mxu1  ;;  %v2732_v39 = vmul.f32 %v2724_v47, %v2724_v47  ;;  %v2725_v41 = vadd.f32 %v2646_v54, %v2034_v52 }
 0x34a   :  { %v2734_v53 = vmul.f32 %v2726_v48, %v2726_v48  ;;  %v2727_v55 = vadd.f32 %v2717_v51, %v2176_v46 }
 0x34b   :  { %v2736_v58 = vadd.f32 %v2732_v39, %v2728_v49  ;;  %v2733_v1 = vmul.f32 %v2725_v41, %v2725_v41 }
 0x34c   :  { %v2738_v59 = vadd.f32 %v2734_v53, %v2730_v50  ;;  %v2735_v60 = vmul.f32 %v2727_v55, %v2727_v55 }
 0x34d   :  { %3102 = vrsqrt.f32 %v2736_v58  ;;  %v2737_v3 = vadd.f32 %v2733_v1, %v2729_v56  ;;  %vm2742_vm2 = vcmp.eq.f32.partialorder %v2736_v58, inf  ;;  %vm2744_vm3 = vcmp.eq.f32.partialorder %v2736_v58, 0.0 }
 0x34e   :  { %v2739_v61 = vadd.f32 %v2735_v60, %v2731_v57  ;;  %3104 = vrsqrt.f32 %v2738_v59  ;;  %v2745_v7 = vand.u32 2147483648, %v2736_v58  ;;  %vm2756_vm5 = vcmp.eq.f32.partialorder %v2738_v59, inf }
 0x34f   :  { %3106 = vrsqrt.f32 %v2737_v3  ;;  %vm2749_vm4 = vcmp.eq.f32.partialorder %v2737_v3, inf  ;;  %vm2751_vm6 = vcmp.eq.f32.partialorder %v2737_v3, 0.0  ;;  %v2752_v8 = vand.u32 2147483648, %v2737_v3 }
 0x350   :  { %3108 = vrsqrt.f32 %v2739_v61  ;;  %vm2763_vm7 = vcmp.eq.f32.partialorder %v2739_v61, inf  ;;  %v2766_v12 = vand.u32 2147483648, %v2739_v61  ;;  %vm2765_vm8 = vcmp.eq.f32.partialorder %v2739_v61, 0.0 }
 0x351   :  { %v2759_v21 = vand.u32 2147483648, %v2738_v59  ;;  %vm2758_vm9 = vcmp.eq.f32.partialorder %v2738_v59, 0.0 }
 0x35a   :  { %v3103_v62 = vpop.eup %3102 }
 0x35b   :  { %v3105_v63 = vpop.eup %3104  ;;  %v2741_v0 = vmul.f32 %v3103_v62, %v2736_v58 }
 0x35c   :  { %v3107_v2 = vpop.eup %3106  ;;  %v2755_v4 = vmul.f32 %v3105_v63, %v2738_v59 }
 0x35d   :  { %v3109_v5 = vpop.eup %3108  ;;  %v2748_v6 = vmul.f32 %v3107_v2, %v2737_v3  ;;  %v2743_v10 = vsel %vm2742_vm2, %v2736_v58, %v2741_v0 }
 0x35e   :  { %v2762_v9 = vmul.f32 %v3109_v5, %v2739_v61  ;;  %v2757_v13 = vsel %vm2756_vm5, %v2738_v59, %v2755_v4  ;;  %v2746_v23 = vsel %vm2744_vm3, %v2745_v7, %v2743_v10 }
 0x35f   :  { %v2750_v11 = vsel %vm2749_vm4, %v2737_v3, %v2748_v6  ;;  %v2760_v17 = vsel %vm2758_vm9, %v2759_v21, %v2757_v13 }
 0x360   :  { %v2753_v14 = vsel %vm2751_vm6, %v2752_v8, %v2750_v11  ;;  %v2764_v15 = vsel %vm2763_vm7, %v2739_v61, %v2762_v9 }
 0x361   :  { %2896 = vmatprep.mubr.f32.mxu0 %v2753_v14  ;;  %v2767_v16 = vsel %vm2765_vm8, %v2766_v12, %v2764_v15 }
 0x362   :  { %2966 = vmatprep.mubr.f32.mxu1 %v2767_v16  ;;  %2897 = vmatmul.mubr.f32.vlgmr.msra.gmra.mxu0 %v2746_v23 }
 0x363   :  { %2967 = vmatmul.mubr.f32.vlgmr.msra.gmra.mxu1 %v2760_v17 }
 0x422   :  { %v3055_v18 = vpop.f32.mrf.mxu0 }
 0x423   :  { %v3090_v19 = vpop.f32.mrf.mxu1 }
 0x424   :  { %v3056_v20 = vpop.f32.mrf.mxu0 }
 0x425   :  { %v3057_v22 = vadd.f32 %v3056_v20, %v3055_v18  ;;  %v3091_v24 = vpop.f32.mrf.mxu1 }
 0x426   :  { %v3092_v25 = vadd.f32 %v3091_v24, %v3090_v19 }
 0x428   :  { %v2969_v26 = vadd.f32 %v3092_v25, %v3057_v22 }
 0x42a   :  { %v2972_v27 = vadd.f32 1.0, %v2969_v26  ;;  %v2975_v28 = vmul.f32 -0.5, %v2969_v26  ;;  %v2978_v29 = vand.u32 2147483647, %v2969_v26 }
 0x42c   :  { %3110 = vlog2.f32 %v2972_v27  ;;  %v2976_v32 = vadd.f32 1.0, %v2975_v28  ;;  %vm2979_vm10 = vcmp.lt.f32.partialorder %v2978_v29, 0.0004427343 }
 0x42e   :  { %v2977_v31 = vmul.f32 %v2976_v32, %v2969_v26 }
 0x439   :  { %v3111_v30 = vpop.eup %3110 }
 0x43a   :  { %v2974_v34 = vmul.f32 0.6931472, %v3111_v30 }
 0x43c   :  { %v2980_v33 = vsel %vm2979_vm10, %v2977_v31, %v2974_v34 }
 0x43d   :  { %2981 = vst [vmem:[#allocation10] sm:$0xff] %v2980_v33 }
 0x43e   :  { %3211 = shalt.err (!%p3208_p10)
}
 0x43f   :  { %2991 = dma.vmem_to_hbm [thread:$0]  %s2989_s28, 128, %s3430_s7, [#allocation4]  }
 0x440   :  { %3226 = dma.done.wait [#allocation4], 128  }
 0x441   :  { %3227 = vsyncadd [#allocation4], 4294967168 }
 0x442   :  { %2995 = vsyncpa [#allocation3], 1 }
 0x443   :  { %2996 = vsyncpa [#allocation6], 1 }
 0x444   :  { %2997 = vsyncpa [#allocation9], 1 }
 0x445   :  { %2998 = vsyncpa [#allocation4], 1 }

</bundles_post_ra>
